<compile_context>
chip_gen: v7x
topology: tpu7x:2x2x1
jax: 0.10.0
libtpu: 0.0.40
codegen_flags: <defaults>
</compile_context>

<pallas_src>
import functools
import math

import jax
import jax.numpy as jnp
from jax.experimental import pallas as pl
from jax.experimental.pallas import tpu as pltpu

LN_EPS = 1e-5  # nn.LayerNorm default


# ----------------------------------------------------------------------------
# Kernel 1: fused stack of PyTorch TransformerEncoderLayers (post-norm, ReLU
# FFN) for all modalities.  Grid = (modality, layer).  The output block (same
# block index across the layer axis) is the layer-to-layer activation carry.
# ----------------------------------------------------------------------------
def _encoder_stack_kernel(
    x_ref,                           # (1, S, E)   f32   input sequence (per modality)
    in_w_ref, in_b_ref,              # (1, E, 3E) bf16 / (1, 1, 3E) f32   MHA in_proj
    out_w_ref, out_b_ref,            # (1, E, E)  bf16 / (1, 1, E)  f32   MHA out_proj
    lin1_w_ref, lin1_b_ref,          # (1, E, FF) bf16 / (1, 1, FF) f32
    lin2_w_ref, lin2_b_ref,          # (1, FF, E) bf16 / (1, 1, E)  f32
    ln1_w_ref, ln1_b_ref,            # (1, 1, E) f32
    ln2_w_ref, ln2_b_ref,            # (1, 1, E) f32
    o_ref,                           # (1, S, E) f32   resident carry + final output
    *, num_heads,
):
    l = pl.program_id(1)

    @pl.when(l == 0)
    def _():  # initialize the resident carry with the raw modality features
        o_ref[...] = x_ref[...]

    x = o_ref[0]                                    # (S, E) f32
    S, E = x.shape
    nh = num_heads
    hd = E // nh
    scale = 1.0 / math.sqrt(hd)

    def layer_norm(y, w, b):
        mu = jnp.mean(y, axis=-1, keepdims=True)
        var = jnp.mean((y - mu) ** 2, axis=-1, keepdims=True)
        return (y - mu) * jax.lax.rsqrt(var + LN_EPS) * w + b

    # --- self-attention: all heads in one batched contraction ---
    xb = x.astype(jnp.bfloat16)
    qkv = jnp.dot(xb, in_w_ref[0], preferred_element_type=jnp.float32) + in_b_ref[0]
    q = qkv[:, :E].reshape(S, nh, hd).transpose(1, 0, 2)          # (nh, S, hd)
    k = qkv[:, E:2 * E].reshape(S, nh, hd).transpose(1, 0, 2)     # (nh, S, hd)
    v = qkv[:, 2 * E:].reshape(S, nh, hd).transpose(1, 0, 2)      # (nh, S, hd)

    s = jnp.einsum("hqd,hkd->hqk", q, k,
                   preferred_element_type=jnp.float32) * scale    # (nh, S, S)
    s = s - jnp.max(s, axis=-1, keepdims=True)
    p = jnp.exp(s)
    p = p * pl.reciprocal(jnp.sum(p, axis=-1, keepdims=True), approx=True)
    ctx = jnp.einsum("hqk,hkd->hqd", p, v,
                     preferred_element_type=jnp.float32)          # (nh, S, hd)
    ctx = ctx.transpose(1, 0, 2).reshape(S, E)                    # (S, E)
    attn = jnp.dot(ctx.astype(jnp.bfloat16), out_w_ref[0],
                   preferred_element_type=jnp.float32) + out_b_ref[0]

    # dropout = identity (eval); post-norm residual
    x = layer_norm(x + attn, ln1_w_ref[0], ln1_b_ref[0])

    # --- feed-forward (Linear -> ReLU -> Linear), bf16 weights ---
    h1 = jnp.dot(x.astype(jnp.bfloat16), lin1_w_ref[0],
                 preferred_element_type=jnp.float32) + lin1_b_ref[0]
    h1 = jnp.maximum(h1, 0.0)
    h2 = jnp.dot(h1.astype(jnp.bfloat16), lin2_w_ref[0],
                 preferred_element_type=jnp.float32) + lin2_b_ref[0]
    x = layer_norm(x + h2, ln2_w_ref[0], ln2_b_ref[0])

    o_ref[0] = x


def encoder_stack(x_stacked, p, *, num_heads):
    """x_stacked: (M, S, E); p: dict of weights stacked along leading dim M*L."""
    M, S, E = x_stacked.shape
    L = p["in_w"].shape[0] // M
    FF = p["lin1_w"].shape[-1]

    wmap = lambda m, l: (m * L + l, 0, 0)     # per (modality, layer) weight slice
    xmap = lambda m, l: (m, 0, 0)             # activation block resident across l

    in_specs = [
        pl.BlockSpec((1, S, E), xmap),              # x
        pl.BlockSpec((1, E, 3 * E), wmap),          # in_w
        pl.BlockSpec((1, 1, 3 * E), wmap),          # in_b
        pl.BlockSpec((1, E, E), wmap),              # out_w
        pl.BlockSpec((1, 1, E), wmap),              # out_b
        pl.BlockSpec((1, E, FF), wmap),             # lin1_w
        pl.BlockSpec((1, 1, FF), wmap),             # lin1_b
        pl.BlockSpec((1, FF, E), wmap),             # lin2_w
        pl.BlockSpec((1, 1, E), wmap),              # lin2_b
        pl.BlockSpec((1, 1, E), wmap),              # ln1_w
        pl.BlockSpec((1, 1, E), wmap),              # ln1_b
        pl.BlockSpec((1, 1, E), wmap),              # ln2_w
        pl.BlockSpec((1, 1, E), wmap),              # ln2_b
    ]

    return pl.pallas_call(
        functools.partial(_encoder_stack_kernel, num_heads=num_heads),
        out_shape=jax.ShapeDtypeStruct((M, S, E), x_stacked.dtype),
        grid=(M, L),
        in_specs=in_specs,
        out_specs=pl.BlockSpec((1, S, E), xmap),
        compiler_params=pltpu.CompilerParams(
            dimension_semantics=("parallel", "arbitrary"),
            vmem_limit_bytes=32 * 1024 * 1024,
        ),
    )(x_stacked, p["in_w"], p["in_b"], p["out_w"], p["out_b"],
      p["lin1_w"], p["lin1_b"], p["lin2_w"], p["lin2_b"],
      p["ln1_w"], p["ln1_b"], p["ln2_w"], p["ln2_b"])


# ----------------------------------------------------------------------------
# Kernel 2: fusion head — split projection (no concat), length-1 cross-attention
# (softmax == 1 so context == V projection), classifier MLP, lane-padded output.
# ----------------------------------------------------------------------------
def _fusion_head_kernel(
    enc_ref,                         # (3, B, E) f32  encoder outputs (text/audio/video)
    spk_ref,                         # (B, Dsp)  f32  speaker embeddings
    proj_w_ref, proj_b_ref,          # (3E+Dsp, H), (1, H)
    mha_v_w_ref, mha_v_b_ref,        # (H, H), (1, H)   V block of in_proj only
    mha_out_w_ref, mha_out_b_ref,    # (H, H), (1, H)
    fc1_w_ref, fc1_b_ref,            # (H, 128), (1, 128)
    fc2_w_ref, fc2_b_ref,            # (128, Cpad), (1, Cpad)   zero-padded columns
    o_ref,                           # (B, Cpad)
):
    E = enc_ref.shape[2]
    Dsp = spk_ref.shape[1]
    tf = enc_ref[0]
    af = enc_ref[1]
    vf = enc_ref[2]
    spk = spk_ref[...]

    # projection_layer(cat([tf, af, vf, spk])) as a sum of row-block matmuls
    h = (jnp.dot(tf, proj_w_ref[0:E, :], preferred_element_type=jnp.float32)
         + jnp.dot(af, proj_w_ref[E:2 * E, :], preferred_element_type=jnp.float32)
         + jnp.dot(vf, proj_w_ref[2 * E:3 * E, :], preferred_element_type=jnp.float32)
         + jnp.dot(spk, proj_w_ref[3 * E:3 * E + Dsp, :], preferred_element_type=jnp.float32)
         + proj_b_ref[...])

    # cross_attention(q=k=v=h.unsqueeze(1)): sequence length 1 -> softmax == 1,
    # so each head's context equals its value projection; Q/K are never needed.
    v = jnp.dot(h, mha_v_w_ref[...], preferred_element_type=jnp.float32) + mha_v_b_ref[...]
    attn = jnp.dot(v, mha_out_w_ref[...], preferred_element_type=jnp.float32) + mha_out_b_ref[...]

    # fc: Linear -> ReLU -> Dropout(identity) -> Linear (padded to lane-dense width)
    f1 = jnp.maximum(
        jnp.dot(attn, fc1_w_ref[...], preferred_element_type=jnp.float32) + fc1_b_ref[...],
        0.0)
    o_ref[...] = jnp.dot(f1, fc2_w_ref[...], preferred_element_type=jnp.float32) + fc2_b_ref[...]


def fusion_head(enc_out, spk, params):
    args = (enc_out, spk,
            params["proj_w"], params["proj_b"],
            params["mha_v_w"], params["mha_v_b"],
            params["mha_out_w"], params["mha_out_b"],
            params["fc1_w"], params["fc1_b"],
            params["fc2_w_pad"], params["fc2_b_pad"])
    B = enc_out.shape[1]
    Cpad = params["fc2_w_pad"].shape[1]
    return pl.pallas_call(
        _fusion_head_kernel,
        out_shape=jax.ShapeDtypeStruct((B, Cpad), jnp.float32),
        in_specs=[pl.BlockSpec(memory_space=pltpu.MemorySpace.VMEM) for _ in args],
        out_specs=pl.BlockSpec(memory_space=pltpu.MemorySpace.VMEM),
        compiler_params=pltpu.CompilerParams(vmem_limit_bytes=32 * 1024 * 1024),
    )(*args)


# ----------------------------------------------------------------------------
# Parameters (deterministic synthetic init; shapes follow the module __init__).
# ----------------------------------------------------------------------------
def _lin(key, in_f, out_f, wdtype=jnp.float32):
    kw, kb = jax.random.split(key)
    w = (jax.random.normal(kw, (in_f, out_f), jnp.float32) * 0.02).astype(wdtype)
    b = jax.random.normal(kb, (1, out_f), jnp.float32) * 0.02
    return w, b


def _init_encoder_stack(key, dim, num_layers, ff):
    per_layer = []
    for lk in jax.random.split(key, num_layers):
        ks = jax.random.split(lk, 4)
        in_w, in_b = _lin(ks[0], dim, 3 * dim, jnp.bfloat16)
        out_w, out_b = _lin(ks[1], dim, dim, jnp.bfloat16)
        l1w, l1b = _lin(ks[2], dim, ff, jnp.bfloat16)
        l2w, l2b = _lin(ks[3], ff, dim, jnp.bfloat16)
        per_layer.append(dict(
            in_w=in_w, in_b=in_b, out_w=out_w, out_b=out_b,
            lin1_w=l1w, lin1_b=l1b, lin2_w=l2w, lin2_b=l2b,
            ln1_w=jnp.ones((1, dim), jnp.float32),
            ln1_b=jnp.zeros((1, dim), jnp.float32),
            ln2_w=jnp.ones((1, dim), jnp.float32),
            ln2_b=jnp.zeros((1, dim), jnp.float32)))
    # stack along a new leading layer axis -> (L, ...) per weight
    return {name: jnp.stack([lyr[name] for lyr in per_layer], axis=0)
            for name in per_layer[0]}


def init_params(key, *, modal_dim, hidden_dim, num_classes, num_speakers,
                speaker_dim, num_layers, dim_feedforward):
    keys = jax.random.split(key, 9)
    enc_t = _init_encoder_stack(keys[0], modal_dim, num_layers, dim_feedforward)
    enc_a = _init_encoder_stack(keys[1], modal_dim, num_layers, dim_feedforward)
    enc_v = _init_encoder_stack(keys[2], modal_dim, num_layers, dim_feedforward)
    # concat the 3 modality stacks -> leading dim 3*L, ordered [text, audio, video]
    encoders = {k: jnp.concatenate([enc_t[k], enc_a[k], enc_v[k]], axis=0)
                for k in enc_t}

    dtot = 3 * modal_dim + speaker_dim
    proj_w, proj_b = _lin(keys[3], dtot, hidden_dim)
    mha_in_w, mha_in_b = _lin(keys[4], hidden_dim, 3 * hidden_dim)
    mha_out_w, mha_out_b = _lin(keys[5], hidden_dim, hidden_dim)
    fc1_w, fc1_b = _lin(keys[6], hidden_dim, 128)
    fc2_w, fc2_b = _lin(keys[7], 128, num_classes)

    cpad = ((num_classes + 127) // 128) * 128
    fc2_w_pad = jnp.zeros((128, cpad), jnp.float32).at[:, :num_classes].set(fc2_w)
    fc2_b_pad = jnp.zeros((1, cpad), jnp.float32).at[:, :num_classes].set(fc2_b)

    return dict(
        encoders=encoders,
        speaker_emb=jax.random.normal(keys[8], (num_speakers, speaker_dim),
                                      jnp.float32) * 0.02,
        proj_w=proj_w, proj_b=proj_b,
        # length-1 cross attention only uses the V third of in_proj
        mha_v_w=mha_in_w[:, 2 * hidden_dim:], mha_v_b=mha_in_b[:, 2 * hidden_dim:],
        mha_out_w=mha_out_w, mha_out_b=mha_out_b,
        fc1_w=fc1_w, fc1_b=fc1_b,
        fc2_w_pad=fc2_w_pad, fc2_b_pad=fc2_b_pad,
    )


# ----------------------------------------------------------------------------
# Forward pass (tiny glue in plain JAX; all heavy work in the two Pallas calls).
# ----------------------------------------------------------------------------
def forward(params, text, audio, video, speaker_ids, *, num_heads, num_classes):
    vmean = jnp.mean(video, axis=1)                     # video.mean(dim=1)

    # All three encoders share d_model here, so stack them and run a single
    # fused pallas_call with grid = (modality, layer).
    # TODO(synk): if text/audio/video d_model ever differ, call encoder_stack
    # once per modality (M=1) instead of stacking.
    x_stacked = jnp.stack([text, audio, vmean], axis=0)         # (3, B, E)
    enc_out = encoder_stack(x_stacked, params["encoders"], num_heads=num_heads)

    # speaker-id remap == rank of each id among the sorted unique ids
    # (reproduces the host-side sorted(set(...)) dict of the PyTorch module)
    s = speaker_ids.astype(jnp.int32)
    ss = jnp.sort(s)
    is_first = jnp.concatenate([jnp.array([True]), ss[1:] != ss[:-1]])
    mapped = jnp.sum(is_first[None, :] & (ss[None, :] < s[:, None]), axis=1)
    spk = jnp.take(params["speaker_emb"], mapped, axis=0)

    logits_pad = fusion_head(enc_out, spk, params)              # (B, Cpad)
    return logits_pad[:, :num_classes]


if __name__ == "__main__":
    # small, constructor-consistent shapes
    B = 8                     # batch (== the "sequence" seen by the encoders)
    modal_dim = 64            # text_dim = audio_dim = video_dim
    hidden_dim = 64
    num_classes = 8
    num_speakers = 10
    speaker_dim = 64
    num_heads = 8
    num_layers = 2
    dim_feedforward = 2048    # nn.TransformerEncoderLayer default
    T_frames = 4

    assert modal_dim % num_heads == 0 and hidden_dim % num_heads == 0

    key = jax.random.PRNGKey(0)
    kp, kt, ka, kv, ks = jax.random.split(key, 5)
    params = init_params(
        kp, modal_dim=modal_dim, hidden_dim=hidden_dim, num_classes=num_classes,
        num_speakers=num_speakers, speaker_dim=speaker_dim,
        num_layers=num_layers, dim_feedforward=dim_feedforward)

    text = jax.random.normal(kt, (B, modal_dim), jnp.float32)
    audio = jax.random.normal(ka, (B, modal_dim), jnp.float32)
    video = jax.random.normal(kv, (B, T_frames, modal_dim), jnp.float32)
    speaker_ids = jax.random.randint(ks, (B,), 0, num_speakers, dtype=jnp.int32)

    fwd = jax.jit(functools.partial(forward, num_heads=num_heads,
                                    num_classes=num_classes))
    logits = fwd(params, text, audio, video, speaker_ids)
    logits = jax.block_until_ready(logits)
    assert logits.shape == (B, num_classes), logits.shape
    print("KERNEL_OK")
</pallas_src>

<mosaic_0001>
module attributes {stable_mosaic.version = 11 : i64} {
  func.func @_encoder_stack_kernel(%arg0: i32, %arg1: i32, %arg2: memref<1x8x64xf32, #tpu.memory_space<vmem>>, %arg3: memref<1x64x192xbf16, #tpu.memory_space<vmem>>, %arg4: memref<1x1x192xf32, #tpu.memory_space<vmem>>, %arg5: memref<1x64x64xbf16, #tpu.memory_space<vmem>>, %arg6: memref<1x1x64xf32, #tpu.memory_space<vmem>>, %arg7: memref<1x64x2048xbf16, #tpu.memory_space<vmem>>, %arg8: memref<1x1x2048xf32, #tpu.memory_space<vmem>>, %arg9: memref<1x2048x64xbf16, #tpu.memory_space<vmem>>, %arg10: memref<1x1x64xf32, #tpu.memory_space<vmem>>, %arg11: memref<1x1x64xf32, #tpu.memory_space<vmem>>, %arg12: memref<1x1x64xf32, #tpu.memory_space<vmem>>, %arg13: memref<1x1x64xf32, #tpu.memory_space<vmem>>, %arg14: memref<1x1x64xf32, #tpu.memory_space<vmem>>, %arg15: memref<1x8x64xf32, #tpu.memory_space<vmem>>) attributes {dimension_semantics = [#tpu.dimension_semantics<parallel>, #tpu.dimension_semantics<arbitrary>], iteration_bounds = array<i64: 3, 2>, scalar_prefetch = 0 : i64, scratch_operands = 0 : i64, tpu.core_type = #tpu.core_type<tc>, window_params = [{transform_indices = @transform_0, window_bounds = array<i64: 1, 8, 64>}, {transform_indices = @transform_1, window_bounds = array<i64: 1, 64, 192>}, {transform_indices = @transform_2, window_bounds = array<i64: 1, 1, 192>}, {transform_indices = @transform_3, window_bounds = array<i64: 1, 64, 64>}, {transform_indices = @transform_4, window_bounds = array<i64: 1, 1, 64>}, {transform_indices = @transform_5, window_bounds = array<i64: 1, 64, 2048>}, {transform_indices = @transform_6, window_bounds = array<i64: 1, 1, 2048>}, {transform_indices = @transform_7, window_bounds = array<i64: 1, 2048, 64>}, {transform_indices = @transform_8, window_bounds = array<i64: 1, 1, 64>}, {transform_indices = @transform_9, window_bounds = array<i64: 1, 1, 64>}, {transform_indices = @transform_10, window_bounds = array<i64: 1, 1, 64>}, {transform_indices = @transform_11, window_bounds = array<i64: 1, 1, 64>}, {transform_indices = @transform_12, window_bounds = array<i64: 1, 1, 64>}, {transform_indices = @transform_13, window_bounds = array<i64: 1, 8, 64>}]} {
    %c0_i32 = arith.constant 0 : i32
    %0 = arith.cmpi eq, %arg1, %c0_i32 : i32
    %1 = arith.extui %0 : i1 to i32
    %c0_i32_0 = arith.constant 0 : i32
    %2 = arith.cmpi ne, %1, %c0_i32_0 : i32
    scf.if %2 {
      %c0_61 = arith.constant 0 : index
      %c0_62 = arith.constant 0 : index
      %c0_63 = arith.constant 0 : index
      %121 = vector.load %arg2[%c0_61, %c0_62, %c0_63] : memref<1x8x64xf32, #tpu.memory_space<vmem>>, vector<1x8x64xf32>
      %c0_64 = arith.constant 0 : index
      %c0_65 = arith.constant 0 : index
      %c0_66 = arith.constant 0 : index
      %122 = vector.load %arg15[%c0_64, %c0_65, %c0_66] : memref<1x8x64xf32, #tpu.memory_space<vmem>>, vector<1x8x64xf32>
      tpu.vector_store %arg15[%c0_64, %c0_65, %c0_66], %121 {strides = array<i32>} : memref<1x8x64xf32, #tpu.memory_space<vmem>>, vector<1x8x64xf32>,
    } else {
    }
    %c0 = arith.constant 0 : index
    %c0_1 = arith.constant 0 : index
    %c0_2 = arith.constant 0 : index
    %3 = vector.load %arg15[%c0, %c0_1, %c0_2] : memref<1x8x64xf32, #tpu.memory_space<vmem>>, vector<1x8x64xf32>
    %4 = vector.shape_cast %3 : vector<1x8x64xf32> to vector<8x64xf32>
    %5 = arith.truncf %4 : vector<8x64xf32> to vector<8x64xbf16>
    %c0_3 = arith.constant 0 : index
    %c0_4 = arith.constant 0 : index
    %c0_5 = arith.constant 0 : index
    %6 = vector.load %arg3[%c0_3, %c0_4, %c0_5] : memref<1x64x192xbf16, #tpu.memory_space<vmem>>, vector<1x64x192xbf16>
    %7 = vector.shape_cast %6 : vector<1x64x192xbf16> to vector<64x192xbf16>
    %cst = arith.constant dense<0.000000e+00> : vector<8x192xf32>
    %8 = tpu.matmul %5, %7, %cst {dimension_numbers = #tpu.dot_dimension_numbers<[1], [0], [0], [1], [0, 0, 1, 1], [], []>} : vector<8x64xbf16>, vector<64x192xbf16>, vector<8x192xf32> -> vector<8x192xf32>
    %c0_6 = arith.constant 0 : index
    %c0_7 = arith.constant 0 : index
    %c0_8 = arith.constant 0 : index
    %9 = vector.load %arg4[%c0_6, %c0_7, %c0_8] : memref<1x1x192xf32, #tpu.memory_space<vmem>>, vector<1x1x192xf32>
    %10 = vector.shape_cast %9 : vector<1x1x192xf32> to vector<1x192xf32>
    %11 = vector.broadcast %10 : vector<1x192xf32> to vector<8x192xf32>
    %12 = arith.addf %8, %11 : vector<8x192xf32>
    %13 = vector.extract_strided_slice %12 {offsets = [0, 0], sizes = [8, 64], strides = [1, 1]} : vector<8x192xf32> to vector<8x64xf32>
    %14 = vector.shape_cast %13 : vector<8x64xf32> to vector<8x8x8xf32>
    %15 = tpu.transpose %14, [1, 0, 2] : vector<8x8x8xf32> -> vector<8x8x8xf32>
    %16 = vector.extract_strided_slice %12 {offsets = [0, 64], sizes = [8, 64], strides = [1, 1]} : vector<8x192xf32> to vector<8x64xf32>
    %17 = vector.shape_cast %16 : vector<8x64xf32> to vector<8x8x8xf32>
    %18 = tpu.transpose %17, [1, 0, 2] : vector<8x8x8xf32> -> vector<8x8x8xf32>
    %19 = vector.extract_strided_slice %12 {offsets = [0, 128], sizes = [8, 64], strides = [1, 1]} : vector<8x192xf32> to vector<8x64xf32>
    %20 = vector.shape_cast %19 : vector<8x64xf32> to vector<8x8x8xf32>
    %21 = tpu.transpose %20, [1, 0, 2] : vector<8x8x8xf32> -> vector<8x8x8xf32>
    "tpu.trace_start"() <{level = 10 : i32, message = "hqd,hkd->hqk"}> : () -> ()
    %cst_9 = arith.constant dense<0.000000e+00> : vector<8x8x8xf32>
    %22 = tpu.matmul %15, %18, %cst_9 {dimension_numbers = #tpu.dot_dimension_numbers<[2], [2], [1], [1], [0, 0, 0, 1, 1, 1], [0], [0]>} : vector<8x8x8xf32>, vector<8x8x8xf32>, vector<8x8x8xf32> -> vector<8x8x8xf32>
    "tpu.trace_stop"() : () -> ()
    %cst_10 = arith.constant 0.353553385 : f32
    %23 = vector.broadcast %cst_10 : f32 to vector<8x8x8xf32>
    %24 = arith.mulf %22, %23 : vector<8x8x8xf32>
    %cst_11 = arith.constant dense<0xFF800000> : vector<8x8xf32>
    %25 = vector.multi_reduction <maximumf>, %24, %cst_11 [2] : vector<8x8x8xf32> to vector<8x8xf32>
    %26 = vector.shape_cast %25 : vector<8x8xf32> to vector<8x8x1xf32>
    %27 = vector.broadcast %26 : vector<8x8x1xf32> to vector<8x8x8xf32>
    %28 = arith.subf %24, %27 : vector<8x8x8xf32>
    %29 = math.exp %28 : vector<8x8x8xf32>
    %cst_12 = arith.constant dense<0.000000e+00> : vector<8x8xf32>
    %30 = vector.multi_reduction <add>, %29, %cst_12 [2] : vector<8x8x8xf32> to vector<8x8xf32>
    %31 = vector.shape_cast %30 : vector<8x8xf32> to vector<8x8x1xf32>
    %32 = tpu.reciprocal %31 {approx = true} : vector<8x8x1xf32> -> vector<8x8x1xf32>
    %33 = vector.broadcast %32 : vector<8x8x1xf32> to vector<8x8x8xf32>
    %34 = arith.mulf %29, %33 : vector<8x8x8xf32>
    "tpu.trace_start"() <{level = 10 : i32, message = "hqk,hkd->hqd"}> : () -> ()
    %cst_13 = arith.constant dense<0.000000e+00> : vector<8x8x8xf32>
    %35 = tpu.matmul %34, %21, %cst_13 {dimension_numbers = #tpu.dot_dimension_numbers<[2], [1], [1], [2], [0, 0, 0, 1, 1, 2], [0], [0]>} : vector<8x8x8xf32>, vector<8x8x8xf32>, vector<8x8x8xf32> -> vector<8x8x8xf32>
    "tpu.trace_stop"() : () -> ()
    %36 = tpu.transpose %35, [1, 0, 2] : vector<8x8x8xf32> -> vector<8x8x8xf32>
    %37 = vector.shape_cast %36 : vector<8x8x8xf32> to vector<8x64xf32>
    %38 = arith.truncf %37 : vector<8x64xf32> to vector<8x64xbf16>
    %c0_14 = arith.constant 0 : index
    %c0_15 = arith.constant 0 : index
    %c0_16 = arith.constant 0 : index
    %39 = vector.load %arg5[%c0_14, %c0_15, %c0_16] : memref<1x64x64xbf16, #tpu.memory_space<vmem>>, vector<1x64x64xbf16>
    %40 = vector.shape_cast %39 : vector<1x64x64xbf16> to vector<64x64xbf16>
    %cst_17 = arith.constant dense<0.000000e+00> : vector<8x64xf32>
    %41 = tpu.matmul %38, %40, %cst_17 {dimension_numbers = #tpu.dot_dimension_numbers<[1], [0], [0], [1], [0, 0, 1, 1], [], []>} : vector<8x64xbf16>, vector<64x64xbf16>, vector<8x64xf32> -> vector<8x64xf32>
    %c0_18 = arith.constant 0 : index
    %c0_19 = arith.constant 0 : index
    %c0_20 = arith.constant 0 : index
    %42 = vector.load %arg6[%c0_18, %c0_19, %c0_20] : memref<1x1x64xf32, #tpu.memory_space<vmem>>, vector<1x1x64xf32>
    %43 = vector.shape_cast %42 : vector<1x1x64xf32> to vector<1x64xf32>
    %44 = vector.broadcast %43 : vector<1x64xf32> to vector<8x64xf32>
    %45 = arith.addf %41, %44 : vector<8x64xf32>
    %46 = arith.addf %4, %45 : vector<8x64xf32>
    %c0_21 = arith.constant 0 : index
    %c0_22 = arith.constant 0 : index
    %c0_23 = arith.constant 0 : index
    %47 = vector.load %arg11[%c0_21, %c0_22, %c0_23] : memref<1x1x64xf32, #tpu.memory_space<vmem>>, vector<1x1x64xf32>
    %48 = vector.shape_cast %47 : vector<1x1x64xf32> to vector<1x64xf32>
    %c0_24 = arith.constant 0 : index
    %c0_25 = arith.constant 0 : index
    %c0_26 = arith.constant 0 : index
    %49 = vector.load %arg12[%c0_24, %c0_25, %c0_26] : memref<1x1x64xf32, #tpu.memory_space<vmem>>, vector<1x1x64xf32>
    %50 = vector.shape_cast %49 : vector<1x1x64xf32> to vector<1x64xf32>
    %cst_27 = arith.constant dense<0.000000e+00> : vector<8xf32>
    %51 = vector.multi_reduction <add>, %46, %cst_27 [1] : vector<8x64xf32> to vector<8xf32>
    %52 = vector.shape_cast %51 : vector<8xf32> to vector<8x1xf32>
    %cst_28 = arith.constant 6.400000e+01 : f32
    %53 = vector.broadcast %cst_28 : f32 to vector<8x1xf32>
    %54 = arith.divf %52, %53 : vector<8x1xf32>
    %55 = vector.broadcast %54 : vector<8x1xf32> to vector<8x64xf32>
    %56 = arith.subf %46, %55 : vector<8x64xf32>
    %57 = arith.mulf %56, %56 : vector<8x64xf32>
    %cst_29 = arith.constant dense<0.000000e+00> : vector<8xf32>
    %58 = vector.multi_reduction <add>, %57, %cst_29 [1] : vector<8x64xf32> to vector<8xf32>
    %59 = vector.shape_cast %58 : vector<8xf32> to vector<8x1xf32>
    %cst_30 = arith.constant 6.400000e+01 : f32
    %60 = vector.broadcast %cst_30 : f32 to vector<8x1xf32>
    %61 = arith.divf %59, %60 : vector<8x1xf32>
    %62 = vector.broadcast %54 : vector<8x1xf32> to vector<8x64xf32>
    %63 = arith.subf %46, %62 : vector<8x64xf32>
    %cst_31 = arith.constant 9.99999974E-6 : f32
    %64 = vector.broadcast %cst_31 : f32 to vector<8x1xf32>
    %65 = arith.addf %61, %64 : vector<8x1xf32>
    %66 = math.rsqrt %65 : vector<8x1xf32>
    %67 = vector.broadcast %66 : vector<8x1xf32> to vector<8x64xf32>
    %68 = arith.mulf %63, %67 : vector<8x64xf32>
    %69 = vector.broadcast %48 : vector<1x64xf32> to vector<8x64xf32>
    %70 = arith.mulf %68, %69 : vector<8x64xf32>
    %71 = vector.broadcast %50 : vector<1x64xf32> to vector<8x64xf32>
    %72 = arith.addf %70, %71 : vector<8x64xf32>
    %73 = arith.truncf %72 : vector<8x64xf32> to vector<8x64xbf16>
    %c0_32 = arith.constant 0 : index
    %c0_33 = arith.constant 0 : index
    %c0_34 = arith.constant 0 : index
    %74 = vector.load %arg7[%c0_32, %c0_33, %c0_34] : memref<1x64x2048xbf16, #tpu.memory_space<vmem>>, vector<1x64x2048xbf16>
    %75 = vector.shape_cast %74 : vector<1x64x2048xbf16> to vector<64x2048xbf16>
    %cst_35 = arith.constant dense<0.000000e+00> : vector<8x2048xf32>
    %76 = tpu.matmul %73, %75, %cst_35 {dimension_numbers = #tpu.dot_dimension_numbers<[1], [0], [0], [1], [0, 0, 1, 1], [], []>} : vector<8x64xbf16>, vector<64x2048xbf16>, vector<8x2048xf32> -> vector<8x2048xf32>
    %c0_36 = arith.constant 0 : index
    %c0_37 = arith.constant 0 : index
    %c0_38 = arith.constant 0 : index
    %77 = vector.load %arg8[%c0_36, %c0_37, %c0_38] : memref<1x1x2048xf32, #tpu.memory_space<vmem>>, vector<1x1x2048xf32>
    %78 = vector.shape_cast %77 : vector<1x1x2048xf32> to vector<1x2048xf32>
    %79 = vector.broadcast %78 : vector<1x2048xf32> to vector<8x2048xf32>
    %80 = arith.addf %76, %79 : vector<8x2048xf32>
    %cst_39 = arith.constant 0.000000e+00 : f32
    %81 = vector.broadcast %cst_39 : f32 to vector<8x2048xf32>
    %82 = arith.maximumf %80, %81 : vector<8x2048xf32>
    %83 = arith.truncf %82 : vector<8x2048xf32> to vector<8x2048xbf16>
    %c0_40 = arith.constant 0 : index
    %c0_41 = arith.constant 0 : index
    %c0_42 = arith.constant 0 : index
    %84 = vector.load %arg9[%c0_40, %c0_41, %c0_42] : memref<1x2048x64xbf16, #tpu.memory_space<vmem>>, vector<1x2048x64xbf16>
    %85 = vector.shape_cast %84 : vector<1x2048x64xbf16> to vector<2048x64xbf16>
    %cst_43 = arith.constant dense<0.000000e+00> : vector<8x64xf32>
    %86 = tpu.matmul %83, %85, %cst_43 {dimension_numbers = #tpu.dot_dimension_numbers<[1], [0], [0], [1], [0, 0, 1, 1], [], []>} : vector<8x2048xbf16>, vector<2048x64xbf16>, vector<8x64xf32> -> vector<8x64xf32>
    %c0_44 = arith.constant 0 : index
    %c0_45 = arith.constant 0 : index
    %c0_46 = arith.constant 0 : index
    %87 = vector.load %arg10[%c0_44, %c0_45, %c0_46] : memref<1x1x64xf32, #tpu.memory_space<vmem>>, vector<1x1x64xf32>
    %88 = vector.shape_cast %87 : vector<1x1x64xf32> to vector<1x64xf32>
    %89 = vector.broadcast %88 : vector<1x64xf32> to vector<8x64xf32>
    %90 = arith.addf %86, %89 : vector<8x64xf32>
    %91 = arith.addf %72, %90 : vector<8x64xf32>
    %c0_47 = arith.constant 0 : index
    %c0_48 = arith.constant 0 : index
    %c0_49 = arith.constant 0 : index
    %92 = vector.load %arg13[%c0_47, %c0_48, %c0_49] : memref<1x1x64xf32, #tpu.memory_space<vmem>>, vector<1x1x64xf32>
    %93 = vector.shape_cast %92 : vector<1x1x64xf32> to vector<1x64xf32>
    %c0_50 = arith.constant 0 : index
    %c0_51 = arith.constant 0 : index
    %c0_52 = arith.constant 0 : index
    %94 = vector.load %arg14[%c0_50, %c0_51, %c0_52] : memref<1x1x64xf32, #tpu.memory_space<vmem>>, vector<1x1x64xf32>
    %95 = vector.shape_cast %94 : vector<1x1x64xf32> to vector<1x64xf32>
    %cst_53 = arith.constant dense<0.000000e+00> : vector<8xf32>
    %96 = vector.multi_reduction <add>, %91, %cst_53 [1] : vector<8x64xf32> to vector<8xf32>
    %97 = vector.shape_cast %96 : vector<8xf32> to vector<8x1xf32>
    %cst_54 = arith.constant 6.400000e+01 : f32
    %98 = vector.broadcast %cst_54 : f32 to vector<8x1xf32>
    %99 = arith.divf %97, %98 : vector<8x1xf32>
    %100 = vector.broadcast %99 : vector<8x1xf32> to vector<8x64xf32>
    %101 = arith.subf %91, %100 : vector<8x64xf32>
    %102 = arith.mulf %101, %101 : vector<8x64xf32>
    %cst_55 = arith.constant dense<0.000000e+00> : vector<8xf32>
    %103 = vector.multi_reduction <add>, %102, %cst_55 [1] : vector<8x64xf32> to vector<8xf32>
    %104 = vector.shape_cast %103 : vector<8xf32> to vector<8x1xf32>
    %cst_56 = arith.constant 6.400000e+01 : f32
    %105 = vector.broadcast %cst_56 : f32 to vector<8x1xf32>
    %106 = arith.divf %104, %105 : vector<8x1xf32>
    %107 = vector.broadcast %99 : vector<8x1xf32> to vector<8x64xf32>
    %108 = arith.subf %91, %107 : vector<8x64xf32>
    %cst_57 = arith.constant 9.99999974E-6 : f32
    %109 = vector.broadcast %cst_57 : f32 to vector<8x1xf32>
    %110 = arith.addf %106, %109 : vector<8x1xf32>
    %111 = math.rsqrt %110 : vector<8x1xf32>
    %112 = vector.broadcast %111 : vector<8x1xf32> to vector<8x64xf32>
    %113 = arith.mulf %108, %112 : vector<8x64xf32>
    %114 = vector.broadcast %93 : vector<1x64xf32> to vector<8x64xf32>
    %115 = arith.mulf %113, %114 : vector<8x64xf32>
    %116 = vector.broadcast %95 : vector<1x64xf32> to vector<8x64xf32>
    %117 = arith.addf %115, %116 : vector<8x64xf32>
    %c0_58 = arith.constant 0 : index
    %c0_59 = arith.constant 0 : index
    %c0_60 = arith.constant 0 : index
    %118 = vector.load %arg15[%c0_58, %c0_59, %c0_60] : memref<1x8x64xf32, #tpu.memory_space<vmem>>, vector<1x8x64xf32>
    %119 = vector.shape_cast %118 : vector<1x8x64xf32> to vector<8x64xf32>
    %120 = vector.shape_cast %117 : vector<8x64xf32> to vector<1x8x64xf32>
    tpu.vector_store %arg15[%c0_58, %c0_59, %c0_60], %120 {strides = array<i32>} : memref<1x8x64xf32, #tpu.memory_space<vmem>>, vector<1x8x64xf32>,
    return
  }
  func.func @transform_0(%arg0: i32, %arg1: i32) -> (i32, i32, i32) {
    %c0_i32 = arith.constant 0 : i32
    %c0_i32_0 = arith.constant 0 : i32
    %c0_i32_1 = arith.constant 0 : i32
    return %arg0, %c0_i32, %c0_i32_0 : i32, i32, i32
  }
  func.func @transform_1(%arg0: i32, %arg1: i32) -> (i32, i32, i32) {
    %c2_i32 = arith.constant 2 : i32
    %0 = arith.muli %arg0, %c2_i32 : i32
    %1 = arith.addi %0, %arg1 : i32
    %c0_i32 = arith.constant 0 : i32
    %c0_i32_0 = arith.constant 0 : i32
    %c0_i32_1 = arith.constant 0 : i32
    return %1, %c0_i32, %c0_i32_0 : i32, i32, i32
  }
  func.func @transform_2(%arg0: i32, %arg1: i32) -> (i32, i32, i32) {
    %c2_i32 = arith.constant 2 : i32
    %0 = arith.muli %arg0, %c2_i32 : i32
    %1 = arith.addi %0, %arg1 : i32
    %c0_i32 = arith.constant 0 : i32
    %c0_i32_0 = arith.constant 0 : i32
    %c0_i32_1 = arith.constant 0 : i32
    return %1, %c0_i32, %c0_i32_0 : i32, i32, i32
  }
  func.func @transform_3(%arg0: i32, %arg1: i32) -> (i32, i32, i32) {
    %c2_i32 = arith.constant 2 : i32
    %0 = arith.muli %arg0, %c2_i32 : i32
    %1 = arith.addi %0, %arg1 : i32
    %c0_i32 = arith.constant 0 : i32
    %c0_i32_0 = arith.constant 0 : i32
    %c0_i32_1 = arith.constant 0 : i32
    return %1, %c0_i32, %c0_i32_0 : i32, i32, i32
  }
  func.func @transform_4(%arg0: i32, %arg1: i32) -> (i32, i32, i32) {
    %c2_i32 = arith.constant 2 : i32
    %0 = arith.muli %arg0, %c2_i32 : i32
    %1 = arith.addi %0, %arg1 : i32
    %c0_i32 = arith.constant 0 : i32
    %c0_i32_0 = arith.constant 0 : i32
    %c0_i32_1 = arith.constant 0 : i32
    return %1, %c0_i32, %c0_i32_0 : i32, i32, i32
  }
  func.func @transform_5(%arg0: i32, %arg1: i32) -> (i32, i32, i32) {
    %c2_i32 = arith.constant 2 : i32
    %0 = arith.muli %arg0, %c2_i32 : i32
    %1 = arith.addi %0, %arg1 : i32
    %c0_i32 = arith.constant 0 : i32
    %c0_i32_0 = arith.constant 0 : i32
    %c0_i32_1 = arith.constant 0 : i32
    return %1, %c0_i32, %c0_i32_0 : i32, i32, i32
  }
  func.func @transform_6(%arg0: i32, %arg1: i32) -> (i32, i32, i32) {
    %c2_i32 = arith.constant 2 : i32
    %0 = arith.muli %arg0, %c2_i32 : i32
    %1 = arith.addi %0, %arg1 : i32
    %c0_i32 = arith.constant 0 : i32
    %c0_i32_0 = arith.constant 0 : i32
    %c0_i32_1 = arith.constant 0 : i32
    return %1, %c0_i32, %c0_i32_0 : i32, i32, i32
  }
  func.func @transform_7(%arg0: i32, %arg1: i32) -> (i32, i32, i32) {
    %c2_i32 = arith.constant 2 : i32
    %0 = arith.muli %arg0, %c2_i32 : i32
    %1 = arith.addi %0, %arg1 : i32
    %c0_i32 = arith.constant 0 : i32
    %c0_i32_0 = arith.constant 0 : i32
    %c0_i32_1 = arith.constant 0 : i32
    return %1, %c0_i32, %c0_i32_0 : i32, i32, i32
  }
  func.func @transform_8(%arg0: i32, %arg1: i32) -> (i32, i32, i32) {
    %c2_i32 = arith.constant 2 : i32
    %0 = arith.muli %arg0, %c2_i32 : i32
    %1 = arith.addi %0, %arg1 : i32
    %c0_i32 = arith.constant 0 : i32
    %c0_i32_0 = arith.constant 0 : i32
    %c0_i32_1 = arith.constant 0 : i32
    return %1, %c0_i32, %c0_i32_0 : i32, i32, i32
  }
  func.func @transform_9(%arg0: i32, %arg1: i32) -> (i32, i32, i32) {
    %c2_i32 = arith.constant 2 : i32
    %0 = arith.muli %arg0, %c2_i32 : i32
    %1 = arith.addi %0, %arg1 : i32
    %c0_i32 = arith.constant 0 : i32
    %c0_i32_0 = arith.constant 0 : i32
    %c0_i32_1 = arith.constant 0 : i32
    return %1, %c0_i32, %c0_i32_0 : i32, i32, i32
  }
  func.func @transform_10(%arg0: i32, %arg1: i32) -> (i32, i32, i32) {
    %c2_i32 = arith.constant 2 : i32
    %0 = arith.muli %arg0, %c2_i32 : i32
    %1 = arith.addi %0, %arg1 : i32
    %c0_i32 = arith.constant 0 : i32
    %c0_i32_0 = arith.constant 0 : i32
    %c0_i32_1 = arith.constant 0 : i32
    return %1, %c0_i32, %c0_i32_0 : i32, i32, i32
  }
  func.func @transform_11(%arg0: i32, %arg1: i32) -> (i32, i32, i32) {
    %c2_i32 = arith.constant 2 : i32
    %0 = arith.muli %arg0, %c2_i32 : i32
    %1 = arith.addi %0, %arg1 : i32
    %c0_i32 = arith.constant 0 : i32
    %c0_i32_0 = arith.constant 0 : i32
    %c0_i32_1 = arith.constant 0 : i32
    return %1, %c0_i32, %c0_i32_0 : i32, i32, i32
  }
  func.func @transform_12(%arg0: i32, %arg1: i32) -> (i32, i32, i32) {
    %c2_i32 = arith.constant 2 : i32
    %0 = arith.muli %arg0, %c2_i32 : i32
    %1 = arith.addi %0, %arg1 : i32
    %c0_i32 = arith.constant 0 : i32
    %c0_i32_0 = arith.constant 0 : i32
    %c0_i32_1 = arith.constant 0 : i32
    return %1, %c0_i32, %c0_i32_0 : i32, i32, i32
  }
  func.func @transform_13(%arg0: i32, %arg1: i32) -> (i32, i32, i32) {
    %c0_i32 = arith.constant 0 : i32
    %c0_i32_0 = arith.constant 0 : i32
    %c0_i32_1 = arith.constant 0 : i32
    return %arg0, %c0_i32, %c0_i32_0 : i32, i32, i32
  }
}

module attributes {stable_mosaic.version = 11 : i64} {
  func.func @_fusion_head_kernel(%arg0: memref<3x8x64xf32, #tpu.memory_space<vmem>>, %arg1: memref<8x64xf32, #tpu.memory_space<vmem>>, %arg2: memref<256x64xf32, #tpu.memory_space<vmem>>, %arg3: memref<1x64xf32, #tpu.memory_space<vmem>>, %arg4: memref<64x64xf32, #tpu.memory_space<vmem>>, %arg5: memref<1x64xf32, #tpu.memory_space<vmem>>, %arg6: memref<64x64xf32, #tpu.memory_space<vmem>>, %arg7: memref<1x64xf32, #tpu.memory_space<vmem>>, %arg8: memref<64x128xf32, #tpu.memory_space<vmem>>, %arg9: memref<1x128xf32, #tpu.memory_space<vmem>>, %arg10: memref<128x128xf32, #tpu.memory_space<vmem>>, %arg11: memref<1x128xf32, #tpu.memory_space<vmem>>, %arg12: memref<8x128xf32, #tpu.memory_space<vmem>>) attributes {dimension_semantics = [], scalar_prefetch = 0 : i64, scratch_operands = 0 : i64, tpu.core_type = #tpu.core_type<tc>} {
    %c0 = arith.constant 0 : index
    %c0_0 = arith.constant 0 : index
    %c0_1 = arith.constant 0 : index
    %0 = vector.load %arg0[%c0, %c0_0, %c0_1] : memref<3x8x64xf32, #tpu.memory_space<vmem>>, vector<1x8x64xf32>
    %1 = vector.shape_cast %0 : vector<1x8x64xf32> to vector<8x64xf32>
    %c1 = arith.constant 1 : index
    %c0_2 = arith.constant 0 : index
    %c0_3 = arith.constant 0 : index
    %2 = vector.load %arg0[%c1, %c0_2, %c0_3] : memref<3x8x64xf32, #tpu.memory_space<vmem>>, vector<1x8x64xf32>
    %3 = vector.shape_cast %2 : vector<1x8x64xf32> to vector<8x64xf32>
    %c2 = arith.constant 2 : index
    %c0_4 = arith.constant 0 : index
    %c0_5 = arith.constant 0 : index
    %4 = vector.load %arg0[%c2, %c0_4, %c0_5] : memref<3x8x64xf32, #tpu.memory_space<vmem>>, vector<1x8x64xf32>
    %5 = vector.shape_cast %4 : vector<1x8x64xf32> to vector<8x64xf32>
    %c0_6 = arith.constant 0 : index
    %c0_7 = arith.constant 0 : index
    %6 = vector.load %arg1[%c0_6, %c0_7] : memref<8x64xf32, #tpu.memory_space<vmem>>, vector<8x64xf32>
    %c0_8 = arith.constant 0 : index
    %c0_9 = arith.constant 0 : index
    %7 = vector.load %arg2[%c0_8, %c0_9] : memref<256x64xf32, #tpu.memory_space<vmem>>, vector<64x64xf32>
    %cst = arith.constant dense<0.000000e+00> : vector<8x64xf32>
    %8 = tpu.matmul %1, %7, %cst {dimension_numbers = #tpu.dot_dimension_numbers<[1], [0], [0], [1], [0, 0, 1, 1], [], []>} : vector<8x64xf32>, vector<64x64xf32>, vector<8x64xf32> -> vector<8x64xf32>
    %c64 = arith.constant 64 : index
    %c0_10 = arith.constant 0 : index
    %9 = vector.load %arg2[%c64, %c0_10] : memref<256x64xf32, #tpu.memory_space<vmem>>, vector<64x64xf32>
    %cst_11 = arith.constant dense<0.000000e+00> : vector<8x64xf32>
    %10 = tpu.matmul %3, %9, %cst_11 {dimension_numbers = #tpu.dot_dimension_numbers<[1], [0], [0], [1], [0, 0, 1, 1], [], []>} : vector<8x64xf32>, vector<64x64xf32>, vector<8x64xf32> -> vector<8x64xf32>
    %11 = arith.addf %8, %10 : vector<8x64xf32>
    %c128 = arith.constant 128 : index
    %c0_12 = arith.constant 0 : index
    %12 = vector.load %arg2[%c128, %c0_12] : memref<256x64xf32, #tpu.memory_space<vmem>>, vector<64x64xf32>
    %cst_13 = arith.constant dense<0.000000e+00> : vector<8x64xf32>
    %13 = tpu.matmul %5, %12, %cst_13 {dimension_numbers = #tpu.dot_dimension_numbers<[1], [0], [0], [1], [0, 0, 1, 1], [], []>} : vector<8x64xf32>, vector<64x64xf32>, vector<8x64xf32> -> vector<8x64xf32>
    %14 = arith.addf %11, %13 : vector<8x64xf32>
    %c192 = arith.constant 192 : index
    %c0_14 = arith.constant 0 : index
    %15 = vector.load %arg2[%c192, %c0_14] : memref<256x64xf32, #tpu.memory_space<vmem>>, vector<64x64xf32>
    %cst_15 = arith.constant dense<0.000000e+00> : vector<8x64xf32>
    %16 = tpu.matmul %6, %15, %cst_15 {dimension_numbers = #tpu.dot_dimension_numbers<[1], [0], [0], [1], [0, 0, 1, 1], [], []>} : vector<8x64xf32>, vector<64x64xf32>, vector<8x64xf32> -> vector<8x64xf32>
    %17 = arith.addf %14, %16 : vector<8x64xf32>
    %c0_16 = arith.constant 0 : index
    %c0_17 = arith.constant 0 : index
    %18 = vector.load %arg3[%c0_16, %c0_17] : memref<1x64xf32, #tpu.memory_space<vmem>>, vector<1x64xf32>
    %19 = vector.broadcast %18 : vector<1x64xf32> to vector<8x64xf32>
    %20 = arith.addf %17, %19 : vector<8x64xf32>
    %c0_18 = arith.constant 0 : index
    %c0_19 = arith.constant 0 : index
    %21 = vector.load %arg4[%c0_18, %c0_19] : memref<64x64xf32, #tpu.memory_space<vmem>>, vector<64x64xf32>
    %cst_20 = arith.constant dense<0.000000e+00> : vector<8x64xf32>
    %22 = tpu.matmul %20, %21, %cst_20 {dimension_numbers = #tpu.dot_dimension_numbers<[1], [0], [0], [1], [0, 0, 1, 1], [], []>} : vector<8x64xf32>, vector<64x64xf32>, vector<8x64xf32> -> vector<8x64xf32>
    %c0_21 = arith.constant 0 : index
    %c0_22 = arith.constant 0 : index
    %23 = vector.load %arg5[%c0_21, %c0_22] : memref<1x64xf32, #tpu.memory_space<vmem>>, vector<1x64xf32>
    %24 = vector.broadcast %23 : vector<1x64xf32> to vector<8x64xf32>
    %25 = arith.addf %22, %24 : vector<8x64xf32>
    %c0_23 = arith.constant 0 : index
    %c0_24 = arith.constant 0 : index
    %26 = vector.load %arg6[%c0_23, %c0_24] : memref<64x64xf32, #tpu.memory_space<vmem>>, vector<64x64xf32>
    %cst_25 = arith.constant dense<0.000000e+00> : vector<8x64xf32>
    %27 = tpu.matmul %25, %26, %cst_25 {dimension_numbers = #tpu.dot_dimension_numbers<[1], [0], [0], [1], [0, 0, 1, 1], [], []>} : vector<8x64xf32>, vector<64x64xf32>, vector<8x64xf32> -> vector<8x64xf32>
    %c0_26 = arith.constant 0 : index
    %c0_27 = arith.constant 0 : index
    %28 = vector.load %arg7[%c0_26, %c0_27] : memref<1x64xf32, #tpu.memory_space<vmem>>, vector<1x64xf32>
    %29 = vector.broadcast %28 : vector<1x64xf32> to vector<8x64xf32>
    %30 = arith.addf %27, %29 : vector<8x64xf32>
    %c0_28 = arith.constant 0 : index
    %c0_29 = arith.constant 0 : index
    %31 = vector.load %arg8[%c0_28, %c0_29] : memref<64x128xf32, #tpu.memory_space<vmem>>, vector<64x128xf32>
    %cst_30 = arith.constant dense<0.000000e+00> : vector<8x128xf32>
    %32 = tpu.matmul %30, %31, %cst_30 {dimension_numbers = #tpu.dot_dimension_numbers<[1], [0], [0], [1], [0, 0, 1, 1], [], []>} : vector<8x64xf32>, vector<64x128xf32>, vector<8x128xf32> -> vector<8x128xf32>
    %c0_31 = arith.constant 0 : index
    %c0_32 = arith.constant 0 : index
    %33 = vector.load %arg9[%c0_31, %c0_32] : memref<1x128xf32, #tpu.memory_space<vmem>>, vector<1x128xf32>
    %34 = vector.broadcast %33 : vector<1x128xf32> to vector<8x128xf32>
    %35 = arith.addf %32, %34 : vector<8x128xf32>
    %cst_33 = arith.constant 0.000000e+00 : f32
    %36 = vector.broadcast %cst_33 : f32 to vector<8x128xf32>
    %37 = arith.maximumf %35, %36 : vector<8x128xf32>
    %c0_34 = arith.constant 0 : index
    %c0_35 = arith.constant 0 : index
    %38 = vector.load %arg10[%c0_34, %c0_35] : memref<128x128xf32, #tpu.memory_space<vmem>>, vector<128x128xf32>
    %cst_36 = arith.constant dense<0.000000e+00> : vector<8x128xf32>
    %39 = tpu.matmul %37, %38, %cst_36 {dimension_numbers = #tpu.dot_dimension_numbers<[1], [0], [0], [1], [0, 0, 1, 1], [], []>} : vector<8x128xf32>, vector<128x128xf32>, vector<8x128xf32> -> vector<8x128xf32>
    %c0_37 = arith.constant 0 : index
    %c0_38 = arith.constant 0 : index
    %40 = vector.load %arg11[%c0_37, %c0_38] : memref<1x128xf32, #tpu.memory_space<vmem>>, vector<1x128xf32>
    %41 = vector.broadcast %40 : vector<1x128xf32> to vector<8x128xf32>
    %42 = arith.addf %39, %41 : vector<8x128xf32>
    %c0_39 = arith.constant 0 : index
    %c0_40 = arith.constant 0 : index
    %43 = vector.load %arg12[%c0_39, %c0_40] : memref<8x128xf32, #tpu.memory_space<vmem>>, vector<8x128xf32>
    tpu.vector_store %arg12[%c0_39, %c0_40], %42 {strides = array<i32>} : memref<8x128xf32, #tpu.memory_space<vmem>>, vector<8x128xf32>,
    return
  }
}

</mosaic_0001>

<bundles_post_ra>
// kernel: forward.3
= control target key start
LH: loop header
LB: loop body
LE: loop exit
PB: predicated region body
PF: predicated region fallthrough
CT: control target
= control target key end

     0   :  { %v1154_v3 = vmov 0.0|0.0   ;;  %vm1155_vm0 = vmmov 0   ;;  %v1156_v11 = vmov 0.0   ;;  %s1537_s0 = inlined_call_operand.vmem [shape: f32[3,8,64], index: 0, kind: input, shape index: {}]   ;;  %s1538_s1 = inlined_call_operand.vmem [shape: f32[8,64], index: 1, kind: input, shape index: {}]   ;;  %s1539_s2 = inlined_call_operand.vmem [shape: f32[256,64], index: 2, kind: input, shape index: {}]   ;;  %s1540_s3 = inlined_call_operand.vmem [shape: f32[1,64], index: 3, kind: input, shape index: {}]   ;;  %s1541_s4 = inlined_call_operand.vmem [shape: f32[64,64], index: 4, kind: input, shape index: {}]   ;;  %s1542_s5 = inlined_call_operand.vmem [shape: f32[1,64], index: 5, kind: input, shape index: {}]   ;;  %s1543_s6 = inlined_call_operand.vmem [shape: f32[64,64], index: 6, kind: input, shape index: {}]   ;;  %s1544_s7 = inlined_call_operand.vmem [shape: f32[1,64], index: 7, kind: input, shape index: {}]   ;;  %s1545_s8 = inlined_call_operand.vmem [shape: f32[64,128], index: 8, kind: input, shape index: {}]   ;;  %s1546_s9 = inlined_call_operand.vmem [shape: f32[1,128], index: 9, kind: input, shape index: {}]   ;;  %s1547_s10 = inlined_call_operand.vmem [shape: f32[128,128], index: 10, kind: input, shape index: {}]   ;;  %s1548_s11 = inlined_call_operand.vmem [shape: f32[1,128], index: 11, kind: input, shape index: {}]   ;;  %s1549_s12 = inlined_call_operand.hbm [shape: f32[8,128], index: 12, kind: output, shape index: {}]  }
   0x1   :  { %v56_v0 = vld [vmem:[%s1539_s2 + $0x40] sm:$0xff]  ;;  %v57_v1 = vld [vmem:[%s1539_s2 + $0x48] sm:$0xff]  ;;  %1018 = vmatprep.subr.bf16.mxu0 %v1154_v3  ;;  %1030 = vmatprep.subr.bf16.mxu1 %v1154_v3  ;;  %v58_v6 = vld [vmem:[%s1539_s2 + $0x50] sm:$0xff] }
   0x2   :  { %v48_v2 = vld [vmem:[%s1539_s2] sm:$0xff]  ;;  %v1019_v4 = vpack.c.bf16 %v57_v1, %v56_v0  ;;  %v49_v5 = vld [vmem:[%s1539_s2 + $0x8] sm:$0xff]  ;;  %v59_v7 = vld [vmem:[%s1539_s2 + $0x58] sm:$0xff]  ;;  %866 = vmatprep.mubr.msk.f32.mxu0 %vm1155_vm0, %v1156_v11  ;;  %885 = vmatprep.mubr.msk.f32.mxu1 %vm1155_vm0, %v1156_v11 }
   0x3   :  { %v1031_v8 = vpack.c.bf16 %v49_v5, %v48_v2  ;;  %v50_v9 = vld [vmem:[%s1539_s2 + $0x10] sm:$0xff]  ;;  %v51_v10 = vld [vmem:[%s1539_s2 + $0x18] sm:$0xff]  ;;  %v1022_v12 = vpack.c.bf16 %v59_v7, %v58_v6  ;;  %v60_v14 = vld [vmem:[%s1539_s2 + $0x60] sm:$0xff] }
   0x4   :  { %1020 = vmatpush3.bf16.msra.mxu0 %v1019_v4  ;;  %v1034_v13 = vpack.c.bf16 %v51_v10, %v50_v9  ;;  %v61_v15 = vld [vmem:[%s1539_s2 + $0x68] sm:$0xff]  ;;  %v52_v16 = vld [vmem:[%s1539_s2 + $0x20] sm:$0xff]  ;;  %v62_v20 = vld [vmem:[%s1539_s2 + $0x70] sm:$0xff] }
   0x5   :  { %1032 = vmatpush3.bf16.msra.mxu1 %v1031_v8  ;;  %1021 = vmatprep.subr.bf16.mxu0 %v1154_v3  ;;  %v53_v17 = vld [vmem:[%s1539_s2 + $0x28] sm:$0xff]  ;;  %v1025_v18 = vpack.c.bf16 %v61_v15, %v60_v14  ;;  %v63_v21 = vld [vmem:[%s1539_s2 + $0x78] sm:$0xff]  ;;  %v54_v22 = vld [vmem:[%s1539_s2 + $0x30] sm:$0xff] }
   0x6   :  { %1033 = vmatprep.subr.bf16.mxu1 %v1154_v3  ;;  %v1037_v19 = vpack.c.bf16 %v53_v17, %v52_v16  ;;  %v55_v23 = vld [vmem:[%s1539_s2 + $0x38] sm:$0xff]  ;;  %v1028_v24 = vpack.c.bf16 %v63_v21, %v62_v20  ;;  %v211_v26 = vld [vmem:[%s1539_s2 + $0x80] sm:$0xff]  ;;  %v212_v27 = vld [vmem:[%s1539_s2 + $0x88] sm:$0xff] }
   0x7   :  { %v1040_v25 = vpack.c.bf16 %v55_v23, %v54_v22 }
   0x8   :  { %1023 = vmatpush3.bf16.msra.mxu0 %v1022_v12 }
   0x9   :  { %1035 = vmatpush3.bf16.msra.mxu1 %v1034_v13  ;;  %1024 = vmatprep.subr.bf16.mxu0 %v1154_v3 }
   0xa   :  { %1036 = vmatprep.subr.bf16.mxu1 %v1154_v3 }
   0xc   :  { %1026 = vmatpush3.bf16.msra.mxu0 %v1025_v18 }
   0xd   :  { %1038 = vmatpush3.bf16.msra.mxu1 %v1037_v19  ;;  %1027 = vmatprep.subr.bf16.mxu0 %v1154_v3 }
   0xe   :  { %17 = vsyncpa [#allocation3], 0  ;;  %1039 = vmatprep.subr.bf16.mxu1 %v1154_v3  ;;  %v293_v28 = vld [vmem:[%s1539_s2 + $0xc0] sm:$0xff]  ;;  %v294_v29 = vld [vmem:[%s1539_s2 + $0xc8] sm:$0xff]  ;;  %vm64_vm1 = vcmask 523264   ;;  %v1043_v31 = vpack.c.bf16 %v212_v27, %v211_v26  ;;  %s1157_s14 = smov [#allocation2]  }
   0xf   :  { %v756_v30 = vld [vmem:[%s1537_s0 + $0x8] sm:$0xff]  ;;  %v42_v32 = vld [vmem:[%s1537_s0] sm:$0xff]  ;;  %v1055_v33 = vpack.c.bf16 %v294_v29, %v293_v28  ;;  %v213_v34 = vld [vmem:[%s1539_s2 + $0x90] sm:$0xff]  ;;  %s748_s15 = sshll.u32 %s1157_s14, 4  ;;  %s749_s15 = int_to_ptr.vmem [resolvable:$true] %s748_s15 }
  0x10   :  { %1029 = vmatpush3.bf16.msra.mxu0 %v1028_v24  ;;  %v214_v35 = vld [vmem:[%s1539_s2 + $0x98] sm:$0xff]  ;;  %v295_v36 = vld [vmem:[%s1539_s2 + $0xd0] sm:$0xff]  ;;  %v215_v40 = vld [vmem:[%s1539_s2 + $0xa0] sm:$0xff]  ;;  %p1135_p1 = scmp.lt.s32.totalorder %s749_s15, %s749_s15 }
  0x11   :  { %1041 = vmatpush3.bf16.msra.mxu1 %v1040_v25  ;;  %1042 = vmatprep.subr.bf16.mxu0 %v1154_v3  ;;  %v296_v37 = vld [vmem:[%s1539_s2 + $0xd8] sm:$0xff]  ;;  %v1046_v38 = vpack.c.bf16 %v214_v35, %v213_v34  ;;  %v216_v41 = vld [vmem:[%s1539_s2 + $0xa8] sm:$0xff]  ;;  %v297_v42 = vld [vmem:[%s1539_s2 + $0xe0] sm:$0xff] }
  0x12   :  { %1054 = vmatprep.subr.bf16.mxu1 %v1154_v3  ;;  %v1058_v39 = vpack.c.bf16 %v296_v37, %v295_v36  ;;  %v298_v43 = vld [vmem:[%s1539_s2 + $0xe8] sm:$0xff]  ;;  %v1049_v44 = vpack.c.bf16 %v216_v41, %v215_v40  ;;  %v217_v46 = vld [vmem:[%s1539_s2 + $0xb0] sm:$0xff]  ;;  %v218_v47 = vld [vmem:[%s1539_s2 + $0xb8] sm:$0xff] }
  0x13   :  { %867 = vmatmul.mubr.msk.f32.vlgmr.msra.gmra.mrb[0].mxu0 %vm64_vm1, %v756_v30  ;;  %v1061_v45 = vpack.c.bf16 %v298_v43, %v297_v42  ;;  %v299_v48 = vld [vmem:[%s1539_s2 + $0xf0] sm:$0xff]  ;;  %v300_v49 = vld [vmem:[%s1539_s2 + $0xf8] sm:$0xff]  ;;  %v1052_v50 = vpack.c.bf16 %v218_v47, %v217_v46  ;;  %v47_v53 = vld [vmem:[%s1538_s1] sm:$0xff] }
  0x14   :  { %886 = vmatmul.mubr.msk.f32.vlgmr.msra.gmra.mrb[0].mxu1 %vm64_vm1, %v42_v32  ;;  %1044 = vmatpush3.bf16.msra.mxu0 %v1043_v31  ;;  %v1064_v51 = vpack.c.bf16 %v300_v49, %v299_v48  ;;  %v757_v52 = vld [vmem:[%s1537_s0 + $0x10] sm:$0xff]  ;;  %v383_v54 = vld [vmem:[%s1541_s4] sm:$0xff]  ;;  %v384_v55 = vld [vmem:[%s1541_s4 + $0x8] sm:$0xff] }
  0x15   :  { %1056 = vmatpush3.bf16.msra.mxu1 %v1055_v33  ;;  %1045 = vmatprep.subr.bf16.mxu0 %v1154_v3  ;;  %v385_v56 = vld [vmem:[%s1541_s4 + $0x10] sm:$0xff]  ;;  %v1067_v57 = vpack.c.bf16 %v384_v55, %v383_v54  ;;  %v386_v58 = vld [vmem:[%s1541_s4 + $0x18] sm:$0xff]  ;;  %v387_v60 = vld [vmem:[%s1541_s4 + $0x20] sm:$0xff] }
  0x16   :  { %1057 = vmatprep.subr.bf16.mxu1 %v1154_v3  ;;  %904 = vmatprep.mubr.msk.f32.mxu0 %vm1155_vm0, %v1156_v11  ;;  %v1070_v59 = vpack.c.bf16 %v386_v58, %v385_v56  ;;  %v388_v61 = vld [vmem:[%s1541_s4 + $0x28] sm:$0xff]  ;;  %v389_v63 = vld [vmem:[%s1541_s4 + $0x30] sm:$0xff]  ;;  %v390_v0 = vld [vmem:[%s1541_s4 + $0x38] sm:$0xff] }
  0x17   :  { %923 = vmatprep.mubr.msk.f32.mxu1 %vm1155_vm0, %v1156_v11  ;;  %v1073_v62 = vpack.c.bf16 %v388_v61, %v387_v60  ;;  %v1076_v1 = vpack.c.bf16 %v390_v0, %v389_v63  ;;  %v471_v2 = vld [vmem:[%s1543_s6] sm:$0xff]  ;;  %v472_v4 = vld [vmem:[%s1543_s6 + $0x8] sm:$0xff]  ;;  %v473_v5 = vld [vmem:[%s1543_s6 + $0x10] sm:$0xff] }
  0x18   :  { %1047 = vmatpush3.bf16.msra.mxu0 %v1046_v38  ;;  %v1079_v6 = vpack.c.bf16 %v472_v4, %v471_v2  ;;  %v474_v7 = vld [vmem:[%s1543_s6 + $0x18] sm:$0xff]  ;;  %v475_v9 = vld [vmem:[%s1543_s6 + $0x20] sm:$0xff]  ;;  %v476_v10 = vld [vmem:[%s1543_s6 + $0x28] sm:$0xff] }
  0x19   :  { %1059 = vmatpush3.bf16.msra.mxu1 %v1058_v39  ;;  %1048 = vmatprep.subr.bf16.mxu0 %v1154_v3  ;;  %v1082_v8 = vpack.c.bf16 %v474_v7, %v473_v5  ;;  %v1085_v12 = vpack.c.bf16 %v476_v10, %v475_v9  ;;  %v762_v22 = vld [vmem:[%s1540_s3] ss:$0 sm:$0xff]  ;;  %v477_v26 = vld [vmem:[%s1543_s6 + $0x30] sm:$0xff]  ;;  %v478_v27 = vld [vmem:[%s1543_s6 + $0x38] sm:$0xff] }
  0x1a   :  { %1060 = vmatprep.subr.bf16.mxu1 %v1154_v3  ;;  %v1088_v28 = vpack.c.bf16 %v478_v27, %v477_v26  ;;  %v559_v29 = vld [vmem:[%s1545_s8] sm:$0xff]  ;;  %v560_v30 = vld [vmem:[%s1545_s8 + $0x8] sm:$0xff]  ;;  %v561_v31 = vld [vmem:[%s1545_s8 + $0x10] sm:$0xff] }
  0x1b   :  { %v1091_v32 = vpack.c.bf16 %v560_v30, %v559_v29  ;;  %v562_v33 = vld [vmem:[%s1545_s8 + $0x18] sm:$0xff]  ;;  %v563_v35 = vld [vmem:[%s1545_s8 + $0x20] sm:$0xff]  ;;  %v564_v36 = vld [vmem:[%s1545_s8 + $0x28] sm:$0xff] }
  0x1c   :  { %1050 = vmatpush3.bf16.msra.mxu0 %v1049_v44  ;;  %v1094_v34 = vpack.c.bf16 %v562_v33, %v561_v31  ;;  %v1097_v37 = vpack.c.bf16 %v564_v36, %v563_v35  ;;  %v763_v38 = vld [vmem:[%s1542_s5] ss:$0 sm:$0xff]  ;;  %v565_v42 = vld [vmem:[%s1545_s8 + $0x30] sm:$0xff]  ;;  %v566_v43 = vld [vmem:[%s1545_s8 + $0x38] sm:$0xff] }
  0x1d   :  { %1062 = vmatpush3.bf16.msra.mxu1 %v1061_v45  ;;  %1051 = vmatprep.subr.bf16.mxu0 %v1154_v3  ;;  %v1100_v44 = vpack.c.bf16 %v566_v43, %v565_v42  ;;  %v648_v45 = vld [vmem:[%s1547_s10] sm:$0xff]  ;;  %v649_v46 = vld [vmem:[%s1547_s10 + $0x8] sm:$0xff]  ;;  %v651_v48 = vld [vmem:[%s1547_s10 + $0x18] sm:$0xff] }
  0x1e   :  { %1063 = vmatprep.subr.bf16.mxu1 %v1154_v3  ;;  %v1103_v47 = vpack.c.bf16 %v649_v46, %v648_v45  ;;  %v655_v54 = vld [vmem:[%s1547_s10 + $0x38] sm:$0xff]  ;;  %v656_v56 = vld [vmem:[%s1547_s10 + $0x40] sm:$0xff]  ;;  %v661_v63 = vld [vmem:[%s1547_s10 + $0x68] sm:$0xff] }
  0x1f   :  { %v659_v60 = vld [vmem:[%s1547_s10 + $0x58] sm:$0xff] }
  0x20   :  { %1053 = vmatpush3.bf16.msra.mxu0 %v1052_v50  ;;  %v652_v50 = vld [vmem:[%s1547_s10 + $0x20] sm:$0xff]  ;;  %v663_v7 = vld [vmem:[%s1547_s10 + $0x78] sm:$0xff] }
  0x21   :  { %1065 = vmatpush3.bf16.msra.mxu1 %v1064_v51  ;;  %1066 = vmatprep.subr.bf16.mxu0 %v1154_v3  ;;  %v653_v51 = vld [vmem:[%s1547_s10 + $0x28] sm:$0xff] }
  0x22   :  { %1078 = vmatprep.subr.bf16.mxu1 %v1154_v3 }
  0x23   :  { %905 = vmatmul.mubr.msk.f32.vlgmr.msra.gmra.mrb[2].mxu0 %vm64_vm1, %v757_v52  ;;  %v1109_v52 = vpack.c.bf16 %v653_v51, %v652_v50 }
  0x24   :  { %924 = vmatmul.mubr.msk.f32.vlgmr.msra.gmra.mrb[2].mxu1 %vm64_vm1, %v47_v53  ;;  %942 = vmatprep.mubr.msk.f32.mxu0 %vm1155_vm0, %v1156_v11  ;;  %v654_v53 = vld [vmem:[%s1547_s10 + $0x30] sm:$0xff] }
  0x25   :  { %961 = vmatprep.mubr.msk.f32.mxu1 %vm1155_vm0, %v1156_v11  ;;  %1068 = vmatpush3.bf16.msra.mxu0 %v1067_v57  ;;  %v1112_v55 = vpack.c.bf16 %v655_v54, %v654_v53  ;;  %v657_v57 = vld [vmem:[%s1547_s10 + $0x48] sm:$0xff] }
  0x26   :  { %1069 = vmatprep.subr.bf16.mxu0 %v1154_v3  ;;  %1080 = vmatpush3.bf16.msra.mxu1 %v1079_v6  ;;  %v1115_v58 = vpack.c.bf16 %v657_v57, %v656_v56  ;;  %v662_v6 = vld [vmem:[%s1547_s10 + $0x70] sm:$0xff] }
  0x27   :  { %1081 = vmatprep.subr.bf16.mxu1 %v1154_v3 }
  0x29   :  { %1071 = vmatpush3.bf16.msra.mxu0 %v1070_v59  ;;  %v658_v59 = vld [vmem:[%s1547_s10 + $0x50] sm:$0xff] }
  0x2a   :  { %1072 = vmatprep.subr.bf16.mxu0 %v1154_v3  ;;  %1083 = vmatpush3.bf16.msra.mxu1 %v1082_v8  ;;  %v1118_v61 = vpack.c.bf16 %v659_v60, %v658_v59  ;;  %v1124_v8 = vpack.c.bf16 %v663_v7, %v662_v6 }
  0x2b   :  { %1084 = vmatprep.subr.bf16.mxu1 %v1154_v3 }
  0x2d   :  { %1074 = vmatpush3.bf16.msra.mxu0 %v1073_v62  ;;  %v660_v62 = vld [vmem:[%s1547_s10 + $0x60] sm:$0xff] }
  0x2e   :  { %1075 = vmatprep.subr.bf16.mxu0 %v1154_v3  ;;  %1086 = vmatpush3.bf16.msra.mxu1 %v1085_v12  ;;  %v1121_v0 = vpack.c.bf16 %v661_v63, %v660_v62 }
  0x2f   :  { %1087 = vmatprep.subr.bf16.mxu1 %v1154_v3 }
  0x31   :  { %1077 = vmatpush3.bf16.msra.mxu0 %v1076_v1  ;;  %v765_v1 = vld [vmem:[%s1544_s7] ss:$0 sm:$0xff] }
  0x32   :  { %1090 = vmatprep.subr.bf16.mxu0 %v1154_v3  ;;  %1089 = vmatpush3.bf16.msra.mxu1 %v1088_v28 }
  0x33   :  { %1102 = vmatprep.subr.bf16.mxu1 %v1154_v3 }
  0xe6   :  { %v134_v13 = vpop.f32.mrb[0].mxu0 }
  0xe7   :  { %v868_v14 = vpop.f32.mrb[1].mxu0  ;;  %v207_v15 = vpop.f32.mrb[0].mxu1 }
  0xe8   :  { %v208_v16 = vadd.f32 %v207_v15, %v134_v13  ;;  %v887_v17 = vpop.f32.mrb[1].mxu1  ;;  %v769_v14 = vld [vmem:[%s1548_s11] ss:$0 sm:$0xff] }
  0xf6   :  { %v288_v18 = vpop.f32.mrb[2].mxu0 }
  0xf7   :  { %v292_v19 = vadd.f32 %v288_v18, %v208_v16  ;;  %v906_v20 = vpop.f32.mrb[3].mxu0  ;;  %v370_v21 = vpop.f32.mrb[2].mxu1 }
  0xf8   :  { %v925_v23 = vpop.f32.mrb[3].mxu1 }
  0xf9   :  { %v374_v24 = vadd.f32 %v370_v21, %v292_v19 }
  0xfb   :  { %v382_v25 = vadd.f32 %v762_v22, %v374_v24 }
  0xfd   :  { %943 = vmatmul.mubr.msk.f32.vlgmr.msra.gmra.mrb[4].mxu0 %vm64_vm1, %v382_v25 }
  0xfe   :  { %980 = vmatprep.mubr.msk.f32.mxu0 %vm1155_vm0, %v1156_v11  ;;  %1092 = vmatpush3.bf16.msra.mxu0 %v1091_v32 }
  0xff   :  { %1093 = vmatprep.subr.bf16.mxu0 %v1154_v3 }
 0x102   :  { %1095 = vmatpush3.bf16.msra.mxu0 %v1094_v34 }
 0x103   :  { %1096 = vmatprep.subr.bf16.mxu0 %v1154_v3 }
 0x106   :  { %1098 = vmatpush3.bf16.msra.mxu0 %v1097_v37 }
 0x107   :  { %1099 = vmatprep.subr.bf16.mxu0 %v1154_v3 }
 0x10a   :  { %1101 = vmatpush3.bf16.msra.mxu0 %v1100_v44 }
 0x1d0   :  { %v467_v39 = vpop.f32.mrb[4].mxu0 }
 0x1d1   :  { %v468_v40 = vadd.f32 %v763_v38, %v467_v39  ;;  %v944_v41 = vpop.f32.mrb[5].mxu0 }
 0x1d3   :  { %962 = vmatmul.mubr.msk.f32.vlgmr.msra.gmra.mrb[4].mxu1 %vm64_vm1, %v468_v40 }
 0x1d4   :  { %1015 = vmatprep.mubr.msk.f32.mxu1 %vm1155_vm0, %v1156_v11  ;;  %v650_v11 = vld [vmem:[%s1547_s10 + $0x10] sm:$0xff]  ;;  %1104 = vmatpush3.bf16.msra.mxu1 %v1103_v47  ;;  %s1130_s10 = scalar_lea.vmem %s749_s15, 128 }
 0x1d5   :  { %v1106_v49 = vpack.c.bf16 %v651_v48, %v650_v11  ;;  %1105 = vmatprep.subr.bf16.mxu1 %v1154_v3  ;;  %p1131_p0 = scmp.ne.s32.totalorder %s749_s15, %s1130_s10  ;;  %p1136_p2 = scmp.lt.s32.totalorder %s1130_s10, %s1130_s10 }
 0x1d7   :  { %p1137_p3 = por %p1136_p2, %p1135_p1 }
 0x1d8   :  { %1107 = vmatpush3.bf16.msra.mxu1 %v1106_v49 }
 0x1d9   :  { %1108 = vmatprep.subr.bf16.mxu1 %v1154_v3  ;;  %p1138_p4 = pnand %p1137_p3, %p1131_p0 }
 0x1dc   :  { %1110 = vmatpush3.bf16.msra.mxu1 %v1109_v52 }
 0x1dd   :  { %1111 = vmatprep.subr.bf16.mxu1 %v1154_v3 }
 0x1e0   :  { %1113 = vmatpush3.bf16.msra.mxu1 %v1112_v55 }
 0x1e1   :  { %1114 = vmatprep.subr.bf16.mxu1 %v1154_v3 }
 0x1e4   :  { %1116 = vmatpush3.bf16.msra.mxu1 %v1115_v58 }
 0x1e5   :  { %1117 = vmatprep.subr.bf16.mxu1 %v1154_v3 }
 0x1e8   :  { %1119 = vmatpush3.bf16.msra.mxu1 %v1118_v61 }
 0x1e9   :  { %1120 = vmatprep.subr.bf16.mxu1 %v1154_v3 }
 0x1ec   :  { %1122 = vmatpush3.bf16.msra.mxu1 %v1121_v0 }
 0x1ed   :  { %1123 = vmatprep.subr.bf16.mxu1 %v1154_v3  ;;  %v767_v3 = vld [vmem:[%s1546_s9] ss:$0 sm:$0xff] }
 0x1f0   :  { %1125 = vmatpush3.bf16.msra.mxu1 %v1124_v8 }
 0x2a6   :  { %v555_v2 = vpop.f32.mrb[4].mxu1 }
 0x2a7   :  { %v556_v4 = vadd.f32 %v765_v1, %v555_v2  ;;  %v963_v5 = vpop.f32.mrb[5].mxu1 }
 0x2a9   :  { %981 = vmatmul.mubr.msk.f32.vlgmr.msra.gmra.mrb[6].mxu0 %vm64_vm1, %v556_v4 }
 0x37c   :  { %v643_v9 = vpop.f32.mrb[6].mxu0 }
 0x37d   :  { %v644_v10 = vadd.f32 %v767_v3, %v643_v9  ;;  %v982_v12 = vpop.f32.mrb[7].mxu0 }
 0x37f   :  { %v647_v13 = vmax.f32 %v644_v10, 0.0 }
 0x381   :  { %1016 = vmatmul.mubr.f32.vlgmr.msra.gmra.mrb[6].mxu1 %v647_v13 }
 0x454   :  { %v737_v15 = vpop.f32.mrb[6].mxu1 }
 0x455   :  { %v738_v16 = vadd.f32 %v769_v14, %v737_v15  ;;  %v1017_v17 = vpop.f32.mrb[7].mxu1 }
 0x457   :  { %741 = vst [vmem:[#allocation2] sm:$0xff] %v738_v16 }
 0x458   :  { %1141 = shalt.err (!%p1138_p4)
}
 0x459   :  { %s1142_s17 = scalar_lea.hbm %s1549_s12, 128 }
 0x45a   :  { %p1143_p5 = scmp.ne.s32.totalorder %s1549_s12, %s1142_s17  ;;  %p1146_p6 = scmp.lt.u32.totalorder %s1142_s17, %s1549_s12 }
 0x45c   :  { %p1148_p7 = pnand %p1146_p6, %p1143_p5 }
 0x45e   :  { %1151 = shalt.err (!%p1148_p7)
}
 0x45f   :  { %751 = dma.vmem_to_hbm [thread:$0]  %s749_s15, 128, %s1549_s12, [#allocation3]  }
 0x460   :  { %1152 = dma.done.wait [#allocation3], 128  }
 0x461   :  { %1153 = vsyncadd [#allocation3], 4294967168 }
 0x462   :  { %755 = vsyncpa [#allocation3], 1 }

// kernel: forward.2
= control target key start
LH: loop header
LB: loop body
LE: loop exit
PB: predicated region body
PF: predicated region fallthrough
CT: control target
= control target key end

     0   :  { %s6945_s25 = smov 0   ;;  %s6947_s26 = smov 0   ;;  %s7796_s0 = inlined_call_operand.vmem [shape: f32[3,8,64], index: 0, kind: input, shape index: {}]   ;;  %s7797_s1 = inlined_call_operand.vmem [shape: bf16[6,64,192], index: 1, kind: input, shape index: {}]   ;;  %s7798_s2 = inlined_call_operand.vmem [shape: f32[6,1,192], index: 2, kind: input, shape index: {}]   ;;  %s7799_s3 = inlined_call_operand.vmem [shape: bf16[6,64,64], index: 3, kind: input, shape index: {}]   ;;  %s7800_s4 = inlined_call_operand.vmem [shape: f32[6,1,64], index: 4, kind: input, shape index: {}]   ;;  %s7801_s5 = inlined_call_operand.vmem [shape: bf16[6,64,2048], index: 5, kind: input, shape index: {}]   ;;  %s7802_s6 = inlined_call_operand.vmem [shape: f32[6,1,2048], index: 6, kind: input, shape index: {}]   ;;  %s7803_s7 = inlined_call_operand.vmem [shape: bf16[6,2048,64], index: 7, kind: input, shape index: {}]   ;;  %s7804_s8 = inlined_call_operand.vmem [shape: f32[6,1,64], index: 8, kind: input, shape index: {}]   ;;  %s7805_s9 = inlined_call_operand.vmem [shape: f32[6,1,64], index: 9, kind: input, shape index: {}]   ;;  %s7806_s10 = inlined_call_operand.vmem [shape: f32[6,1,64], index: 10, kind: input, shape index: {}]   ;;  %s7807_s11 = inlined_call_operand.vmem [shape: f32[6,1,64], index: 11, kind: input, shape index: {}]   ;;  %s7808_s12 = inlined_call_operand.vmem [shape: f32[6,1,64], index: 12, kind: input, shape index: {}]   ;;  %s7809_s13 = inlined_call_operand.vmem [shape: f32[3,8,64], index: 13, kind: output, shape index: {}]  }
   0x1   :  { %7815 = sst [smem:[#allocation9_spill]] %s7796_s0  ;;  %s6949_s27 = smov 0  }
   0x2   :  { %7816 = sst [smem:[#allocation10_spill]] %s7797_s1  ;;  %s6951_s28 = smov 0  }
   0x3   :  { %7817 = sst [smem:[#allocation11_spill]] %s7798_s2  ;;  %s6953_s29 = smov 0  }
   0x4   :  { %7818 = sst [smem:[#allocation12_spill]] %s7799_s3 }
   0x5   :  { %7819 = sst [smem:[#allocation13_spill]] %s7801_s5 }
   0x6   :  { %7820 = sst [smem:[#allocation14_spill]] %s7802_s6 }
   0x7   :  { %7821 = sst [smem:[#allocation15_spill]] %s7809_s13 }
   0x8 LB: > { %7822 = sst [smem:[#allocation2_spill]] %s6845_s27  ;;  %s32_s30 = sadd.s32 1, %s6845_s27  ;;  %s6853_s29 = sphi %s6953_s29, %s23_s29   ;;  %s6849_s28 = sphi %s6951_s28, %s7844_s28   ;;  %s6845_s27 = sphi %s6949_s27, %s7843_s27   ;;  %s6841_s26 = sphi %s6947_s26, %s7842_s26   ;;  %s6837_s25 = sphi %s6945_s25, %s7841_s25  }
   0x9   : > { %7823 = sst [smem:[#allocation3_spill]] %s6849_s28  ;;  %s35_s14 = sadd.s32 1, %s6849_s28 }
   0xa   : > { %7824 = sst [smem:[#allocation4_spill]] %s6853_s29  ;;  %p33_p0 = scmp.ge.s32.totalorder %s32_s30, 2 }
   0xb   : > { %p5961_p1 = scmp.ge.s32.totalorder %s6853_s29, 1  ;;  %p600_p2 = scmp.lt.s32.totalorder %s6853_s29, 7 }
   0xc   : > { %s7846_s30 = smov (%p33_p0, %s32_s30), 0  ;;  %s7848_s14 = smov (!%p33_p0, %s35_s14), %s6849_s28 }
   0xd   : > { %7825 = sst [smem:[#allocation5_spill]] %s7846_s30  ;;  %p601_p3 = pnand %p5961_p1, %p600_p2 }
   0xe   : > { %p37_p4 = scmp.ge.s32.totalorder %s7848_s14, 3 }
   0xf   : > { %604 = sbr.rel (%p601_p3) target bundleno = 2836 (0xb14), region = 72 }
  0x10   : > { %s7850_s14 = smov (%p37_p4, %s7848_s14), 0 }
  0x11   : > { %7826 = sst [smem:[#allocation6_spill]] %s7850_s14 }
  0x16   : > { %p712_p5 = scmp.lt.s32.totalorder %s6841_s26, 2  ;;  %s5963_s15 = sshll.u32 %s6841_s26, 1 }
  0x17   : > { %s717_s16 = sadd.s32 %s6837_s25, %s5963_s15  ;;  %s7827_s0 = sld [smem:[#allocation9_spill]] }
  0x18   : > { %s7852_s26 = smov (!%p712_p5, %s6841_s26), 2  ;;  %p718_p6 = scmp.lt.s32.totalorder %s717_s16, 5 }
  0x19   : > { %s5962_s17 = sshll.u32 %s7852_s26, 3  ;;  %s7828_s13 = sld [smem:[#allocation15_spill]] }
  0x1a   : > { %s7854_s16 = smov (!%p718_p6, %s717_s16), 5  ;;  %s7830_s1 = sld [smem:[#allocation10_spill]] }
  0x1b   : > { %s6265_s24 = sshll.u32 %s7854_s16, 6  ;;  %s5967_s26 = sshll.u32 %s7854_s16, 1 }
  0x1c   : > { %s7831_s2 = sld [smem:[#allocation11_spill]]  ;;  %s7832_s3 = sld [smem:[#allocation12_spill]] }
  0x1d   : > { %s715_s20 = scalar_lea.vmem %s7827_s0, %s5962_s17  ;;  %s6266_s0 = sshll.u32 %s7854_s16, 5 }
  0x1e   : > { %s7833_s5 = sld [smem:[#allocation13_spill]]  ;;  %s7834_s6 = sld [smem:[#allocation14_spill]] }
  0x1f   : > { %s6984_s23 = scalar_lea.vmem %s7828_s13, %s5962_s17  ;;  %s779_s28 = scalar_lea.vmem %s7804_s8, %s7854_s16 }
  0x20   : > { %7829 = sst [smem:[#allocation7_spill]] %s6984_s23  ;;  %s6993_s17 = scalar_lea.vmem %s7830_s1, %s6265_s24 }
  0x21   : > { %s6267_s23 = sshll.u32 %s7854_s16, 9  ;;  %s5976_s1 = sshll.u32 %s7854_s16, 4 }
  0x22   : > { %s6998_s22 = scalar_lea.vmem %s7831_s2, %s5967_s26  ;;  %s7008_s29 = scalar_lea.vmem %s7832_s3, %s6266_s0 }
  0x23   : > { %s6268_s2 = sshll.u32 %s7854_s16, 10  ;;  %s793_s19 = scalar_lea.vmem %s7806_s10, %s7854_s16 }
  0x24   : > { %s7014_s24 = scalar_lea.vmem %s7833_s5, %s6267_s23  ;;  %s7020_s21 = scalar_lea.vmem %s7834_s6, %s5976_s1 }
  0x25   : > { %7835 = sst [smem:[#allocation8_spill]] %s7020_s21  ;;  %s7026_s30 = scalar_lea.vmem %s7803_s7, %s6268_s2 }
  0x26   : > { %s786_s23 = scalar_lea.vmem %s7805_s9, %s7854_s16  ;;  %s800_s6 = scalar_lea.vmem %s7807_s11, %s7854_s16 }
  0x27   : > { %s807_s2 = scalar_lea.vmem %s7808_s12, %s7854_s16  ;;  %p5986_p7 = scmp.ne.s32.totalorder %s6837_s25, 0 }
  0x28   : > { %v819_v0 = vld [vmem:[%s715_s20] sm:$0xff] (!%p5986_p7)  ;;  %s7836_s14 = sld [smem:[#allocation7_spill]] (!%p5986_p7)  ;;  %vm820_vm0 = vcmask (!%p5986_p7), 523264  }
  0x29   : > { %818 = sbr.rel (%p5986_p7) target bundleno = 48 (0x30), region = 76 }
  0x2e   : > { %821 = vst.msk [vmem:[%s7836_s14] sm:$0xff] (!%p5986_p7), %vm820_vm0, %v819_v0 }
  0x30 PF: > { %v6634_v1 = vld [vmem:[%s6993_s17 + $0x4] ss:$8 sps:$4 sm:$0xff]   ;;  %s7837_s3 = sld [smem:[#allocation7_spill]]  ;;  %v6636_v2 = vld [vmem:[%s6993_s17] ss:$8 sps:$4 sm:$0xff]   ;;  %v6855_v3 = vmov 0   ;;  %v834_v12 = vlaneseq }
  0x31   : > { %920 = vmatprep.mubr.bf16.mxu0 %v6855_v3  ;;  %888 = vmatprep.subr.bf16.mxu0 %v6634_v1  ;;  %v6637_v4 = vld [vmem:[%s6993_s17 + $0x14] ss:$8 sps:$4 sm:$0xff]   ;;  %v6639_v5 = vld [vmem:[%s6993_s17 + $0x10] ss:$8 sps:$4 sm:$0xff]   ;;  %v6640_v6 = vld [vmem:[%s6993_s17 + $0x24] ss:$8 sps:$4 sm:$0xff]  }
  0x32   : > { %889 = vmatpush1.bf16.msra.mxu0 %v6636_v2  ;;  %v6642_v7 = vld [vmem:[%s6993_s17 + $0x20] ss:$8 sps:$4 sm:$0xff]   ;;  %v6643_v8 = vld [vmem:[%s6993_s17 + $0x34] ss:$8 sps:$4 sm:$0xff]   ;;  %vm884_vm1 = vcmask 523264   ;;  %v7061_v13 = vshrl.u32 %v834_v12, 7 }
  0x33   : > { %890 = vmatprep.subr.bf16.mxu0 %v6637_v4  ;;  %v6645_v9 = vld [vmem:[%s6993_s17 + $0x30] ss:$8 sps:$4 sm:$0xff]   ;;  %v7067_v15 = vld [vmem:[%s6998_s22] sm:$0x3]  ;;  %s6856_s5 = smov 104   ;;  %s6857_s25 = smov 120  }
  0x34   : > { %v7064_v14 = vsub.s32 0, %v7061_v13  ;;  %s6858_s20 = smov 96   ;;  %s6859_s17 = smov 112   ;;  %v6864_v22 = vmov 1983009808   ;;  %v6866_v54 = vmov 0.0  }
  0x35   : > { %s6860_s22 = smov 80   ;;  %s6861_s21 = smov 88   ;;  %v954_v23 = vunpack.c.l.s4 %v6864_v22  ;;  %v6865_v24 = vmov 1934713408   ;;  %6487 = vmatprep.subr.mxu1 %v6866_v54  ;;  %vm6867_vm2 = vmmov 0   ;;  %vm1813_vm3 = vcmask 64512  }
  0x36   : > { %891 = vmatpush1.bf16.msra.mxu0 %v6639_v5  ;;  %v822_v10 = vld [vmem:[%s7837_s3] sm:$0xff]  ;;  %v837_v16 = vrot.slane %v7067_v15, %v7064_v14  ;;  %s6862_s0 = smov 64   ;;  %s6863_s27 = smov 72   ;;  %v1018_v25 = vunpack.c.l.s4 %v6865_v24  ;;  %6489 = vmatprep.mubr.msk.f32.mxu1 %vm6867_vm2, %v6866_v54  ;;  %vm3403_vm4 = vcmask 130048   ;;  %vm3405_vm5 = vcmask 195584  }
  0x37   : > { %892 = vmatprep.subr.bf16.mxu0 %v6640_v6  ;;  %v823_v11 = vpack.c.bf16 %v822_v10, %v822_v10  ;;  %v955_v26 = vunpack.c.0.s8 %v954_v23  ;;  %s6868_s15 = smov 16   ;;  %s6869_s18 = smov 8   ;;  %vm3407_vm6 = vcmask 261120   ;;  %vm3409_vm7 = vcmask 326656  }
  0x38   : > { %v1019_v31 = vunpack.c.0.s8 %v1018_v25  ;;  %s6870_s1 = smov 24   ;;  %s6871_s26 = smov 40   ;;  %vm3411_vm8 = vcmask 392192   ;;  %vm3413_vm9 = vcmask 457728  }
  0x39   : > { %v7083_v32 = vsub.s32 %v955_v26, %v7061_v13  ;;  %s6873_s13 = smov 56   ;;  %s6874_s14 = smov 48  }
  0x3a   : > { %893 = vmatpush1.bf16.msra.mxu0 %v6642_v7  ;;  %v7088_v37 = vsub.s32 %v1019_v31, %v7061_v13 }
  0x3b   : > { %894 = vmatprep.subr.bf16.mxu0 %v6643_v8 }
  0x3e   : > { %895 = vmatpush1.bf16.msra.mxu0 %v6645_v9 }
  0x3f   : > { %6482 = vmatprep.subr.mxu0 %v6866_v54 }
  0x41   : > { %5995 = vmatmul.mubr.msk.bf16.vlgmr.msra.gmra.mrb[0].mxu0 %vm884_vm1, %v823_v11 }
  0x42   : > { %6484 = vmatprep.mubr.msk.f32.mxu0 %vm6867_vm2, %v6866_v54 }
 0x114   : > { %v922_v17 = vpop.f32.mrb[0].mxu0 }
 0x115   : > { %v923_v18 = vadd.f32 %v922_v17, %v837_v16  ;;  %v7071_v19 = vpop.f32.mrb[1].mxu0 }
 0x116   : > { %v926_v20 = vpop.f32.mrb[2].mxu0 }
 0x117   : > { %v927_v21 = vpop.f32.mrb[3].mxu0  ;;  %936 = vrot.lane.b32.xlu1 %v923_v18, %s6856_s5  ;;  %930 = vrot.lane.b32.xlu0 %v923_v18, %s6857_s25 }
 0x11b   : > { %939 = vrot.lane.b32.xlu1 %v923_v18, %s6858_s20  ;;  %933 = vrot.lane.b32.xlu0 %v923_v18, %s6859_s17 }
 0x11f   : > { %945 = vrot.lane.b32.xlu1 %v923_v18, %s6860_s22  ;;  %942 = vrot.lane.b32.xlu0 %v923_v18, %s6861_s21 }
 0x123   : > { %1223 = vrot.lane.b32.xlu1 %v923_v18, %s6862_s0  ;;  %948 = vrot.lane.b32.xlu0 %v923_v18, %s6863_s27 }
 0x189   : > { %v937_v27 = vpop.permute.xlu1 %936  ;;  %v931_v28 = vpop.permute.xlu0 %930 }
 0x18a   : > { %v967_v29 = vcombine.low %v931_v28, %v937_v27  ;;  %v968_v30 = vcombine.high %v931_v28, %v937_v27  ;;  %1225 = vrot.lane.b32.xlu0 %v931_v28, %s6862_s0 }
 0x18c   : > { %v975_v38 = vrot.slane %v967_v29, %v7083_v32  ;;  %v982_v39 = vrot.slane %v968_v30, %v7083_v32 }
 0x18d   : > { %v940_v33 = vpop.permute.xlu1 %939  ;;  %v934_v34 = vpop.permute.xlu0 %933 }
 0x18e   : > { %v951_v35 = vcombine.low %v923_v18, %v934_v34  ;;  %v952_v36 = vcombine.high %v923_v18, %v934_v34  ;;  %1229 = vrot.lane.b32.xlu0 %v937_v27, %s6862_s0  ;;  %1227 = vrot.lane.b32.xlu1 %v934_v34, %s6862_s0 }
 0x190   : > { %v959_v40 = vrot.slane %v951_v35, %v7083_v32  ;;  %v966_v41 = vrot.slane %v952_v36, %v7083_v32 }
 0x191   : > { %v946_v42 = vpop.permute.xlu1 %945  ;;  %v943_v43 = vpop.permute.xlu0 %942 }
 0x192   : > { %v1015_v44 = vcombine.low %v959_v40, %v975_v38  ;;  %v1016_v45 = vcombine.high %v959_v40, %v975_v38  ;;  %v1031_v46 = vcombine.low %v966_v41, %v982_v39  ;;  %v1032_v47 = vcombine.high %v966_v41, %v982_v39  ;;  %1231 = vrot.lane.b32.xlu1 %v940_v33, %s6862_s0 }
 0x193   : > { %v983_v48 = vcombine.low %v940_v33, %v946_v42  ;;  %v984_v49 = vcombine.high %v940_v33, %v946_v42  ;;  %1233 = vrot.lane.b32.xlu0 %v943_v43, %s6862_s0 }
 0x194   : > { %v1023_v50 = vrot.slane %v1015_v44, %v7088_v37  ;;  %v1030_v51 = vrot.slane %v1016_v45, %v7088_v37  ;;  %v1039_v52 = vrot.slane %v1031_v46, %v7088_v37  ;;  %v1046_v53 = vrot.slane %v1032_v47, %v7088_v37 }
 0x195   : > { %v949_v55 = vpop.permute.xlu0 %948  ;;  %v991_v2 = vrot.slane %v983_v48, %v7083_v32  ;;  %v998_v4 = vrot.slane %v984_v49, %v7083_v32 }
 0x196   : > { %v5996_v56 = vcombine.low %v1023_v50, %v1030_v51  ;;  %v5998_v57 = vcombine.high %v1023_v50, %v1030_v51  ;;  %v6000_v58 = vcombine.low %v1039_v52, %v1046_v53  ;;  %v6002_v59 = vcombine.high %v1039_v52, %v1046_v53  ;;  %1235 = vrot.lane.b32.xlu1 %v946_v42, %s6862_s0  ;;  %v1224_v53 = vpop.permute.xlu1 %1223 }
 0x197   : > { %v999_v60 = vcombine.low %v943_v43, %v949_v55  ;;  %v1000_v61 = vcombine.high %v943_v43, %v949_v55  ;;  %1237 = vrot.lane.b32.xlu0 %v949_v55, %s6862_s0 }
 0x198   : > { %v1095_v62 = vrot.slane %v5996_v56, %v7083_v32  ;;  %v1111_v63 = vrot.slane %v5998_v57, %v7083_v32  ;;  %v1127_v0 = vrot.slane %v6000_v58, %v7083_v32  ;;  %v1143_v1 = vrot.slane %v6002_v59, %v7083_v32 }
 0x199   : > { %v1007_v5 = vrot.slane %v999_v60, %v7083_v32  ;;  %v1014_v6 = vrot.slane %v1000_v61, %v7083_v32 }
 0x19a   : > { %v1151_v7 = vcombine.low %v1095_v62, %v1111_v63  ;;  %v1152_v8 = vcombine.high %v1095_v62, %v1111_v63  ;;  %v1183_v9 = vcombine.low %v1127_v0, %v1143_v1  ;;  %v1184_v10 = vcombine.high %v1127_v0, %v1143_v1 }
 0x19b   : > { %v1047_v11 = vcombine.low %v991_v2, %v1007_v5  ;;  %v1048_v12 = vcombine.high %v991_v2, %v1007_v5  ;;  %v1063_v16 = vcombine.low %v998_v4, %v1014_v6  ;;  %v1064_v17 = vcombine.high %v998_v4, %v1014_v6 }
 0x19c   : > { %v7117_v18 = vrot.slane %v1151_v7, %v7088_v37  ;;  %v7120_v20 = vrot.slane %v1183_v9, %v7088_v37  ;;  %v7123_v21 = vrot.slane %v1152_v8, %v7088_v37  ;;  %v7126_v22 = vrot.slane %v1184_v10, %v7088_v37 }
 0x19d   : > { %v1055_v23 = vrot.slane %v1047_v11, %v7088_v37  ;;  %v1062_v24 = vrot.slane %v1048_v12, %v7088_v37  ;;  %v1071_v25 = vrot.slane %v1063_v16, %v7088_v37  ;;  %v1078_v26 = vrot.slane %v1064_v17, %v7088_v37 }
 0x19e   : > { %v1215_v27 = vcombine.low %v7117_v18, %v7120_v20  ;;  %v1216_v28 = vcombine.high %v7117_v18, %v7120_v20  ;;  %v1217_v29 = vcombine.low %v7123_v21, %v7126_v22  ;;  %v1218_v30 = vcombine.high %v7123_v21, %v7126_v22 }
 0x19f   : > { %v5997_v31 = vcombine.low %v1055_v23, %v1062_v24  ;;  %v5999_v33 = vcombine.high %v1055_v23, %v1062_v24  ;;  %v6001_v34 = vcombine.low %v1071_v25, %v1078_v26  ;;  %v6003_v35 = vcombine.high %v1071_v25, %v1078_v26 }
 0x1a1   : > { %v1102_v36 = vrot.slane %v5997_v31, %v7083_v32  ;;  %v1118_v38 = vrot.slane %v5999_v33, %v7083_v32  ;;  %v1134_v39 = vrot.slane %v6001_v34, %v7083_v32  ;;  %v1150_v40 = vrot.slane %v6003_v35, %v7083_v32 }
 0x1a3   : > { %v1167_v41 = vcombine.low %v1102_v36, %v1118_v38  ;;  %v1168_v42 = vcombine.high %v1102_v36, %v1118_v38  ;;  %v1199_v43 = vcombine.low %v1134_v39, %v1150_v40  ;;  %v1200_v44 = vcombine.high %v1134_v39, %v1150_v40 }
 0x1a5   : > { %v7145_v45 = vrot.slane %v1167_v41, %v7088_v37  ;;  %v7148_v46 = vrot.slane %v1199_v43, %v7088_v37  ;;  %v7151_v47 = vrot.slane %v1168_v42, %v7088_v37  ;;  %v7154_v48 = vrot.slane %v1200_v44, %v7088_v37 }
 0x1a7   : > { %v1220_v49 = vcombine.high %v7145_v45, %v7148_v46  ;;  %v1219_v50 = vcombine.low %v7145_v45, %v7148_v46  ;;  %v1222_v51 = vcombine.high %v7151_v47, %v7154_v48  ;;  %v1221_v52 = vcombine.low %v7151_v47, %v7154_v48 }
 0x1fc   : > { %v1226_v55 = vpop.permute.xlu0 %1225 }
 0x200   : > { %v1228_v56 = vpop.permute.xlu1 %1227  ;;  %v1230_v57 = vpop.permute.xlu0 %1229 }
 0x201   : > { %v1247_v58 = vcombine.low %v1224_v53, %v1228_v56  ;;  %v1248_v59 = vcombine.high %v1224_v53, %v1228_v56  ;;  %v1263_v60 = vcombine.low %v1226_v55, %v1230_v57  ;;  %v1264_v61 = vcombine.high %v1226_v55, %v1230_v57 }
 0x203   : > { %v1255_v62 = vrot.slane %v1247_v58, %v7083_v32  ;;  %v1262_v63 = vrot.slane %v1248_v59, %v7083_v32  ;;  %v1271_v0 = vrot.slane %v1263_v60, %v7083_v32  ;;  %v1278_v1 = vrot.slane %v1264_v61, %v7083_v32 }
 0x204   : > { %v1232_v2 = vpop.permute.xlu1 %1231 }
 0x205   : > { %v1311_v4 = vcombine.low %v1255_v62, %v1271_v0  ;;  %v1312_v5 = vcombine.high %v1255_v62, %v1271_v0  ;;  %v1327_v6 = vcombine.low %v1262_v63, %v1278_v1  ;;  %v1328_v7 = vcombine.high %v1262_v63, %v1278_v1  ;;  %v1234_v8 = vpop.permute.xlu0 %1233 }
 0x207   : > { %v1319_v9 = vrot.slane %v1311_v4, %v7088_v37  ;;  %v1326_v10 = vrot.slane %v1312_v5, %v7088_v37  ;;  %v1335_v11 = vrot.slane %v1327_v6, %v7088_v37  ;;  %v1342_v12 = vrot.slane %v1328_v7, %v7088_v37 }
 0x208   : > { %v1236_v16 = vpop.permute.xlu1 %1235 }
 0x209   : > { %v6004_v17 = vcombine.low %v1319_v9, %v1326_v10  ;;  %v6006_v23 = vcombine.high %v1319_v9, %v1326_v10  ;;  %v6008_v24 = vcombine.low %v1335_v11, %v1342_v12  ;;  %v6010_v25 = vcombine.high %v1335_v11, %v1342_v12  ;;  %v1238_v26 = vpop.permute.xlu0 %1237 }
 0x20a   : > { %v1279_v31 = vcombine.low %v1232_v2, %v1236_v16  ;;  %v1280_v33 = vcombine.high %v1232_v2, %v1236_v16  ;;  %v1295_v34 = vcombine.low %v1234_v8, %v1238_v26  ;;  %v1296_v35 = vcombine.high %v1234_v8, %v1238_v26 }
 0x20b   : > { %v1391_v36 = vrot.slane %v6004_v17, %v7083_v32  ;;  %v1407_v38 = vrot.slane %v6006_v23, %v7083_v32  ;;  %v1423_v39 = vrot.slane %v6008_v24, %v7083_v32  ;;  %v1439_v40 = vrot.slane %v6010_v25, %v7083_v32 }
 0x20c   : > { %v1287_v41 = vrot.slane %v1279_v31, %v7083_v32  ;;  %v1294_v42 = vrot.slane %v1280_v33, %v7083_v32  ;;  %v1303_v43 = vrot.slane %v1295_v34, %v7083_v32  ;;  %v1310_v44 = vrot.slane %v1296_v35, %v7083_v32 }
 0x20d   : > { %v1447_v53 = vcombine.low %v1391_v36, %v1407_v38  ;;  %v1448_v55 = vcombine.high %v1391_v36, %v1407_v38  ;;  %v1479_v56 = vcombine.low %v1423_v39, %v1439_v40  ;;  %v1480_v57 = vcombine.high %v1423_v39, %v1439_v40 }
 0x20e   : > { %v1343_v58 = vcombine.low %v1287_v41, %v1303_v43  ;;  %v1344_v59 = vcombine.high %v1287_v41, %v1303_v43  ;;  %v1359_v60 = vcombine.low %v1294_v42, %v1310_v44  ;;  %v1360_v61 = vcombine.high %v1294_v42, %v1310_v44 }
 0x20f   : > { %v1455_v62 = vrot.slane %v1447_v53, %v7088_v37  ;;  %v1487_v63 = vrot.slane %v1479_v56, %v7088_v37  ;;  %v1462_v7 = vrot.slane %v1448_v55, %v7088_v37  ;;  %v1494_v8 = vrot.slane %v1480_v57, %v7088_v37 }
 0x210   : > { %v1351_v0 = vrot.slane %v1343_v58, %v7088_v37  ;;  %v1358_v1 = vrot.slane %v1344_v59, %v7088_v37  ;;  %v1367_v2 = vrot.slane %v1359_v60, %v7088_v37  ;;  %v1374_v4 = vrot.slane %v1360_v61, %v7088_v37 }
 0x211   : > { %v1511_v5 = vcombine.low %v1455_v62, %v1487_v63  ;;  %v1512_v6 = vcombine.high %v1455_v62, %v1487_v63  ;;  %v1513_v25 = vcombine.low %v1462_v7, %v1494_v8 }
 0x212   : > { %v6005_v9 = vcombine.low %v1351_v0, %v1358_v1  ;;  %v6007_v10 = vcombine.high %v1351_v0, %v1358_v1  ;;  %v6009_v11 = vcombine.low %v1367_v2, %v1374_v4  ;;  %v6011_v12 = vcombine.high %v1367_v2, %v1374_v4 }
 0x213   : > { %6483 = vmatpush3.xpose.msk.msra.mxu0 %vm1813_vm3, %v1511_v5  ;;  %6488 = vmatpush3.xpose.msk.msra.mxu1 %vm1813_vm3, %v1512_v6 }
 0x214   : > { %v1398_v16 = vrot.slane %v6005_v9, %v7083_v32  ;;  %v1414_v17 = vrot.slane %v6007_v10, %v7083_v32  ;;  %v1430_v23 = vrot.slane %v6009_v11, %v7083_v32  ;;  %v1446_v24 = vrot.slane %v6011_v12, %v7083_v32  ;;  %6492 = vmatprep.subr.mxu1 %v6866_v54 }
 0x215   : > { %6507 = vmatprep.subr.mxu0 %v6866_v54 }
 0x216   : > { %v1463_v26 = vcombine.low %v1398_v16, %v1414_v17  ;;  %v1464_v31 = vcombine.high %v1398_v16, %v1414_v17  ;;  %v1495_v33 = vcombine.low %v1430_v23, %v1446_v24  ;;  %v1496_v34 = vcombine.high %v1430_v23, %v1446_v24  ;;  %6485 = vmatmul.mubr.msk.f32.vlgmr.msra.gmra.mrb[4].mxu0 %vm1813_vm3, %v1215_v27 }
 0x217   : > { %6490 = vmatmul.mubr.msk.f32.vlgmr.msra.gmra.mrb[0].mxu1 %vm1813_vm3, %v1216_v28  ;;  %6509 = vmatprep.mubr.msk.f32.mxu0 %vm6867_vm2, %v6866_v54  ;;  %v1514_v27 = vcombine.high %v1462_v7, %v1494_v8  ;;  %v7269_v7 = vsub.s32 1, %v7061_v13 }
 0x218   : > { %6493 = vmatpush3.xpose.msk.msra.mxu1 %vm1813_vm3, %v1513_v25  ;;  %6494 = vmatprep.mubr.msk.f32.mxu1 %vm6867_vm2, %v6866_v54  ;;  %v1471_v35 = vrot.slane %v1463_v26, %v7088_v37  ;;  %v1503_v36 = vrot.slane %v1495_v33, %v7088_v37  ;;  %v1478_v18 = vrot.slane %v1464_v31, %v7088_v37 }
 0x219   : > { %6497 = vmatprep.subr.mxu1 %v6866_v54  ;;  %v1510_v20 = vrot.slane %v1496_v34, %v7088_v37  ;;  %v841_v8 = vrot.slane %v7067_v15, %v7269_v7 }
 0x21a   : > { %v1516_v38 = vcombine.high %v1471_v35, %v1503_v36  ;;  %v1515_v28 = vcombine.low %v1471_v35, %v1503_v36 }
 0x21b   : > { %6495 = vmatmul.mubr.msk.f32.vlgmr.msra.gmra.mrb[2].mxu1 %vm1813_vm3, %v1217_v29  ;;  %v1518_v39 = vcombine.high %v1478_v18, %v1510_v20  ;;  %v1517_v21 = vcombine.low %v1478_v18, %v1510_v20  ;;  %v7274_v9 = vadd.f32 %v7071_v19, %v841_v8 }
 0x21c   : > { %6498 = vmatpush3.xpose.msk.msra.mxu1 %vm1813_vm3, %v1514_v27  ;;  %6508 = vmatpush3.xpose.msk.msra.mxu0 %vm1813_vm3, %v1516_v38 }
 0x21d   : > { %6499 = vmatprep.mubr.msk.f32.mxu1 %vm6867_vm2, %v6866_v54  ;;  %6502 = vmatprep.subr.mxu1 %v6866_v54 }
 0x21e   : > { %6517 = vmatprep.subr.mxu0 %v6866_v54 }
 0x21f   : > { %6500 = vmatmul.mubr.msk.f32.vlgmr.msra.gmra.mrb[4].mxu1 %vm1813_vm3, %v1218_v30  ;;  %6510 = vmatmul.mubr.msk.f32.vlgmr.msra.gmra.mrb[6].mxu0 %vm1813_vm3, %v1220_v49 }
 0x220   : > { %6503 = vmatpush3.xpose.msk.msra.mxu1 %vm1813_vm3, %v1515_v28  ;;  %6518 = vmatpush3.xpose.msk.msra.mxu0 %vm1813_vm3, %v1518_v39 }
 0x221   : > { %6504 = vmatprep.mubr.msk.f32.mxu1 %vm6867_vm2, %v6866_v54  ;;  %6519 = vmatprep.mubr.msk.f32.mxu0 %vm6867_vm2, %v6866_v54 }
 0x222   : > { %6512 = vmatprep.subr.mxu1 %v6866_v54  ;;  %6527 = vmatprep.subr.mxu0 %v6866_v54 }
 0x223   : > { %6505 = vmatmul.mubr.msk.f32.vlgmr.msra.gmra.mrb[6].mxu1 %vm1813_vm3, %v1219_v50  ;;  %6520 = vmatmul.mubr.msk.f32.vlgmr.msra.gmra.mrb[8].mxu0 %vm1813_vm3, %v1222_v51 }
 0x224   : > { %6513 = vmatpush3.xpose.msk.msra.mxu1 %vm1813_vm3, %v1517_v21  ;;  %6514 = vmatprep.mubr.msk.f32.mxu1 %vm6867_vm2, %v6866_v54 }
 0x225   : > { %6522 = vmatprep.subr.mxu1 %v6866_v54  ;;  %6529 = vmatprep.mubr.msk.f32.mxu0 %vm6867_vm2, %v6866_v54 }
 0x227   : > { %6515 = vmatmul.mubr.msk.f32.vlgmr.msra.gmra.mrb[8].mxu1 %vm1813_vm3, %v1221_v52 }
 0x228   : > { %6524 = vmatprep.mubr.msk.f32.mxu1 %vm6867_vm2, %v6866_v54 }
 0x2e9   : > { %v1886_v22 = vpop.f32.mrb[4].mxu0 }
 0x2ea   : > { %v2422_v29 = vmul.f32 0.35355338, %v1886_v22  ;;  %v1962_v30 = vpop.f32.mrb[0].mxu1  ;;  %v6486_v45 = vpop.f32.mrb[5].mxu0 }
 0x2eb   : > { %v2423_v46 = vmul.f32 0.35355338, %v1962_v30  ;;  %v6491_v49 = vpop.f32.mrb[1].mxu1 }
 0x2ec   : > { %v2430_v50 = vsel %vm1813_vm3, %v2422_v29, -inf }
 0x2ed   : > { %v2433_v51 = vsel %vm1813_vm3, %v2423_v46, -inf  ;;  %2431 = vmax.xlane.f32.xlu1 %v2430_v50 }
 0x2ee   : > { %2434 = vmax.xlane.f32.xlu0 %v2433_v51  ;;  %v2038_v40 = vpop.f32.mrb[2].mxu1 }
 0x2ef   : > { %v2424_v41 = vmul.f32 0.35355338, %v2038_v40  ;;  %v6496_v47 = vpop.f32.mrb[3].mxu1 }
 0x2f1   : > { %v2436_v48 = vsel %vm1813_vm3, %v2424_v41, -inf }
 0x2f2   : > { %2437 = vmax.xlane.f32.xlu0 %v2436_v48  ;;  %v2114_v52 = vpop.f32.mrb[4].mxu1  ;;  %v2266_v42 = vpop.f32.mrb[6].mxu0 }
 0x2f3   : > { %v2427_v43 = vmul.f32 0.35355338, %v2266_v42  ;;  %v6501_v44 = vpop.f32.mrb[5].mxu1  ;;  %v6511_v53 = vpop.f32.mrb[7].mxu0  ;;  %v2425_v55 = vmul.f32 0.35355338, %v2114_v52 }
 0x2f5   : > { %v2445_v56 = vsel %vm1813_vm3, %v2427_v43, -inf  ;;  %v2439_v63 = vsel %vm1813_vm3, %v2425_v55, -inf }
 0x2f6   : > { %2446 = vmax.xlane.f32.xlu1 %v2445_v56  ;;  %v2190_v57 = vpop.f32.mrb[6].mxu1  ;;  %v2418_v58 = vpop.f32.mrb[8].mxu0 }
 0x2f7   : > { %v2426_v59 = vmul.f32 0.35355338, %v2190_v57  ;;  %v6506_v60 = vpop.f32.mrb[7].mxu1  ;;  %v6521_v61 = vpop.f32.mrb[9].mxu0  ;;  %v2429_v62 = vmul.f32 0.35355338, %v2418_v58 }
 0x2f9   : > { %v2442_v0 = vsel %vm1813_vm3, %v2426_v59, -inf  ;;  %v2451_v5 = vsel %vm1813_vm3, %v2429_v62, -inf }
 0x2fa   : > { %2440 = vmax.xlane.f32.xlu1 %v2439_v63  ;;  %2443 = vmax.xlane.f32.xlu0 %v2442_v0  ;;  %v2342_v1 = vpop.f32.mrb[8].mxu1 }
 0x2fb   : > { %v2428_v2 = vmul.f32 0.35355338, %v2342_v1  ;;  %v6516_v4 = vpop.f32.mrb[9].mxu1 }
 0x2fd   : > { %v2448_v6 = vsel %vm1813_vm3, %v2428_v2, -inf }
 0x2fe   : > { %2452 = vmax.xlane.f32.xlu1 %v2451_v5  ;;  %2449 = vmax.xlane.f32.xlu0 %v2448_v6 }
 0x30f   : > { %1523 = vrot.lane.b32.xlu1 %v7274_v9, %s6859_s17 }
 0x313   : > { %1526 = vrot.lane.b32.xlu1 %v7274_v9, %s6856_s5 }
 0x314   : > { %1520 = vrot.lane.b32.xlu0 %v7274_v9, %s6857_s25 }
 0x317   : > { %1529 = vrot.lane.b32.xlu1 %v7274_v9, %s6858_s20  ;;  %s7838_s20 = scalar_lea.vmem %s7800_s4, %s7854_s16 }
 0x37a   : > { %v2432_v10 = vpop.xlane.xlu1 %2431 }
 0x37b   : > { %v2454_v11 = vsub.f32 %v2422_v29, %v2432_v10  ;;  %v2435_v12 = vpop.xlane.xlu0 %2434 }
 0x37c   : > { %v2455_v16 = vsub.f32 %v2423_v46, %v2435_v12 }
 0x37d   : > { %v2462_v15 = vmul.f32 1.442695, %v2454_v11 }
 0x37e   : > { %v2464_v17 = vmul.f32 1.442695, %v2455_v16 }
 0x37f   : > { %6778 = vpow2.f32 %v2462_v15  ;;  %v2438_v19 = vpop.xlane.xlu0 %2437 }
 0x380   : > { %6780 = vpow2.f32 %v2464_v17  ;;  %v2456_v23 = vsub.f32 %v2424_v41, %v2438_v19 }
 0x382   : > { %v2466_v24 = vmul.f32 1.442695, %v2456_v23 }
 0x383   : > { %v2447_v25 = vpop.xlane.xlu1 %2446 }
 0x384   : > { %6782 = vpow2.f32 %v2466_v24  ;;  %v2459_v26 = vsub.f32 %v2427_v43, %v2447_v25 }
 0x386   : > { %v2472_v31 = vmul.f32 1.442695, %v2459_v26 }
 0x387   : > { %v2441_v33 = vpop.xlane.xlu1 %2440  ;;  %v2444_v34 = vpop.xlane.xlu0 %2443 }
 0x388   : > { %6784 = vpow2.f32 %v2472_v31  ;;  %v2457_v35 = vsub.f32 %v2425_v55, %v2441_v33  ;;  %v2458_v18 = vsub.f32 %v2426_v59, %v2444_v34 }
 0x389   : > { %v7284_v36 = vpop.eup %6778 }
 0x38a   : > { %v7286_v27 = vpop.eup %6780  ;;  %v2468_v38 = vmul.f32 1.442695, %v2457_v35  ;;  %v2478_v20 = vsel %vm1813_vm3, %v7284_v36, 0.0  ;;  %v2470_v45 = vmul.f32 1.442695, %v2458_v18 }
 0x38b   : > { %v2453_v28 = vpop.xlane.xlu1 %2452  ;;  %v2450_v39 = vpop.xlane.xlu0 %2449  ;;  %2479 = vadd.xlane.f32.xlu0 %v2478_v20  ;;  %v2481_v21 = vsel %vm1813_vm3, %v7286_v27, 0.0 }
 0x38c   : > { %6786 = vpow2.f32 %v2468_v38  ;;  %v2461_v22 = vsub.f32 %v2429_v62, %v2453_v28  ;;  %2482 = vadd.xlane.f32.xlu1 %v2481_v21  ;;  %v2460_v29 = vsub.f32 %v2428_v2, %v2450_v39 }
 0x38e   : > { %v7292_v30 = vpop.eup %6782  ;;  %v2476_v46 = vmul.f32 1.442695, %v2461_v22  ;;  %v2474_v51 = vmul.f32 1.442695, %v2460_v29 }
 0x38f   : > { %v1524_v49 = vpop.permute.xlu1 %1523  ;;  %v2484_v50 = vsel %vm1813_vm3, %v7292_v30, 0.0  ;;  %v1521_v48 = vpop.permute.xlu0 %1520 }
 0x390   : > { %6788 = vpow2.f32 %v2476_v46  ;;  %2485 = vadd.xlane.f32.xlu0 %v2484_v50  ;;  %v1541_v41 = vcombine.low %v7274_v9, %v1524_v49  ;;  %v1542_v47 = vcombine.high %v7274_v9, %v1524_v49 }
 0x391   : > { %6790 = vpow2.f32 %v2470_v45 }
 0x392   : > { %v7296_v40 = vpop.eup %6784  ;;  %6792 = vpow2.f32 %v2474_v51  ;;  %v1549_v55 = vrot.slane %v1541_v41, %v7083_v32  ;;  %v1556_v56 = vrot.slane %v1542_v47, %v7083_v32 }
 0x393   : > { %v1527_v52 = vpop.permute.xlu1 %1526  ;;  %v2493_v42 = vsel %vm1813_vm3, %v7296_v40, 0.0 }
 0x394   : > { %v1557_v43 = vcombine.low %v1521_v48, %v1527_v52  ;;  %v1558_v44 = vcombine.high %v1521_v48, %v1527_v52  ;;  %2494 = vadd.xlane.f32.xlu1 %v2493_v42 }
 0x396   : > { %v7302_v53 = vpop.eup %6786  ;;  %v1565_v57 = vrot.slane %v1557_v43, %v7083_v32  ;;  %v1572_v58 = vrot.slane %v1558_v44, %v7083_v32 }
 0x397   : > { %v2487_v59 = vsel %vm1813_vm3, %v7302_v53, 0.0  ;;  %v1530_v45 = vpop.permute.xlu1 %1529 }
 0x398   : > { %v1605_v60 = vcombine.low %v1549_v55, %v1565_v57  ;;  %v1606_v61 = vcombine.high %v1549_v55, %v1565_v57  ;;  %v1621_v62 = vcombine.low %v1556_v56, %v1572_v58  ;;  %v1622_v63 = vcombine.high %v1556_v56, %v1572_v58  ;;  %2488 = vadd.xlane.f32.xlu1 %v2487_v59 }
 0x39a   : > { %v7310_v0 = vpop.eup %6788  ;;  %v1613_v1 = vrot.slane %v1605_v60, %v7088_v37  ;;  %v1620_v2 = vrot.slane %v1606_v61, %v7088_v37  ;;  %v1629_v4 = vrot.slane %v1621_v62, %v7088_v37  ;;  %v1636_v5 = vrot.slane %v1622_v63, %v7088_v37 }
 0x39b   : > { %v2499_v6 = vsel %vm1813_vm3, %v7310_v0, 0.0  ;;  %v7318_v8 = vpop.eup %6790 }
 0x39c   : > { %v6012_v10 = vcombine.low %v1613_v1, %v1620_v2  ;;  %v6014_v11 = vcombine.high %v1613_v1, %v1620_v2  ;;  %v6016_v12 = vcombine.low %v1629_v4, %v1636_v5  ;;  %v6018_v16 = vcombine.high %v1629_v4, %v1636_v5  ;;  %2500 = vadd.xlane.f32.xlu0 %v2499_v6  ;;  %v7324_v24 = vpop.eup %6792 }
 0x39d   : > { %v2490_v25 = vsel %vm1813_vm3, %v7318_v8, 0.0  ;;  %v2496_v28 = vsel %vm1813_vm3, %v7324_v24, 0.0 }
 0x39e   : > { %v1685_v15 = vrot.slane %v6012_v10, %v7083_v32  ;;  %v1701_v17 = vrot.slane %v6014_v11, %v7083_v32  ;;  %v1717_v19 = vrot.slane %v6016_v12, %v7083_v32  ;;  %v1733_v23 = vrot.slane %v6018_v16, %v7083_v32 }
 0x3a0   : > { %2491 = vadd.xlane.f32.xlu0 %v2490_v25  ;;  %v1741_v26 = vcombine.low %v1685_v15, %v1701_v17  ;;  %v1773_v31 = vcombine.low %v1717_v19, %v1733_v23  ;;  %v1742_v33 = vcombine.high %v1685_v15, %v1701_v17  ;;  %v1774_v34 = vcombine.high %v1717_v19, %v1733_v23 }
 0x3a2   : > { %v1749_v35 = vrot.slane %v1741_v26, %v7088_v37  ;;  %v1781_v38 = vrot.slane %v1773_v31, %v7088_v37  ;;  %v1756_v18 = vrot.slane %v1742_v33, %v7088_v37  ;;  %v1788_v20 = vrot.slane %v1774_v34, %v7088_v37 }
 0x3a4   : > { %2497 = vadd.xlane.f32.xlu0 %v2496_v28  ;;  %v1805_v39 = vcombine.low %v1749_v35, %v1781_v38  ;;  %v1806_v21 = vcombine.high %v1749_v35, %v1781_v38  ;;  %v1807_v22 = vcombine.low %v1756_v18, %v1788_v20  ;;  %v1808_v29 = vcombine.high %v1756_v18, %v1788_v20 }
 0x3a6   : > { %6523 = vmatpush3.msra.mxu1 %v1805_v39  ;;  %6528 = vmatpush3.msra.mxu0 %v1806_v21 }
 0x3a7   : > { %6532 = vmatprep.subr.mxu1 %v6866_v54  ;;  %6537 = vmatprep.subr.mxu0 %v6866_v54 }
 0x3a9   : > { %1535 = vrot.lane.b32.xlu1 %v7274_v9, %s6860_s22 }
 0x3ad   : > { %1538 = vrot.lane.b32.xlu1 %v7274_v9, %s6863_s27 }
 0x3ba   : > { %1532 = vrot.lane.b32.xlu0 %v7274_v9, %s6861_s21 }
 0x418   : > { %v2480_v46 = vpop.xlane.xlu0 %2479 }
 0x419   : > { %v2483_v49 = vpop.xlane.xlu1 %2482  ;;  %6794 = vrcp.f32 %v2480_v46 }
 0x41a   : > { %6796 = vrcp.f32 %v2483_v49 }
 0x41d   : > { %v2486_v50 = vpop.xlane.xlu0 %2485 }
 0x41e   : > { %6798 = vrcp.f32 %v2486_v50 }
 0x421   : > { %v2495_v51 = vpop.xlane.xlu1 %2494 }
 0x423   : > { %v6795_v41 = vpop.eup %6794 }
 0x424   : > { %v6797_v47 = vpop.eup %6796  ;;  %v2510_v48 = vmul.f32 %v6795_v41, %v7284_v36 }
 0x425   : > { %v2511_v52 = vmul.f32 %v6797_v47, %v7286_v27  ;;  %v2489_v42 = vpop.xlane.xlu1 %2488 }
 0x426   : > { %6800 = vrcp.f32 %v2489_v42  ;;  %6525 = vmatmul.mubr.msk.f32.vlgmr.msra.gmra.mrb[10].mxu1 %vm1813_vm3, %v2510_v48 }
 0x427   : > { %6530 = vmatmul.mubr.msk.f32.vlgmr.msra.gmra.mrb[10].mxu0 %vm1813_vm3, %v2511_v52  ;;  %6533 = vmatpush3.msra.mxu1 %v1807_v22  ;;  %6802 = vrcp.f32 %v2495_v51 }
 0x428   : > { %v6799_v9 = vpop.eup %6798  ;;  %6538 = vmatpush3.msra.mxu0 %v1808_v29  ;;  %6534 = vmatprep.mubr.msk.f32.mxu1 %vm6867_vm2, %v6866_v54 }
 0x429   : > { %v2512_v43 = vmul.f32 %v6799_v9, %v7292_v30  ;;  %v2501_v44 = vpop.xlane.xlu0 %2500  ;;  %6539 = vmatprep.mubr.msk.f32.mxu0 %vm6867_vm2, %v6866_v54  ;;  %6542 = vmatprep.subr.mxu1 %v6866_v54  ;;  %v1536_v27 = vpop.permute.xlu1 %1535 }
 0x42a   : > { %6547 = vmatprep.subr.mxu0 %v6866_v54  ;;  %v1573_v30 = vcombine.low %v1530_v45, %v1536_v27  ;;  %v1574_v58 = vcombine.high %v1530_v45, %v1536_v27 }
 0x42b   : > { %6535 = vmatmul.mubr.msk.f32.vlgmr.msra.gmra.mrb[12].mxu1 %vm1813_vm3, %v2512_v43 }
 0x42c   : > { %6544 = vmatprep.mubr.msk.f32.mxu1 %vm6867_vm2, %v6866_v54  ;;  %v1581_v63 = vrot.slane %v1573_v30, %v7083_v32  ;;  %v1588_v1 = vrot.slane %v1574_v58, %v7083_v32 }
 0x42d   : > { %v2492_v36 = vpop.xlane.xlu0 %2491  ;;  %v1539_v59 = vpop.permute.xlu1 %1538 }
 0x42e   : > { %6804 = vrcp.f32 %v2492_v36 }
 0x42f   : > { %6806 = vrcp.f32 %v2501_v44 }
 0x430   : > { %v6801_v55 = vpop.eup %6800 }
 0x431   : > { %v2513_v56 = vmul.f32 %v6801_v55, %v7302_v53  ;;  %v2498_v57 = vpop.xlane.xlu0 %2497  ;;  %v6803_v35 = vpop.eup %6802 }
 0x432   : > { %6808 = vrcp.f32 %v2498_v57  ;;  %v2515_v41 = vmul.f32 %v6803_v35, %v7296_v40 }
 0x433   : > { %6540 = vmatmul.mubr.msk.f32.vlgmr.msra.gmra.mrb[12].mxu0 %vm1813_vm3, %v2513_v56 }
 0x434   : > { %6549 = vmatprep.mubr.msk.f32.mxu0 %vm6867_vm2, %v6866_v54 }
 0x435   : > { %v1533_v60 = vpop.permute.xlu0 %1532 }
 0x436   : > { %v1589_v61 = vcombine.low %v1533_v60, %v1539_v59  ;;  %v1590_v62 = vcombine.high %v1533_v60, %v1539_v59 }
 0x438   : > { %v1597_v2 = vrot.slane %v1589_v61, %v7083_v32  ;;  %v1604_v53 = vrot.slane %v1590_v62, %v7083_v32  ;;  %v6805_v39 = vpop.eup %6804 }
 0x439   : > { %v6807_v29 = vpop.eup %6806  ;;  %v2514_v47 = vmul.f32 %v6805_v39, %v7318_v8 }
 0x43a   : > { %v1637_v4 = vcombine.low %v1581_v63, %v1597_v2  ;;  %v1638_v5 = vcombine.high %v1581_v63, %v1597_v2  ;;  %v1653_v6 = vcombine.low %v1588_v1, %v1604_v53  ;;  %v1654_v10 = vcombine.high %v1588_v1, %v1604_v53 }
 0x43b   : > { %v2517_v42 = vmul.f32 %v6807_v29, %v7310_v0 }
 0x43c   : > { %v1645_v11 = vrot.slane %v1637_v4, %v7088_v37  ;;  %v1652_v12 = vrot.slane %v1638_v5, %v7088_v37  ;;  %v1661_v16 = vrot.slane %v1653_v6, %v7088_v37  ;;  %v1668_v15 = vrot.slane %v1654_v10, %v7088_v37  ;;  %v6809_v51 = vpop.eup %6808 }
 0x43d   : > { %v2516_v9 = vmul.f32 %v6809_v51, %v7324_v24 }
 0x43e   : > { %v6013_v17 = vcombine.low %v1645_v11, %v1652_v12  ;;  %v6015_v19 = vcombine.high %v1645_v11, %v1652_v12  ;;  %v6017_v23 = vcombine.low %v1661_v16, %v1668_v15  ;;  %v6019_v25 = vcombine.high %v1661_v16, %v1668_v15  ;;  %v6646_v15 = vld [vmem:[%s7008_s29] sm:$0xff]  }
 0x440   : > { %v1692_v26 = vrot.slane %v6013_v17, %v7083_v32  ;;  %v1708_v31 = vrot.slane %v6015_v19, %v7083_v32  ;;  %v1724_v33 = vrot.slane %v6017_v23, %v7083_v32  ;;  %v1740_v34 = vrot.slane %v6019_v25, %v7083_v32 }
 0x442   : > { %v1757_v38 = vcombine.low %v1692_v26, %v1708_v31  ;;  %v1789_v18 = vcombine.low %v1724_v33, %v1740_v34  ;;  %v1758_v20 = vcombine.high %v1692_v26, %v1708_v31  ;;  %v1790_v28 = vcombine.high %v1724_v33, %v1740_v34  ;;  %v6647_v26 = vld [vmem:[%s7008_s29 + $0x8] sm:$0xff]  }
 0x444   : > { %v1765_v21 = vrot.slane %v1757_v38, %v7088_v37  ;;  %v1797_v22 = vrot.slane %v1789_v18, %v7088_v37  ;;  %v1772_v45 = vrot.slane %v1758_v20, %v7088_v37  ;;  %v1804_v46 = vrot.slane %v1790_v28, %v7088_v37 }
 0x446   : > { %v1809_v49 = vcombine.low %v1765_v21, %v1797_v22  ;;  %v1810_v50 = vcombine.high %v1765_v21, %v1797_v22  ;;  %v1811_v48 = vcombine.low %v1772_v45, %v1804_v46  ;;  %v1812_v52 = vcombine.high %v1772_v45, %v1804_v46 }
 0x448   : > { %6543 = vmatpush3.msra.mxu1 %v1809_v49  ;;  %6548 = vmatpush3.msra.mxu0 %v1810_v50 }
 0x449   : > { %6545 = vmatmul.mubr.msk.f32.vlgmr.msra.gmra.mrb[14].mxu1 %vm1813_vm3, %v2514_v47  ;;  %6550 = vmatmul.mubr.msk.f32.vlgmr.msra.gmra.mrb[14].mxu0 %vm1813_vm3, %v2515_v41 }
 0x44a   : > { %6552 = vmatprep.subr.mxu1 %v6866_v54  ;;  %6557 = vmatprep.subr.mxu0 %v6866_v54 }
 0x44b   : > { %6553 = vmatpush3.msra.mxu1 %v1811_v48  ;;  %6558 = vmatpush3.msra.mxu0 %v1812_v52 }
 0x44c   : > { %6554 = vmatprep.mubr.msk.f32.mxu1 %vm6867_vm2, %v6866_v54  ;;  %6559 = vmatprep.mubr.msk.f32.mxu0 %vm6867_vm2, %v6866_v54 }
 0x44d   : > { %6555 = vmatmul.mubr.msk.f32.vlgmr.msra.gmra.mrb[16].mxu1 %vm1813_vm3, %v2516_v9  ;;  %6560 = vmatmul.mubr.msk.f32.vlgmr.msra.gmra.mrb[16].mxu0 %vm1813_vm3, %v2517_v42 }
 0x44e   : > { %6562 = vmatprep.subr.bf16.mxu1 %v6866_v54  ;;  %6570 = vmatprep.mubr.msk.bf16.mxu1 %vm6867_vm2, %v6866_v54 }
 0x44f   : > { %4033 = vmatprep.mubr.bf16.mxu0 %v6855_v3  ;;  %6563 = vmatpush3.bf16.msra.mxu1 %v6646_v15 }
 0x450   : > { %6564 = vmatprep.subr.bf16.mxu1 %v6866_v54 }
 0x453   : > { %6565 = vmatpush3.bf16.msra.mxu1 %v6647_v26 }
 0x454   : > { %6566 = vmatprep.subr.bf16.mxu1 %v6866_v54 }
 0x4f9   : > { %v2587_v40 = vpop.f32.mrb[10].mxu1 }
 0x4fa   : > { %v2660_v0 = vpop.f32.mrb[10].mxu0  ;;  %v6526_v8 = vpop.f32.mrb[11].mxu1 }
 0x4fb   : > { %v6531_v24 = vpop.f32.mrb[11].mxu0 }
 0x4fe   : > { %v2733_v43 = vpop.f32.mrb[12].mxu1 }
 0x4ff   : > { %v3102_v44 = vcombine.low %v2587_v40, %v2733_v43  ;;  %v3103_v36 = vcombine.high %v2587_v40, %v2733_v43  ;;  %v6536_v27 = vpop.f32.mrb[13].mxu1 }
 0x501   : > { %v3110_v58 = vrot.slane %v3102_v44, %v7083_v32  ;;  %v3117_v59 = vrot.slane %v3103_v36, %v7083_v32 }
 0x506   : > { %v2806_v55 = vpop.f32.mrb[12].mxu0 }
 0x507   : > { %v3118_v56 = vcombine.low %v2660_v0, %v2806_v55  ;;  %v3119_v57 = vcombine.high %v2660_v0, %v2806_v55  ;;  %v6541_v30 = vpop.f32.mrb[13].mxu0 }
 0x509   : > { %v3126_v60 = vrot.slane %v3118_v56, %v7083_v32  ;;  %v3133_v61 = vrot.slane %v3119_v57, %v7083_v32 }
 0x50b   : > { %v3166_v62 = vcombine.low %v3110_v58, %v3126_v60  ;;  %v3167_v63 = vcombine.high %v3110_v58, %v3126_v60  ;;  %v3182_v1 = vcombine.low %v3117_v59, %v3133_v61  ;;  %v3183_v2 = vcombine.high %v3117_v59, %v3133_v61  ;;  %v6648_v59 = vld [vmem:[%s7008_s29 + $0x10] sm:$0xff]  }
 0x50c   : > { %6567 = vmatpush3.bf16.msra.mxu1 %v6648_v59  ;;  %v3554_v59 = vld [vmem:[%s7014_s24 + $0xc0] sm:$0xff] }
 0x50d   : > { %v3174_v53 = vrot.slane %v3166_v62, %v7088_v37  ;;  %v3181_v4 = vrot.slane %v3167_v63, %v7088_v37  ;;  %v3190_v5 = vrot.slane %v3182_v1, %v7088_v37  ;;  %v3197_v6 = vrot.slane %v3183_v2, %v7088_v37  ;;  %6568 = vmatprep.subr.bf16.mxu1 %v6866_v54 }
 0x50f   : > { %v6044_v10 = vcombine.low %v3174_v53, %v3181_v4  ;;  %v6046_v11 = vcombine.high %v3174_v53, %v3181_v4  ;;  %v6048_v12 = vcombine.low %v3190_v5, %v3197_v6  ;;  %v6050_v16 = vcombine.high %v3190_v5, %v3197_v6  ;;  %v6649_v5 = vld [vmem:[%s7008_s29 + $0x18] sm:$0xff]   ;;  %s6872_s29 = smov 32  }
 0x510   : > { %6569 = vmatpush3.bf16.msra.mxu1 %v6649_v5  ;;  %v3563_v5 = vld [vmem:[%s7014_s24 + $0x108] sm:$0xff] }
 0x511   : > { %v3246_v17 = vrot.slane %v6044_v10, %v7083_v32  ;;  %v3262_v19 = vrot.slane %v6046_v11, %v7083_v32  ;;  %v3278_v23 = vrot.slane %v6048_v12, %v7083_v32  ;;  %v3294_v25 = vrot.slane %v6050_v16, %v7083_v32 }
 0x513   : > { %v3303_v31 = vcombine.high %v3246_v17, %v3262_v19  ;;  %v3335_v33 = vcombine.high %v3278_v23, %v3294_v25  ;;  %v3302_v34 = vcombine.low %v3246_v17, %v3262_v19  ;;  %v3334_v35 = vcombine.low %v3278_v23, %v3294_v25 }
 0x515   : > { %v3317_v38 = vrot.slane %v3303_v31, %v7088_v37  ;;  %v3349_v18 = vrot.slane %v3335_v33, %v7088_v37  ;;  %v7412_v20 = vrot.slane %v3302_v34, %v7088_v37  ;;  %v7415_v28 = vrot.slane %v3334_v35, %v7088_v37 }
 0x517   : > { %v3368_v39 = vcombine.low %v3317_v38, %v3349_v18  ;;  %v3367_v21 = vcombine.high %v7412_v20, %v7415_v28  ;;  %v3369_v22 = vcombine.high %v3317_v38, %v3349_v18  ;;  %v3366_v29 = vcombine.low %v7412_v20, %v7415_v28 }
 0x519   : > { %3379 = vrot.lane.b32.xlu1 %v3368_v39, %s6868_s15  ;;  %3375 = vrot.lane.b32.xlu0 %v3367_v21, %s6869_s18 }
 0x51c   : > { %v2879_v45 = vpop.f32.mrb[14].mxu1  ;;  %v2952_v46 = vpop.f32.mrb[14].mxu0 }
 0x51d   : > { %3383 = vrot.lane.b32.xlu0 %v3369_v22, %s6870_s1  ;;  %v6546_v49 = vpop.f32.mrb[15].mxu1  ;;  %v6551_v50 = vpop.f32.mrb[15].mxu0 }
 0x520   : > { %v3025_v51 = vpop.f32.mrb[16].mxu1  ;;  %v3098_v41 = vpop.f32.mrb[16].mxu0 }
 0x521   : > { %v3134_v47 = vcombine.low %v2879_v45, %v3025_v51  ;;  %v3135_v48 = vcombine.high %v2879_v45, %v3025_v51  ;;  %v3150_v52 = vcombine.low %v2952_v46, %v3098_v41  ;;  %v3151_v42 = vcombine.high %v2952_v46, %v3098_v41  ;;  %v6556_v9 = vpop.f32.mrb[17].mxu1  ;;  %v6561_v40 = vpop.f32.mrb[17].mxu0  ;;  %v6052_v46 = vld [vmem:[%s7838_s20] ss:$0 sm:$0xff] }
 0x523   : > { %v3142_v0 = vrot.slane %v3134_v47, %v7083_v32  ;;  %v3149_v8 = vrot.slane %v3135_v48, %v7083_v32  ;;  %v3158_v24 = vrot.slane %v3150_v52, %v7083_v32  ;;  %v3165_v43 = vrot.slane %v3151_v42, %v7083_v32  ;;  %v6814_v48 = vld [vmem:[%s7837_s3] sm:$0xff] }
 0x525   : > { %v3198_v44 = vcombine.low %v3142_v0, %v3158_v24  ;;  %v3199_v36 = vcombine.high %v3142_v0, %v3158_v24  ;;  %v3214_v27 = vcombine.low %v3149_v8, %v3165_v43  ;;  %v3215_v55 = vcombine.high %v3149_v8, %v3165_v43  ;;  %v3530_v43 = vld [vmem:[%s7014_s24] sm:$0xff] }
 0x527   : > { %v3206_v56 = vrot.slane %v3198_v44, %v7088_v37  ;;  %v3213_v57 = vrot.slane %v3199_v36, %v7088_v37  ;;  %v3222_v30 = vrot.slane %v3214_v27, %v7088_v37  ;;  %v3229_v58 = vrot.slane %v3215_v55, %v7088_v37  ;;  %v3538_v44 = vld [vmem:[%s7014_s24 + $0x40] sm:$0xff]  ;;  %v3531_v36 = vld [vmem:[%s7014_s24 + $0x8] sm:$0xff] }
 0x528   : > { %v6061_v27 = vcombine.high %v3530_v43, %v3538_v44  ;;  %v3539_v55 = vld [vmem:[%s7014_s24 + $0x48] sm:$0xff] }
 0x529   : > { %v6045_v60 = vcombine.low %v3206_v56, %v3213_v57  ;;  %v6047_v61 = vcombine.high %v3206_v56, %v3213_v57  ;;  %v6049_v62 = vcombine.low %v3222_v30, %v3229_v58  ;;  %v6051_v63 = vcombine.high %v3222_v30, %v3229_v58  ;;  %v3546_v58 = vld [vmem:[%s7014_s24 + $0x80] sm:$0xff] }
 0x52a   : > { %v6060_v56 = vcombine.low %v3530_v43, %v3538_v44  ;;  %v6062_v57 = vcombine.low %v3531_v36, %v3539_v55  ;;  %v6063_v30 = vcombine.high %v3531_v36, %v3539_v55  ;;  %4001 = vmatprep.subr.bf16.mxu0 %v6061_v27  ;;  %v3580_v55 = vld [vmem:[%s7014_s24 + $0x190] sm:$0xff] }
 0x52b   : > { %v3253_v1 = vrot.slane %v6045_v60, %v7083_v32  ;;  %v3269_v2 = vrot.slane %v6047_v61, %v7083_v32  ;;  %v3285_v53 = vrot.slane %v6049_v62, %v7083_v32  ;;  %v3301_v4 = vrot.slane %v6051_v63, %v7083_v32  ;;  %v3547_v60 = vld [vmem:[%s7014_s24 + $0x88] sm:$0xff] }
 0x52c   : > { %4042 = vmatprep.subr.bf16.mxu1 %v6063_v30  ;;  %4002 = vmatpush1.bf16.msra.mxu0 %v6060_v56  ;;  %v6077_v61 = vcombine.high %v3546_v58, %v3554_v59  ;;  %v3555_v62 = vld [vmem:[%s7014_s24 + $0xc8] sm:$0xff]  ;;  %v6076_v63 = vcombine.low %v3546_v58, %v3554_v59  ;;  %v3588_v56 = vld [vmem:[%s7014_s24 + $0x1d0] sm:$0xff]  ;;  %v3589_v30 = vld [vmem:[%s7014_s24 + $0x1d8] sm:$0xff] }
 0x52d   : > { %v3318_v6 = vcombine.low %v3253_v1, %v3269_v2  ;;  %v3350_v10 = vcombine.low %v3285_v53, %v3301_v4  ;;  %v3319_v11 = vcombine.high %v3253_v1, %v3269_v2  ;;  %v3351_v12 = vcombine.high %v3285_v53, %v3301_v4  ;;  %v3562_v53 = vld [vmem:[%s7014_s24 + $0x100] sm:$0xff] }
 0x52e   : > { %v6078_v1 = vcombine.low %v3547_v60, %v3555_v62  ;;  %v6079_v2 = vcombine.high %v3547_v60, %v3555_v62  ;;  %4003 = vmatprep.subr.bf16.mxu0 %v6077_v61  ;;  %v3570_v4 = vld [vmem:[%s7014_s24 + $0x140] sm:$0xff]  ;;  %v6113_v60 = vcombine.high %v3580_v55, %v3588_v56 }
 0x52f   : > { %v3326_v16 = vrot.slane %v3318_v6, %v7088_v37  ;;  %v3358_v15 = vrot.slane %v3350_v10, %v7088_v37  ;;  %v3333_v54 = vrot.slane %v3319_v11, %v7088_v37  ;;  %v3365_v17 = vrot.slane %v3351_v12, %v7088_v37  ;;  %v3571_v10 = vld [vmem:[%s7014_s24 + $0x148] sm:$0xff]  ;;  %v3534_v62 = vld [vmem:[%s7014_s24 + $0x20] sm:$0xff] }
 0x530   : > { %4004 = vmatpush1.bf16.msra.mxu0 %v6076_v63  ;;  %v6093_v6 = vcombine.high %v3562_v53, %v3570_v4  ;;  %v6092_v11 = vcombine.low %v3562_v53, %v3570_v4  ;;  %v6094_v12 = vcombine.low %v3563_v5, %v3571_v10  ;;  %v3542_v63 = vld [vmem:[%s7014_s24 + $0x60] sm:$0xff]  ;;  %v6112_v53 = vcombine.low %v3580_v55, %v3588_v56  ;;  %v3569_v55 = vld [vmem:[%s7014_s24 + $0x138] sm:$0xff] }
 0x531   : > { %v3371_v19 = vcombine.high %v3326_v16, %v3358_v15  ;;  %v3370_v23 = vcombine.low %v3326_v16, %v3358_v15  ;;  %v3373_v25 = vcombine.high %v3333_v54, %v3365_v17  ;;  %v3372_v26 = vcombine.low %v3333_v54, %v3365_v17  ;;  %v3578_v15 = vld [vmem:[%s7014_s24 + $0x180] sm:$0xff]  ;;  %v3579_v17 = vld [vmem:[%s7014_s24 + $0x188] sm:$0xff]  ;;  %v3577_v56 = vld [vmem:[%s7014_s24 + $0x178] sm:$0xff] }
 0x532   : > { %v6095_v16 = vcombine.high %v3563_v5, %v3571_v10  ;;  %4005 = vmatprep.subr.bf16.mxu0 %v6093_v6  ;;  %v3586_v54 = vld [vmem:[%s7014_s24 + $0x1c0] sm:$0xff]  ;;  %v6069_v5 = vcombine.high %v3534_v62, %v3542_v63 }
 0x533   : > { %3391 = vrot.lane.b32.xlu0 %v3371_v19, %s6871_s26  ;;  %3387 = vrot.lane.b32.xlu1 %v3370_v23, %s6872_s29  ;;  %v6109_v19 = vcombine.high %v3578_v15, %v3586_v54  ;;  %v3587_v23 = vld [vmem:[%s7014_s24 + $0x1c8] sm:$0xff]  ;;  %v3550_v10 = vld [vmem:[%s7014_s24 + $0xa0] sm:$0xff] }
 0x534   : > { %4006 = vmatpush1.bf16.msra.mxu0 %v6092_v11  ;;  %v3558_v11 = vld [vmem:[%s7014_s24 + $0xe0] sm:$0xff] }
 0x535   : > { %4007 = vmatprep.subr.bf16.mxu0 %v6109_v19 }
 0x537   : > { %3399 = vrot.lane.b32.xlu0 %v3373_v25, %s6873_s13  ;;  %3395 = vrot.lane.b32.xlu1 %v3372_v26, %s6874_s14  ;;  %v6108_v25 = vcombine.low %v3578_v15, %v3586_v54  ;;  %v6110_v26 = vcombine.low %v3579_v17, %v3587_v23  ;;  %v6068_v15 = vcombine.low %v3534_v62, %v3542_v63  ;;  %v3585_v62 = vld [vmem:[%s7014_s24 + $0x1b8] sm:$0xff] }
 0x538   : > { %v3593_v63 = vld [vmem:[%s7014_s24 + $0x1f8] sm:$0xff] }
 0x539   : > { %4008 = vmatpush1.bf16.msra.mxu0 %v6108_v25  ;;  %v3574_v25 = vld [vmem:[%s7014_s24 + $0x160] sm:$0xff] }
 0x58b   : > { %v3376_v32 = vpop.permute.xlu0 %3375  ;;  %v3380_v31 = vpop.permute.xlu1 %3379 }
 0x58c   : > { %v3402_v33 = vsel %vm1813_vm3, %v3366_v29, %v3376_v32  ;;  %v6111_v32 = vcombine.high %v3579_v17, %v3587_v23  ;;  %v6085_v17 = vcombine.high %v3550_v10, %v3558_v11  ;;  %v3566_v23 = vld [vmem:[%s7014_s24 + $0x120] sm:$0xff] }
 0x58d   : > { %v3404_v34 = vsel %vm3403_vm4, %v3402_v33, %v3380_v31  ;;  %v3532_v31 = vld [vmem:[%s7014_s24 + $0x10] sm:$0xff] }
 0x58e   : > { %v3540_v33 = vld [vmem:[%s7014_s24 + $0x50] sm:$0xff] }
 0x58f   : > { %v3384_v37 = vpop.permute.xlu0 %3383 }
 0x590   : > { %v3406_v35 = vsel %vm3405_vm5, %v3404_v34, %v3384_v37  ;;  %v3533_v37 = vld [vmem:[%s7014_s24 + $0x18] sm:$0xff]  ;;  %v6064_v34 = vcombine.low %v3532_v31, %v3540_v33 }
 0x5a5   : > { %v3388_v38 = vpop.permute.xlu1 %3387  ;;  %v3392_v18 = vpop.permute.xlu0 %3391 }
 0x5a6   : > { %v3408_v39 = vsel %vm3407_vm6, %v3406_v35, %v3388_v38  ;;  %v6065_v35 = vcombine.high %v3532_v31, %v3540_v33  ;;  %v3541_v38 = vld [vmem:[%s7014_s24 + $0x58] sm:$0xff]  ;;  %v6084_v31 = vcombine.low %v3550_v10, %v3558_v11  ;;  %v6651_v10 = vld [vmem:[%s7026_s30 + $0xc0] sm:$0xff]  }
 0x5a7   : > { %v3410_v21 = vsel %vm3409_vm7, %v3408_v39, %v3392_v18  ;;  %v6066_v18 = vcombine.low %v3533_v37, %v3541_v38  ;;  %v6067_v39 = vcombine.high %v3533_v37, %v3541_v38  ;;  %v6101_v37 = vcombine.high %v3566_v23, %v3574_v25  ;;  %v3590_v38 = vld [vmem:[%s7014_s24 + $0x1e0] sm:$0xff] }
 0x5a8   : > { %4083 = vmatprep.subr.bf16.mxu0 %v6065_v35  ;;  %v3582_v35 = vld [vmem:[%s7014_s24 + $0x1a0] sm:$0xff] }
 0x5a9   : > { %v3396_v22 = vpop.permute.xlu1 %3395  ;;  %v3400_v45 = vpop.permute.xlu0 %3399  ;;  %v6652_v11 = vld [vmem:[%s7026_s30] sm:$0xff]  }
 0x5aa   : > { %v3412_v20 = vsel %vm3411_vm8, %v3410_v21, %v3396_v22 }
 0x5ab   : > { %v3414_v28 = vsel %vm3413_vm9, %v3412_v20, %v3400_v45 }
 0x5ac   : > { %v3415_v29 = vpack.c.bf16 %v3414_v28, %v3414_v28  ;;  %v6058_v28 = vld [vmem:[%s786_s23] ss:$0 sm:$0xff] }
 0x5ae   : > { %6571 = vmatmul.mubr.msk.bf16.vlgmr.msra.gmra.mrb[20].mxu1 %vm884_vm1, %v3415_v29 }
 0x5af   : > { %4074 = vmatprep.mubr.bf16.mxu1 %v6855_v3  ;;  %4043 = vmatpush1.bf16.msra.mxu1 %v6062_v57  ;;  %v3581_v57 = vld [vmem:[%s7014_s24 + $0x198] sm:$0xff] }
 0x5b0   : > { %4044 = vmatprep.subr.bf16.mxu1 %v6079_v2  ;;  %v6115_v61 = vcombine.high %v3581_v57, %v3589_v30  ;;  %v3543_v2 = vld [vmem:[%s7014_s24 + $0x68] sm:$0xff]  ;;  %v6114_v4 = vcombine.low %v3581_v57, %v3589_v30 }
 0x5b3   : > { %4045 = vmatpush1.bf16.msra.mxu1 %v6078_v1  ;;  %v3535_v1 = vld [vmem:[%s7014_s24 + $0x28] sm:$0xff] }
 0x5b4   : > { %4046 = vmatprep.subr.bf16.mxu1 %v6095_v16  ;;  %v6071_v6 = vcombine.high %v3535_v1, %v3543_v2  ;;  %v3559_v16 = vld [vmem:[%s7014_s24 + $0xe8] sm:$0xff]  ;;  %v6070_v54 = vcombine.low %v3535_v1, %v3543_v2  ;;  %v6106_v2 = vcombine.low %v3569_v55, %v3577_v56 }
 0x5b7   : > { %4047 = vmatpush1.bf16.msra.mxu1 %v6094_v12  ;;  %v3551_v12 = vld [vmem:[%s7014_s24 + $0xa8] sm:$0xff] }
 0x5b8   : > { %4048 = vmatprep.subr.bf16.mxu1 %v6111_v32  ;;  %v6087_v19 = vcombine.high %v3551_v12, %v3559_v16  ;;  %v3575_v32 = vld [vmem:[%s7014_s24 + $0x168] sm:$0xff]  ;;  %v6086_v33 = vcombine.low %v3551_v12, %v3559_v16  ;;  %v6653_v12 = vld [vmem:[%s7026_s30 + $0x80] sm:$0xff]  }
 0x5b9   : > { %v6654_v16 = vld [vmem:[%s7026_s30 + $0x48] sm:$0xff]  }
 0x5bb   : > { %4049 = vmatpush1.bf16.msra.mxu1 %v6110_v26  ;;  %v3567_v26 = vld [vmem:[%s7014_s24 + $0x128] sm:$0xff] }
 0x5bc   : > { %4124 = vmatprep.subr.bf16.mxu1 %v6067_v39  ;;  %v3591_v39 = vld [vmem:[%s7014_s24 + $0x1e8] sm:$0xff] }
 0x681   : > { %v3492_v49 = vpop.f32.mrb[20].mxu1 }
 0x682   : > { %v3493_v50 = vadd.f32 %v6052_v46, %v3492_v49  ;;  %v6572_v51 = vpop.f32.mrb[21].mxu1  ;;  %v6059_v46 = vld [vmem:[%s793_s19] ss:$0 sm:$0xff] }
 0x683   : > { %v3495_v41 = vpop.f32.mrb[22].mxu1  ;;  %v3556_v51 = vld [vmem:[%s7014_s24 + $0xd0] sm:$0xff] }
 0x684   : > { %v6573_v47 = vpop.f32.mrb[23].mxu1  ;;  %v3498_v52 = vadd.f32 %v6814_v48, %v3493_v50  ;;  %v3548_v50 = vld [vmem:[%s7014_s24 + $0x90] sm:$0xff]  ;;  %v3549_v41 = vld [vmem:[%s7014_s24 + $0x98] sm:$0xff] }
 0x685   : > { %v3557_v47 = vld [vmem:[%s7014_s24 + $0xd8] sm:$0xff]  ;;  %v6080_v43 = vcombine.low %v3548_v50, %v3556_v51 }
 0x686   : > { %v3501_v42 = vsel %vm884_vm1, %v3498_v52, 0.0  ;;  %v6082_v44 = vcombine.low %v3549_v41, %v3557_v47 }
 0x687   : > { %3502 = vadd.xlane.f32.xlu1 %v3501_v42  ;;  %v6081_v42 = vcombine.high %v3548_v50, %v3556_v51  ;;  %v6116_v50 = vcombine.low %v3582_v35, %v3590_v38 }
 0x714   : > { %v3503_v9 = vpop.xlane.xlu1 %3502 }
 0x715   : > { %v3505_v40 = vmul.f32 0.015625, %v3503_v9  ;;  %v6083_v9 = vcombine.high %v3549_v41, %v3557_v47 }
 0x717   : > { %v7454_v0 = vsub.f32 %v3498_v52, %v3505_v40  ;;  %v3564_v40 = vld [vmem:[%s7014_s24 + $0x110] sm:$0xff] }
 0x719   : > { %v3507_v8 = vmul.f32 %v7454_v0, %v7454_v0 }
 0x71b   : > { %v3508_v24 = vsel %vm884_vm1, %v3507_v8, 0.0  ;;  %v3565_v8 = vld [vmem:[%s7014_s24 + $0x118] sm:$0xff] }
 0x71c   : > { %3509 = vadd.xlane.f32.xlu0 %v3508_v24  ;;  %v3573_v24 = vld [vmem:[%s7014_s24 + $0x158] sm:$0xff] }
 0x71d   : > { %v6099_v27 = vcombine.high %v3565_v8, %v3573_v24  ;;  %v6098_v59 = vcombine.low %v3565_v8, %v3573_v24 }
 0x7a9   : > { %v3510_v21 = vpop.xlane.xlu0 %3509 }
 0x7aa   : > { %v3511_v22 = vmul.f32 0.015625, %v3510_v21  ;;  %v6100_v21 = vcombine.low %v3566_v23, %v3574_v25  ;;  %v6659_v23 = vld [vmem:[%s7026_s30 + $0xd0] sm:$0xff]  }
 0x7ab   : > { %v6660_v25 = vld [vmem:[%s7026_s30 + $0x10] sm:$0xff]  }
 0x7ac   : > { %v3512_v45 = vadd.f32 1e-05, %v3511_v22  ;;  %v6102_v22 = vcombine.low %v3567_v26, %v3575_v32 }
 0x7ae   : > { %6810 = vrsqrt.f32 %v3512_v45  ;;  %v6117_v45 = vcombine.high %v3582_v35, %v3590_v38  ;;  %v6668_v35 = vld [vmem:[%s7026_s30 + $0x20] sm:$0xff]  }
 0x7af   : > { %v6669_v38 = vld [vmem:[%s7026_s30 + $0xa0] sm:$0xff]  }
 0x7b8   : > { %v6811_v20 = vpop.eup %6810 }
 0x7b9   : > { %v3514_v29 = vmul.f32 %v6811_v20, %v7454_v0  ;;  %v3572_v0 = vld [vmem:[%s7014_s24 + $0x150] sm:$0xff] }
 0x7ba   : > { %v6097_v36 = vcombine.high %v3564_v40, %v3572_v0  ;;  %v6096_v58 = vcombine.low %v3564_v40, %v3572_v0  ;;  %v3553_v40 = vld [vmem:[%s7014_s24 + $0xb8] sm:$0xff] }
 0x7bb   : > { %v3521_v49 = vmul.f32 %v6058_v28, %v3514_v29  ;;  %v3536_v28 = vld [vmem:[%s7014_s24 + $0x30] sm:$0xff]  ;;  %v3561_v0 = vld [vmem:[%s7014_s24 + $0xf8] sm:$0xff] }
 0x7bc   : > { %v3544_v29 = vld [vmem:[%s7014_s24 + $0x70] sm:$0xff]  ;;  %v6090_v30 = vcombine.low %v3553_v40, %v3561_v0 }
 0x7bd   : > { %v7494_v48 = vadd.f32 %v6059_v46, %v3521_v49  ;;  %v3537_v46 = vld [vmem:[%s7014_s24 + $0x38] sm:$0xff]  ;;  %v6073_v41 = vcombine.high %v3536_v28, %v3544_v29  ;;  %v6072_v8 = vcombine.low %v3536_v28, %v3544_v29  ;;  %v6676_v28 = vld [vmem:[%s7026_s30 + $0x30] sm:$0xff]  }
 0x7be   : > { %v3545_v49 = vld [vmem:[%s7014_s24 + $0x78] sm:$0xff]  ;;  %v6677_v29 = vld [vmem:[%s7026_s30 + $0xb0] sm:$0xff]  }
 0x7bf   : > { %v7498_v52 = vpack.c.bf16 %v7494_v48, %v7494_v48  ;;  %v6075_v47 = vcombine.high %v3537_v46, %v3545_v49  ;;  %v6074_v24 = vcombine.low %v3537_v46, %v3545_v49  ;;  %v6678_v46 = vld [vmem:[%s7026_s30 + $0x78] sm:$0xff]  }
 0x7c0   : > { %v6679_v49 = vld [vmem:[%s7026_s30 + $0xf8] sm:$0xff]  }
 0x7c1   : > { %6124 = vmatmul.mubr.msk.bf16.vlgmr.msra.gmra.mrb[20].mxu0 %vm884_vm1, %v7498_v52  ;;  %6125 = vmatmul.mubr.msk.bf16.vlgmr.msra.gmra.mrb[24].mxu1 %vm884_vm1, %v7498_v52 }
 0x7c2   : > { %4084 = vmatpush1.bf16.msra.mxu0 %v6064_v34  ;;  %4125 = vmatpush1.bf16.msra.mxu1 %v6066_v18  ;;  %v6103_v34 = vcombine.high %v3567_v26, %v3575_v32  ;;  %v3583_v18 = vld [vmem:[%s7014_s24 + $0x1a8] sm:$0xff]  ;;  %v6661_v26 = vld [vmem:[%s7026_s30 + $0x90] sm:$0xff]   ;;  %v6663_v32 = vld [vmem:[%s7026_s30 + $0xd8] sm:$0xff]  }
 0x7c3   : > { %4085 = vmatprep.subr.bf16.mxu0 %v6081_v42  ;;  %4126 = vmatprep.subr.bf16.mxu1 %v6083_v9  ;;  %v6119_v20 = vcombine.high %v3583_v18, %v3591_v39  ;;  %v6118_v51 = vcombine.low %v3583_v18, %v3591_v39  ;;  %v3552_v42 = vld [vmem:[%s7014_s24 + $0xb0] sm:$0xff]  ;;  %v6670_v18 = vld [vmem:[%s7026_s30 + $0x68] sm:$0xff]  }
 0x7c4   : > { %4115 = vmatprep.mubr.bf16.mxu0 %v6855_v3  ;;  %4156 = vmatprep.mubr.bf16.mxu1 %v6855_v3  ;;  %v3560_v9 = vld [vmem:[%s7014_s24 + $0xf0] sm:$0xff]  ;;  %v6671_v39 = vld [vmem:[%s7026_s30 + $0xe8] sm:$0xff]  }
 0x7c5   : > { %v6088_v57 = vcombine.low %v3552_v42, %v3560_v9 }
 0x7c6   : > { %4086 = vmatpush1.bf16.msra.mxu0 %v6080_v43  ;;  %4127 = vmatpush1.bf16.msra.mxu1 %v6082_v44  ;;  %v6089_v43 = vcombine.high %v3552_v42, %v3560_v9  ;;  %v6091_v44 = vcombine.high %v3553_v40, %v3561_v0  ;;  %v3624_v42 = vsub.s32 6, %v7061_v13  ;;  %v3608_v0 = vsub.s32 2, %v7061_v13 }
 0x7c7   : > { %4087 = vmatprep.subr.bf16.mxu0 %v6097_v36  ;;  %4128 = vmatprep.subr.bf16.mxu1 %v6099_v27  ;;  %v3568_v36 = vld [vmem:[%s7014_s24 + $0x130] sm:$0xff] }
 0x7c8   : > { %v3576_v27 = vld [vmem:[%s7014_s24 + $0x170] sm:$0xff] }
 0x7c9   : > { %v6104_v1 = vcombine.low %v3568_v36, %v3576_v27 }
 0x7ca   : > { %4088 = vmatpush1.bf16.msra.mxu0 %v6096_v58  ;;  %4129 = vmatpush1.bf16.msra.mxu1 %v6098_v59  ;;  %v6105_v58 = vcombine.high %v3568_v36, %v3576_v27  ;;  %v6107_v59 = vcombine.high %v3569_v55, %v3577_v56 }
 0x7cb   : > { %4089 = vmatprep.subr.bf16.mxu0 %v6113_v60  ;;  %4130 = vmatprep.subr.bf16.mxu1 %v6115_v61  ;;  %v3584_v60 = vld [vmem:[%s7014_s24 + $0x1b0] sm:$0xff] }
 0x7cc   : > { %v3592_v61 = vld [vmem:[%s7014_s24 + $0x1f0] sm:$0xff]  ;;  %s7839_s24 = sld [smem:[#allocation8_spill]] }
 0x7ce   : > { %4090 = vmatpush1.bf16.msra.mxu0 %v6112_v53  ;;  %4131 = vmatpush1.bf16.msra.mxu1 %v6114_v4  ;;  %v6121_v53 = vcombine.high %v3584_v60, %v3592_v61  ;;  %v6123_v4 = vcombine.high %v3585_v62, %v3593_v63 }
 0x7cf   : > { %4165 = vmatprep.subr.bf16.mxu0 %v6069_v5  ;;  %4206 = vmatprep.subr.bf16.mxu1 %v6071_v6  ;;  %v6120_v5 = vcombine.low %v3584_v60, %v3592_v61  ;;  %v6122_v6 = vcombine.low %v3585_v62, %v3593_v63 }
 0x7d1   : > { %6126 = vmatmul.mubr.msk.bf16.vlgmr.msra.gmra.mrb[24].mxu0 %vm884_vm1, %v7498_v52  ;;  %6127 = vmatmul.mubr.msk.bf16.vlgmr.msra.gmra.mrb[28].mxu1 %vm884_vm1, %v7498_v52 }
 0x7d2   : > { %4166 = vmatpush1.bf16.msra.mxu0 %v6068_v15  ;;  %4207 = vmatpush1.bf16.msra.mxu1 %v6070_v54  ;;  %v6655_v15 = vld [vmem:[%s7026_s30 + $0xc8] sm:$0xff]  }
 0x7d3   : > { %4167 = vmatprep.subr.bf16.mxu0 %v6085_v17  ;;  %4208 = vmatprep.subr.bf16.mxu1 %v6087_v19  ;;  %v6656_v54 = vld [vmem:[%s7026_s30 + $0x8] sm:$0xff]   ;;  %v6658_v19 = vld [vmem:[%s7026_s30 + $0x50] sm:$0xff]  }
 0x7d4   : > { %4197 = vmatprep.mubr.bf16.mxu0 %v6855_v3  ;;  %4238 = vmatprep.mubr.bf16.mxu1 %v6855_v3  ;;  %v6657_v17 = vld [vmem:[%s7026_s30 + $0x88] sm:$0xff]  }
 0x7d5   : > { %v7598_v9 = vld [vmem:[%s7839_s24 + $0x8] sm:$0xff] }
 0x7d6   : > { %4168 = vmatpush1.bf16.msra.mxu0 %v6084_v31  ;;  %4209 = vmatpush1.bf16.msra.mxu1 %v6086_v33  ;;  %v6664_v31 = vld [vmem:[%s7026_s30 + $0x18] sm:$0xff]   ;;  %v7603_v40 = vrot.slane %v7598_v9, %v3624_v42 }
 0x7d7   : > { %4169 = vmatprep.subr.bf16.mxu0 %v6101_v37  ;;  %4210 = vmatprep.subr.bf16.mxu1 %v6103_v34  ;;  %v6665_v33 = vld [vmem:[%s7026_s30 + $0x98] sm:$0xff]   ;;  %v6666_v37 = vld [vmem:[%s7026_s30 + $0x60] sm:$0xff]  }
 0x7d8   : > { %v6667_v34 = vld [vmem:[%s7026_s30 + $0xe0] sm:$0xff]  }
 0x7da   : > { %4170 = vmatpush1.bf16.msra.mxu0 %v6100_v21  ;;  %4211 = vmatpush1.bf16.msra.mxu1 %v6102_v22  ;;  %v6672_v21 = vld [vmem:[%s7026_s30 + $0x28] sm:$0xff]  }
 0x7db   : > { %4171 = vmatprep.subr.bf16.mxu0 %v6117_v45  ;;  %4212 = vmatprep.subr.bf16.mxu1 %v6119_v20  ;;  %v6673_v22 = vld [vmem:[%s7026_s30 + $0xa8] sm:$0xff]   ;;  %v6674_v45 = vld [vmem:[%s7026_s30 + $0x70] sm:$0xff]  }
 0x7dc   : > { %v6675_v20 = vld [vmem:[%s7026_s30 + $0xf0] sm:$0xff]  }
 0x7de   : > { %4172 = vmatpush1.bf16.msra.mxu0 %v6116_v50  ;;  %4213 = vmatpush1.bf16.msra.mxu1 %v6118_v51  ;;  %v6680_v50 = vld [vmem:[%s7026_s30 + $0x38] sm:$0xff]  }
 0x7df   : > { %4247 = vmatprep.subr.bf16.mxu0 %v6073_v41  ;;  %4288 = vmatprep.subr.bf16.mxu1 %v6075_v47  ;;  %v6681_v51 = vld [vmem:[%s7026_s30 + $0xb8] sm:$0xff]   ;;  %v6682_v41 = vld [vmem:[%s7026_s30 + $0x140] sm:$0xff]  }
 0x7e0   : > { %v6683_v47 = vld [vmem:[%s7026_s30 + $0x1c0] sm:$0xff]  }
 0x7e1   : > { %6128 = vmatmul.mubr.msk.bf16.vlgmr.msra.gmra.mrb[28].mxu0 %vm884_vm1, %v7498_v52  ;;  %6129 = vmatmul.mubr.msk.bf16.vlgmr.msra.gmra.mrb[32].mxu1 %vm884_vm1, %v7498_v52 }
 0x7e2   : > { %4248 = vmatpush1.bf16.msra.mxu0 %v6072_v8  ;;  %4289 = vmatpush1.bf16.msra.mxu1 %v6074_v24  ;;  %v7607_v8 = vld [vmem:[%s7839_s24] sm:$0xff]  ;;  %v3612_v24 = vsub.s32 3, %v7061_v13 }
 0x7e3   : > { %4249 = vmatprep.subr.bf16.mxu0 %v6089_v43  ;;  %4290 = vmatprep.subr.bf16.mxu1 %v6091_v44  ;;  %v3601_v43 = vrot.slane %v7607_v8, %v7064_v14  ;;  %v3609_v44 = vrot.slane %v7607_v8, %v3608_v0  ;;  %v3605_v36 = vrot.slane %v7607_v8, %v7269_v7 }
 0x7e4   : > { %4279 = vmatprep.mubr.bf16.mxu0 %v6855_v3  ;;  %4320 = vmatprep.mubr.bf16.mxu1 %v6855_v3  ;;  %v6650_v3 = vld [vmem:[%s7026_s30 + $0x40] sm:$0xff]   ;;  %v3613_v27 = vrot.slane %v7607_v8, %v3612_v24 }
 0x7e6   : > { %4250 = vmatpush1.bf16.msra.mxu0 %v6088_v57  ;;  %4291 = vmatpush1.bf16.msra.mxu1 %v6090_v30 }
 0x7e7   : > { %4251 = vmatprep.subr.bf16.mxu0 %v6105_v58  ;;  %4292 = vmatprep.subr.bf16.mxu1 %v6107_v59 }
 0x7ea   : > { %4252 = vmatpush1.bf16.msra.mxu0 %v6104_v1  ;;  %4293 = vmatpush1.bf16.msra.mxu1 %v6106_v2 }
 0x7eb   : > { %4253 = vmatprep.subr.bf16.mxu0 %v6121_v53  ;;  %4294 = vmatprep.subr.bf16.mxu1 %v6123_v4 }
 0x7ee   : > { %4254 = vmatpush1.bf16.msra.mxu0 %v6120_v5  ;;  %4295 = vmatpush1.bf16.msra.mxu1 %v6122_v6 }
 0x7ef   : > { %6306 = vmatprep.subr.bf16.mxu0 %v6650_v3  ;;  %6328 = vmatprep.subr.bf16.mxu1 %v6651_v10 }
 0x7f1   : > { %6130 = vmatmul.mubr.msk.bf16.vlgmr.msra.gmra.mrb[32].mxu0 %vm884_vm1, %v7498_v52  ;;  %6131 = vmatmul.mubr.msk.bf16.vlgmr.msra.gmra.mrb[36].mxu1 %vm884_vm1, %v7498_v52  ;;  %v6662_v52 = vld [vmem:[%s7026_s30 + $0x58] sm:$0xff]  }
 0x7f2   : > { %6307 = vmatpush3.bf16.msra.mxu0 %v6652_v11  ;;  %6329 = vmatpush3.bf16.msra.mxu1 %v6653_v12  ;;  %v6684_v11 = vld [vmem:[%s7026_s30 + $0x100] sm:$0xff]  }
 0x7f3   : > { %6308 = vmatprep.subr.bf16.mxu0 %v6654_v16  ;;  %6330 = vmatprep.subr.bf16.mxu1 %v6655_v15  ;;  %v6685_v12 = vld [vmem:[%s7026_s30 + $0x180] sm:$0xff]  }
 0x7f6   : > { %6309 = vmatpush3.bf16.msra.mxu0 %v6656_v54  ;;  %6331 = vmatpush3.bf16.msra.mxu1 %v6657_v17  ;;  %v6686_v54 = vld [vmem:[%s7026_s30 + $0x148] sm:$0xff]  }
 0x7f7   : > { %6310 = vmatprep.subr.bf16.mxu0 %v6658_v19  ;;  %6332 = vmatprep.subr.bf16.mxu1 %v6659_v23  ;;  %v6687_v17 = vld [vmem:[%s7026_s30 + $0x1c8] sm:$0xff]  }
 0x7f8   : > { %v6688_v19 = vld [vmem:[%s7026_s30 + $0x108] sm:$0xff]  }
 0x7f9   : > { %v6689_v23 = vld [vmem:[%s7026_s30 + $0x188] sm:$0xff]  }
 0x7fa   : > { %6311 = vmatpush3.bf16.msra.mxu0 %v6660_v25  ;;  %6333 = vmatpush3.bf16.msra.mxu1 %v6661_v26  ;;  %v3620_v25 = vsub.s32 5, %v7061_v13  ;;  %v3628_v26 = vsub.s32 7, %v7061_v13 }
 0x7fb   : > { %6312 = vmatprep.subr.bf16.mxu0 %v6662_v52  ;;  %6334 = vmatprep.subr.bf16.mxu1 %v6663_v32  ;;  %v6690_v52 = vld [vmem:[%s7026_s30 + $0x150] sm:$0xff]  }
 0x7fc   : > { %v6691_v32 = vld [vmem:[%s7026_s30 + $0x1d0] sm:$0xff]  }
 0x7fe   : > { %6313 = vmatpush3.bf16.msra.mxu0 %v6664_v31  ;;  %6335 = vmatpush3.bf16.msra.mxu1 %v6665_v33  ;;  %v3621_v31 = vrot.slane %v7607_v8, %v3620_v25  ;;  %v3629_v33 = vrot.slane %v7607_v8, %v3628_v26 }
 0x7ff   : > { %6314 = vmatprep.subr.bf16.mxu0 %v6666_v37  ;;  %6336 = vmatprep.subr.bf16.mxu1 %v6667_v34  ;;  %v6692_v37 = vld [vmem:[%s7026_s30 + $0x110] sm:$0xff]  }
 0x800   : > { %v6693_v34 = vld [vmem:[%s7026_s30 + $0x190] sm:$0xff]  }
 0x802   : > { %6315 = vmatpush3.bf16.msra.mxu0 %v6668_v35  ;;  %6337 = vmatpush3.bf16.msra.mxu1 %v6669_v38  ;;  %v6694_v35 = vld [vmem:[%s7026_s30 + $0x158] sm:$0xff]  }
 0x803   : > { %6316 = vmatprep.subr.bf16.mxu0 %v6670_v18  ;;  %6338 = vmatprep.subr.bf16.mxu1 %v6671_v39  ;;  %v6695_v38 = vld [vmem:[%s7026_s30 + $0x1d8] sm:$0xff]  }
 0x806   : > { %6317 = vmatpush3.bf16.msra.mxu0 %v6672_v21  ;;  %6339 = vmatpush3.bf16.msra.mxu1 %v6673_v22 }
 0x807   : > { %6318 = vmatprep.subr.bf16.mxu0 %v6674_v45  ;;  %6340 = vmatprep.subr.bf16.mxu1 %v6675_v20 }
 0x80a   : > { %6319 = vmatpush3.bf16.msra.mxu0 %v6676_v28  ;;  %6341 = vmatpush3.bf16.msra.mxu1 %v6677_v29 }
 0x80b   : > { %6320 = vmatprep.subr.bf16.mxu0 %v6678_v46  ;;  %6342 = vmatprep.subr.bf16.mxu1 %v6679_v49  ;;  %v6696_v46 = vld [vmem:[%s7026_s30 + $0x118] sm:$0xff]  }
 0x80c   : > { %v6697_v49 = vld [vmem:[%s7026_s30 + $0x198] sm:$0xff]  }
 0x80e   : > { %6321 = vmatpush3.bf16.msra.mxu0 %v6680_v50  ;;  %6343 = vmatpush3.bf16.msra.mxu1 %v6681_v51 }
 0x80f   : > { %6350 = vmatprep.subr.bf16.mxu0 %v6682_v41  ;;  %6372 = vmatprep.subr.bf16.mxu1 %v6683_v47  ;;  %v6698_v41 = vld [vmem:[%s7026_s30 + $0x160] sm:$0xff]  }
 0x810   : > { %v6699_v47 = vld [vmem:[%s7026_s30 + $0x1e0] sm:$0xff]  }
 0x894   : > { %v4035_v55 = vpop.f32.mrb[20].mxu0  ;;  %v4076_v56 = vpop.f32.mrb[24].mxu1 }
 0x895   : > { %v4036_v57 = vadd.f32 %v4035_v55, %v3601_v43  ;;  %v4077_v30 = vadd.f32 %v4076_v56, %v3609_v44  ;;  %v4037_v58 = vpop.f32.mrb[21].mxu0  ;;  %v4078_v59 = vpop.f32.mrb[25].mxu1  ;;  %v6700_v55 = vld [vmem:[%s7026_s30 + $0x120] sm:$0xff]  }
 0x896   : > { %v4038_v60 = vadd.f32 %v4037_v58, %v3605_v36  ;;  %v4079_v61 = vadd.f32 %v4078_v59, %v3613_v27  ;;  %v4039_v62 = vpop.f32.mrb[22].mxu0  ;;  %v4080_v63 = vpop.f32.mrb[26].mxu1  ;;  %v6701_v56 = vld [vmem:[%s7026_s30 + $0x1a0] sm:$0xff]   ;;  %v6703_v58 = vld [vmem:[%s7026_s30 + $0x1e8] sm:$0xff]  }
 0x897   : > { %v4329_v1 = vmax.f32 %v4036_v57, 0.0  ;;  %v4331_v2 = vmax.f32 %v4077_v30, 0.0  ;;  %v4040_v53 = vpop.f32.mrb[23].mxu0  ;;  %v4081_v4 = vpop.f32.mrb[27].mxu1  ;;  %v3616_v57 = vsub.s32 4, %v7061_v13  ;;  %v6702_v30 = vld [vmem:[%s7026_s30 + $0x168] sm:$0xff]   ;;  %v3625_v62 = vrot.slane %v7607_v8, %v3624_v42 }
 0x898   : > { %v4330_v5 = vmax.f32 %v4038_v60, 0.0  ;;  %v4332_v6 = vmax.f32 %v4079_v61, 0.0  ;;  %v6704_v59 = vld [vmem:[%s7026_s30 + $0x128] sm:$0xff]   ;;  %v6706_v63 = vld [vmem:[%s7026_s30 + $0x170] sm:$0xff]   ;;  %v3637_v53 = vrot.slane %v7598_v9, %v7269_v7  ;;  %v3645_v4 = vrot.slane %v7598_v9, %v3612_v24  ;;  %v6744_v13 = vld [vmem:[%s7026_s30 + $0x238] sm:$0xff]  }
 0x899   : > { %v4345_v16 = vpack.c.bf16 %v4329_v1, %v4329_v1  ;;  %v4347_v15 = vpack.c.bf16 %v4331_v2, %v4331_v2  ;;  %v6705_v60 = vld [vmem:[%s7026_s30 + $0x1a8] sm:$0xff]   ;;  %v3617_v61 = vrot.slane %v7607_v8, %v3616_v57  ;;  %v6707_v1 = vld [vmem:[%s7026_s30 + $0x1f0] sm:$0xff]   ;;  %v3641_v2 = vrot.slane %v7598_v9, %v3608_v0 }
 0x89a   : > { %v4346_v3 = vpack.c.bf16 %v4330_v5, %v4330_v5  ;;  %v4348_v10 = vpack.c.bf16 %v4332_v6, %v4332_v6  ;;  %v6708_v42 = vld [vmem:[%s7026_s30 + $0x130] sm:$0xff]  }
 0x89b   : > { %v6709_v8 = vld [vmem:[%s7026_s30 + $0x1b0] sm:$0xff]  }
 0x89c   : > { %5424 = vmatprep.mubr.bf16.mxu0 %v4346_v3  ;;  %5464 = vmatprep.mubr.bf16.mxu1 %v4348_v10  ;;  %v6710_v3 = vld [vmem:[%s7026_s30 + $0x178] sm:$0xff]  }
 0x89d   : > { %5425 = vmatmul.mubr.bf16.vlgmr.msra.gmra.mrb[36].mxu0 %v4345_v16  ;;  %5465 = vmatmul.mubr.bf16.vlgmr.msra.gmra.mrb[40].mxu1 %v4347_v15  ;;  %v6711_v10 = vld [vmem:[%s7026_s30 + $0x1f8] sm:$0xff]  }
 0x89e   : > { %6351 = vmatpush3.bf16.msra.mxu0 %v6684_v11  ;;  %6373 = vmatpush3.bf16.msra.mxu1 %v6685_v12 }
 0x89f   : > { %6352 = vmatprep.subr.bf16.mxu0 %v6686_v54  ;;  %6374 = vmatprep.subr.bf16.mxu1 %v6687_v17 }
 0x8a2   : > { %6353 = vmatpush3.bf16.msra.mxu0 %v6688_v19  ;;  %6375 = vmatpush3.bf16.msra.mxu1 %v6689_v23  ;;  %v6712_v19 = vld [vmem:[%s7026_s30 + $0x138] sm:$0xff]  }
 0x8a3   : > { %6354 = vmatprep.subr.bf16.mxu0 %v6690_v52  ;;  %6376 = vmatprep.subr.bf16.mxu1 %v6691_v32  ;;  %v6713_v23 = vld [vmem:[%s7026_s30 + $0x1b8] sm:$0xff]  }
 0x8a4   : > { %v4117_v18 = vpop.f32.mrb[24].mxu0  ;;  %v4158_v39 = vpop.f32.mrb[28].mxu1 }
 0x8a5   : > { %v4119_v21 = vpop.f32.mrb[25].mxu0  ;;  %v4160_v22 = vpop.f32.mrb[29].mxu1  ;;  %v4118_v5 = vadd.f32 %v4117_v18, %v3617_v61  ;;  %v4159_v6 = vadd.f32 %v4158_v39, %v3625_v62  ;;  %v6716_v18 = vld [vmem:[%s7026_s30 + $0x200] sm:$0xff]   ;;  %v6728_v61 = vld [vmem:[%s7026_s30 + $0x218] sm:$0xff]  }
 0x8a6   : > { %v4120_v45 = vadd.f32 %v4119_v21, %v3621_v31  ;;  %v4161_v20 = vadd.f32 %v4160_v22, %v3629_v33  ;;  %v4121_v28 = vpop.f32.mrb[26].mxu0  ;;  %v4162_v29 = vpop.f32.mrb[30].mxu1  ;;  %6355 = vmatpush3.bf16.msra.mxu0 %v6692_v37  ;;  %6377 = vmatpush3.bf16.msra.mxu1 %v6693_v34  ;;  %v6714_v37 = vld [vmem:[%s7026_s30 + $0x240] sm:$0xff]  }
 0x8a7   : > { %v4122_v50 = vpop.f32.mrb[27].mxu0  ;;  %v4163_v51 = vpop.f32.mrb[31].mxu1  ;;  %6356 = vmatprep.subr.bf16.mxu0 %v6694_v35  ;;  %6378 = vmatprep.subr.bf16.mxu1 %v6695_v38  ;;  %v4333_v52 = vmax.f32 %v4118_v5, 0.0  ;;  %v4335_v32 = vmax.f32 %v4159_v6, 0.0  ;;  %v6715_v34 = vld [vmem:[%s7026_s30 + $0x2c0] sm:$0xff]   ;;  %v6719_v28 = vld [vmem:[%s7026_s30 + $0x2c8] sm:$0xff]   ;;  %v3633_v6 = vrot.slane %v7598_v9, %v7064_v14 }
 0x8a8   : > { %v4334_v43 = vmax.f32 %v4120_v45, 0.0  ;;  %v4336_v44 = vmax.f32 %v4161_v20, 0.0  ;;  %v6717_v22 = vld [vmem:[%s7026_s30 + $0x280] sm:$0xff]   ;;  %v6718_v20 = vld [vmem:[%s7026_s30 + $0x248] sm:$0xff]   ;;  %v6722_v50 = vld [vmem:[%s7026_s30 + $0x250] sm:$0xff]  }
 0x8a9   : > { %v4349_v39 = vpack.c.bf16 %v4333_v52, %v4333_v52  ;;  %v4351_v21 = vpack.c.bf16 %v4335_v32, %v4335_v32  ;;  %v6723_v51 = vld [vmem:[%s7026_s30 + $0x2d0] sm:$0xff]   ;;  %v6736_v5 = vld [vmem:[%s7026_s30 + $0x228] sm:$0xff]   ;;  %v6747_v52 = vld [vmem:[%s7026_s30 + $0x3c0] sm:$0xff]  }
 0x8aa   : > { %v4350_v36 = vpack.c.bf16 %v4334_v43, %v4334_v43  ;;  %v4352_v27 = vpack.c.bf16 %v4336_v44, %v4336_v44  ;;  %6357 = vmatpush3.bf16.msra.mxu0 %v6696_v46  ;;  %6379 = vmatpush3.bf16.msra.mxu1 %v6697_v49  ;;  %v6720_v46 = vld [vmem:[%s7026_s30 + $0x208] sm:$0xff]   ;;  %v6725_v43 = vld [vmem:[%s7026_s30 + $0x290] sm:$0xff]   ;;  %v6726_v44 = vld [vmem:[%s7026_s30 + $0x258] sm:$0xff]  }
 0x8ab   : > { %6358 = vmatprep.subr.bf16.mxu0 %v6698_v41  ;;  %6380 = vmatprep.subr.bf16.mxu1 %v6699_v47  ;;  %v6721_v49 = vld [vmem:[%s7026_s30 + $0x288] sm:$0xff]   ;;  %v3649_v41 = vrot.slane %v7598_v9, %v3616_v57  ;;  %v6724_v47 = vld [vmem:[%s7026_s30 + $0x210] sm:$0xff]  }
 0x8ac   : > { %5504 = vmatprep.mubr.bf16.mxu0 %v4350_v36  ;;  %5544 = vmatprep.mubr.bf16.mxu1 %v4352_v27 }
 0x8ae   : > { %6359 = vmatpush3.bf16.msra.mxu0 %v6700_v55  ;;  %6381 = vmatpush3.bf16.msra.mxu1 %v6701_v56  ;;  %v6727_v55 = vld [vmem:[%s7026_s30 + $0x2d8] sm:$0xff]  }
 0x8af   : > { %6360 = vmatprep.subr.bf16.mxu0 %v6702_v30  ;;  %6382 = vmatprep.subr.bf16.mxu1 %v6703_v58 }
 0x8b2   : > { %6361 = vmatpush3.bf16.msra.mxu0 %v6704_v59  ;;  %6383 = vmatpush3.bf16.msra.mxu1 %v6705_v60 }
 0x8b3   : > { %6362 = vmatprep.subr.bf16.mxu0 %v6706_v63  ;;  %6384 = vmatprep.subr.bf16.mxu1 %v6707_v1  ;;  %v6729_v1 = vld [vmem:[%s7026_s30 + $0x298] sm:$0xff]  }
 0x8b4   : > { %v7671_v0 = vpop.f32.mrb[28].mxu0  ;;  %v4240_v11 = vpop.f32.mrb[32].mxu1 }
 0x8b5   : > { %v7673_v12 = vadd.f32 %v4240_v11, %v3641_v2  ;;  %v4201_v7 = vpop.f32.mrb[29].mxu0  ;;  %v4242_v16 = vpop.f32.mrb[33].mxu1  ;;  %v6730_v2 = vld [vmem:[%s7026_s30 + $0x260] sm:$0xff]   ;;  %v6739_v11 = vld [vmem:[%s7026_s30 + $0x2f0] sm:$0xff]   ;;  %v4200_v14 = vadd.f32 %v7671_v0, %v3633_v6 }
 0x8b6   : > { %v4202_v24 = vadd.f32 %v4201_v7, %v3637_v53  ;;  %v4243_v15 = vadd.f32 %v4242_v16, %v3645_v4  ;;  %v4203_v54 = vpop.f32.mrb[30].mxu0  ;;  %v4244_v17 = vpop.f32.mrb[34].mxu1  ;;  %6363 = vmatpush3.bf16.msra.mxu0 %v6708_v42  ;;  %6385 = vmatpush3.bf16.msra.mxu1 %v6709_v8  ;;  %v6732_v53 = vld [vmem:[%s7026_s30 + $0x220] sm:$0xff]   ;;  %v6734_v42 = vld [vmem:[%s7026_s30 + $0x268] sm:$0xff]   ;;  %v3653_v7 = vrot.slane %v7598_v9, %v3620_v25 }
 0x8b7   : > { %v4204_v31 = vpop.f32.mrb[31].mxu0  ;;  %v4245_v33 = vpop.f32.mrb[35].mxu1  ;;  %6364 = vmatprep.subr.bf16.mxu0 %v6710_v3  ;;  %6386 = vmatprep.subr.bf16.mxu1 %v6711_v10  ;;  %v6733_v4 = vld [vmem:[%s7026_s30 + $0x2a0] sm:$0xff]   ;;  %v6735_v8 = vld [vmem:[%s7026_s30 + $0x2e8] sm:$0xff]   ;;  %v6738_v10 = vld [vmem:[%s7026_s30 + $0x270] sm:$0xff]   ;;  %v3661_v16 = vrot.slane %v7598_v9, %v3628_v26  ;;  %v4337_v9 = vmax.f32 %v4200_v14, 0.0 }
 0x8b8   : > { %v4338_v35 = vmax.f32 %v4202_v24, 0.0  ;;  %v4340_v38 = vmax.f32 %v4243_v15, 0.0  ;;  %v6737_v3 = vld [vmem:[%s7026_s30 + $0x2a8] sm:$0xff]   ;;  %v6740_v24 = vld [vmem:[%s7026_s30 + $0x230] sm:$0xff]   ;;  %v6742_v54 = vld [vmem:[%s7026_s30 + $0x278] sm:$0xff]   ;;  %v4339_v0 = vmax.f32 %v7673_v12, 0.0 }
 0x8b9   : > { %v6741_v15 = vld [vmem:[%s7026_s30 + $0x2b0] sm:$0xff]   ;;  %v6743_v17 = vld [vmem:[%s7026_s30 + $0x2f8] sm:$0xff]   ;;  %v6748_v33 = vld [vmem:[%s7026_s30 + $0x300] sm:$0xff]  }
 0x8ba   : > { %6365 = vmatpush3.bf16.msra.mxu0 %v6712_v19  ;;  %6387 = vmatpush3.bf16.msra.mxu1 %v6713_v23  ;;  %v4354_v45 = vpack.c.bf16 %v4338_v35, %v4338_v35  ;;  %v4356_v29 = vpack.c.bf16 %v4340_v38, %v4340_v38  ;;  %v6745_v26 = vld [vmem:[%s7026_s30 + $0x2b8] sm:$0xff]   ;;  %v6746_v23 = vld [vmem:[%s7026_s30 + $0x340] sm:$0xff]   ;;  %v4355_v35 = vpack.c.bf16 %v4339_v0, %v4339_v0  ;;  %v6750_v38 = vld [vmem:[%s7026_s30 + $0x348] sm:$0xff]  }
 0x8bb   : > { %6394 = vmatprep.subr.bf16.mxu0 %v6714_v37  ;;  %6416 = vmatprep.subr.bf16.mxu1 %v6715_v34  ;;  %v4353_v37 = vpack.c.bf16 %v4337_v9, %v4337_v9  ;;  %v6749_v34 = vld [vmem:[%s7026_s30 + $0x380] sm:$0xff]   ;;  %v6751_v12 = vld [vmem:[%s7026_s30 + $0x3c8] sm:$0xff]  }
 0x8bc   : > { %v6132_v6 = vld [vmem:[%s779_s28] ss:$0 sm:$0xff] }
 0x8bd   : > { %5505 = vmatmul.mubr.bf16.vlgmr.msra.gmra.mrb[40].mxu0 %v4349_v39  ;;  %5545 = vmatmul.mubr.bf16.vlgmr.msra.gmra.mrb[44].mxu1 %v4351_v21  ;;  %v6752_v21 = vld [vmem:[%s7026_s30 + $0x308] sm:$0xff]  }
 0x8be   : > { %6395 = vmatpush3.bf16.msra.mxu0 %v6716_v18  ;;  %5584 = vmatprep.mubr.bf16.mxu0 %v4354_v45  ;;  %v6754_v45 = vld [vmem:[%s7026_s30 + $0x350] sm:$0xff]  }
 0x8bf   : > { %6417 = vmatpush3.bf16.msra.mxu1 %v6717_v22  ;;  %5624 = vmatprep.mubr.bf16.mxu1 %v4356_v29  ;;  %v6753_v22 = vld [vmem:[%s7026_s30 + $0x388] sm:$0xff]   ;;  %v6757_v29 = vld [vmem:[%s7026_s30 + $0x390] sm:$0xff]  }
 0x8c0   : > { %6396 = vmatprep.subr.bf16.mxu0 %v6718_v20  ;;  %6418 = vmatprep.subr.bf16.mxu1 %v6719_v28  ;;  %v6755_v20 = vld [vmem:[%s7026_s30 + $0x3d0] sm:$0xff]  }
 0x8c1   : > { %v6756_v28 = vld [vmem:[%s7026_s30 + $0x310] sm:$0xff]  }
 0x8c2   : > { %6397 = vmatpush3.bf16.msra.mxu0 %v6720_v46  ;;  %v6758_v46 = vld [vmem:[%s7026_s30 + $0x358] sm:$0xff]  }
 0x8c3   : > { %6419 = vmatpush3.bf16.msra.mxu1 %v6721_v49  ;;  %6398 = vmatprep.subr.bf16.mxu0 %v6722_v50  ;;  %v6759_v49 = vld [vmem:[%s7026_s30 + $0x3d8] sm:$0xff]  }
 0x8c4   : > { %v4281_v36 = vpop.f32.mrb[32].mxu0  ;;  %v4322_v27 = vpop.f32.mrb[36].mxu1  ;;  %6420 = vmatprep.subr.bf16.mxu1 %v6723_v51  ;;  %v6760_v50 = vld [vmem:[%s7026_s30 + $0x318] sm:$0xff]  }
 0x8c5   : > { %v7694_v56 = vadd.f32 %v4281_v36, %v3649_v41  ;;  %v7697_v30 = vadd.f32 %v4322_v27, %v7603_v40  ;;  %v4283_v57 = vpop.f32.mrb[33].mxu0  ;;  %v4324_v58 = vpop.f32.mrb[37].mxu1  ;;  %v6731_v40 = vld [vmem:[%s7026_s30 + $0x2e0] sm:$0xff]   ;;  %v6761_v51 = vld [vmem:[%s7026_s30 + $0x398] sm:$0xff]   ;;  %v6766_v36 = vld [vmem:[%s7026_s30 + $0x368] sm:$0xff]  }
 0x8c6   : > { %v4285_v59 = vpop.f32.mrb[34].mxu0  ;;  %v4326_v60 = vpop.f32.mrb[38].mxu1  ;;  %6399 = vmatpush3.bf16.msra.mxu0 %v6724_v47  ;;  %v4284_v19 = vadd.f32 %v4283_v57, %v3653_v7  ;;  %v4325_v25 = vadd.f32 %v4324_v58, %v3661_v16  ;;  %v6762_v41 = vld [vmem:[%s7026_s30 + $0x360] sm:$0xff]   ;;  %v6767_v27 = vld [vmem:[%s7026_s30 + $0x3e8] sm:$0xff]   ;;  %v6770_v58 = vld [vmem:[%s7026_s30 + $0x370] sm:$0xff]  }
 0x8c7   : > { %6421 = vmatpush3.bf16.msra.mxu1 %v6725_v43  ;;  %v4286_v62 = vpop.f32.mrb[35].mxu0  ;;  %v4327_v63 = vpop.f32.mrb[39].mxu1  ;;  %6400 = vmatprep.subr.bf16.mxu0 %v6726_v44  ;;  %v6763_v47 = vld [vmem:[%s7026_s30 + $0x3e0] sm:$0xff]   ;;  %v6769_v57 = vld [vmem:[%s7026_s30 + $0x3a8] sm:$0xff]   ;;  %v6771_v59 = vld [vmem:[%s7026_s30 + $0x3f0] sm:$0xff]  }
 0x8c8   : > { %6422 = vmatprep.subr.bf16.mxu1 %v6727_v55  ;;  %v4342_v32 = vmax.f32 %v4284_v19, 0.0  ;;  %v4344_v31 = vmax.f32 %v4325_v25, 0.0  ;;  %v6764_v43 = vld [vmem:[%s7026_s30 + $0x320] sm:$0xff]   ;;  %v6768_v55 = vld [vmem:[%s7026_s30 + $0x328] sm:$0xff]   ;;  %v6772_v60 = vld [vmem:[%s7026_s30 + $0x330] sm:$0xff]  }
 0x8c9   : > { %v6765_v44 = vld [vmem:[%s7026_s30 + $0x3a0] sm:$0xff]   ;;  %v6774_v62 = vld [vmem:[%s7026_s30 + $0x378] sm:$0xff]  }
 0x8ca   : > { %6401 = vmatpush3.bf16.msra.mxu0 %v6728_v61  ;;  %v4358_v18 = vpack.c.bf16 %v4342_v32, %v4342_v32  ;;  %v4360_v39 = vpack.c.bf16 %v4344_v31, %v4344_v31  ;;  %v6773_v61 = vld [vmem:[%s7026_s30 + $0x3b0] sm:$0xff]   ;;  %v6775_v63 = vld [vmem:[%s7026_s30 + $0x3f8] sm:$0xff]  }
 0x8cb   : > { %6423 = vmatpush3.bf16.msra.mxu1 %v6729_v1  ;;  %6402 = vmatprep.subr.bf16.mxu0 %v6730_v2  ;;  %v6776_v1 = vld [vmem:[%s7026_s30 + $0x338] sm:$0xff]   ;;  %v4341_v2 = vmax.f32 %v7694_v56, 0.0 }
 0x8cc   : > { %6424 = vmatprep.subr.bf16.mxu1 %v6731_v40  ;;  %v6777_v40 = vld [vmem:[%s7026_s30 + $0x3b8] sm:$0xff]  }
 0x8ce   : > { %6403 = vmatpush3.bf16.msra.mxu0 %v6732_v53  ;;  %v4343_v53 = vmax.f32 %v7697_v30, 0.0 }
 0x8cf   : > { %6425 = vmatpush3.bf16.msra.mxu1 %v6733_v4  ;;  %6404 = vmatprep.subr.bf16.mxu0 %v6734_v42  ;;  %v4357_v4 = vpack.c.bf16 %v4341_v2, %v4341_v2 }
 0x8d0   : > { %6426 = vmatprep.subr.bf16.mxu1 %v6735_v8  ;;  %v4359_v42 = vpack.c.bf16 %v4343_v53, %v4343_v53 }
 0x8d2   : > { %6405 = vmatpush3.bf16.msra.mxu0 %v6736_v5 }
 0x8d3   : > { %6427 = vmatpush3.bf16.msra.mxu1 %v6737_v3  ;;  %6406 = vmatprep.subr.bf16.mxu0 %v6738_v10 }
 0x8d4   : > { %6428 = vmatprep.subr.bf16.mxu1 %v6739_v11 }
 0x8d6   : > { %6407 = vmatpush3.bf16.msra.mxu0 %v6740_v24 }
 0x8d7   : > { %6429 = vmatpush3.bf16.msra.mxu1 %v6741_v15  ;;  %6408 = vmatprep.subr.bf16.mxu0 %v6742_v54 }
 0x8d8   : > { %6430 = vmatprep.subr.bf16.mxu1 %v6743_v17 }
 0x8da   : > { %6409 = vmatpush3.bf16.msra.mxu0 %v6744_v13 }
 0x8db   : > { %6431 = vmatpush3.bf16.msra.mxu1 %v6745_v26  ;;  %6438 = vmatprep.subr.bf16.mxu0 %v6746_v23 }
 0x8dc   : > { %6460 = vmatprep.subr.bf16.mxu1 %v6747_v52 }
 0x8dd   : > { %5585 = vmatmul.mubr.bf16.vlgmr.msra.gmra.mrb[44].mxu0 %v4353_v37 }
 0x8de   : > { %5625 = vmatmul.mubr.bf16.vlgmr.msra.gmra.mrb[48].mxu1 %v4355_v35  ;;  %6439 = vmatpush3.bf16.msra.mxu0 %v6748_v33 }
 0x8df   : > { %5664 = vmatprep.mubr.bf16.mxu0 %v4358_v18  ;;  %6461 = vmatpush3.bf16.msra.mxu1 %v6749_v34 }
 0x8e0   : > { %5704 = vmatprep.mubr.bf16.mxu1 %v4360_v39  ;;  %6440 = vmatprep.subr.bf16.mxu0 %v6750_v38 }
 0x8e1   : > { %6462 = vmatprep.subr.bf16.mxu1 %v6751_v12 }
 0x8e2   : > { %6441 = vmatpush3.bf16.msra.mxu0 %v6752_v21 }
 0x8e3   : > { %6463 = vmatpush3.bf16.msra.mxu1 %v6753_v22  ;;  %6442 = vmatprep.subr.bf16.mxu0 %v6754_v45 }
 0x8e4   : > { %6464 = vmatprep.subr.bf16.mxu1 %v6755_v20 }
 0x8e6   : > { %6443 = vmatpush3.bf16.msra.mxu0 %v6756_v28 }
 0x8e7   : > { %6465 = vmatpush3.bf16.msra.mxu1 %v6757_v29  ;;  %6444 = vmatprep.subr.bf16.mxu0 %v6758_v46 }
 0x8e8   : > { %6466 = vmatprep.subr.bf16.mxu1 %v6759_v49 }
 0x8ea   : > { %6445 = vmatpush3.bf16.msra.mxu0 %v6760_v50 }
 0x8eb   : > { %6467 = vmatpush3.bf16.msra.mxu1 %v6761_v51  ;;  %6446 = vmatprep.subr.bf16.mxu0 %v6762_v41 }
 0x8ec   : > { %6468 = vmatprep.subr.bf16.mxu1 %v6763_v47 }
 0x8ee   : > { %6447 = vmatpush3.bf16.msra.mxu0 %v6764_v43 }
 0x8ef   : > { %6469 = vmatpush3.bf16.msra.mxu1 %v6765_v44  ;;  %6448 = vmatprep.subr.bf16.mxu0 %v6766_v36 }
 0x8f0   : > { %6470 = vmatprep.subr.bf16.mxu1 %v6767_v27 }
 0x8f2   : > { %6449 = vmatpush3.bf16.msra.mxu0 %v6768_v55 }
 0x8f3   : > { %6471 = vmatpush3.bf16.msra.mxu1 %v6769_v57  ;;  %6450 = vmatprep.subr.bf16.mxu0 %v6770_v58 }
 0x8f4   : > { %6472 = vmatprep.subr.bf16.mxu1 %v6771_v59 }
 0x8f6   : > { %6451 = vmatpush3.bf16.msra.mxu0 %v6772_v60 }
 0x8f7   : > { %6473 = vmatpush3.bf16.msra.mxu1 %v6773_v61  ;;  %6452 = vmatprep.subr.bf16.mxu0 %v6774_v62 }
 0x8f8   : > { %6474 = vmatprep.subr.bf16.mxu1 %v6775_v63 }
 0x8fa   : > { %6453 = vmatpush3.bf16.msra.mxu0 %v6776_v1 }
 0x8fb   : > { %6475 = vmatpush3.bf16.msra.mxu1 %v6777_v40 }
 0x8fd   : > { %5665 = vmatmul.mubr.bf16.vlgmr.msra.gmra.mrb[48].mxu0 %v4357_v4  ;;  %v6262_v4 = vld [vmem:[%s807_s2] ss:$0 sm:$0xff] }
 0x8fe   : > { %5705 = vmatmul.mubr.bf16.vlgmr.msra.gmra.mrb[52].mxu1 %v4359_v42 }
 0x970   : > { %v6322_v8 = vpop.f32.mrb[36].mxu0  ;;  %v6344_v5 = vpop.f32.mrb[40].mxu1 }
 0x971   : > { %v6323_v56 = vpop.f32.mrb[37].mxu0  ;;  %v6345_v3 = vpop.f32.mrb[41].mxu1 }
 0x972   : > { %v6324_v10 = vadd.f32 %v6323_v56, %v6322_v8  ;;  %v6346_v11 = vadd.f32 %v6345_v3, %v6344_v5  ;;  %v6325_v7 = vpop.f32.mrb[38].mxu0  ;;  %v6347_v30 = vpop.f32.mrb[42].mxu1 }
 0x973   : > { %v6326_v16 = vpop.f32.mrb[39].mxu0  ;;  %v6348_v24 = vpop.f32.mrb[43].mxu1 }
 0x974   : > { %v5427_v14 = vadd.f32 %v6324_v10, %v6132_v6 }
 0x976   : > { %v5467_v15 = vadd.f32 %v6346_v11, %v5427_v14 }
 0x990   : > { %v6366_v54 = vpop.f32.mrb[40].mxu0  ;;  %v6388_v17 = vpop.f32.mrb[44].mxu1 }
 0x991   : > { %v6367_v19 = vpop.f32.mrb[41].mxu0  ;;  %v6389_v25 = vpop.f32.mrb[45].mxu1 }
 0x992   : > { %v6368_v13 = vadd.f32 %v6367_v19, %v6366_v54  ;;  %v6390_v9 = vadd.f32 %v6389_v25, %v6388_v17  ;;  %v6369_v26 = vpop.f32.mrb[42].mxu0  ;;  %v6391_v23 = vpop.f32.mrb[46].mxu1 }
 0x993   : > { %v6370_v0 = vpop.f32.mrb[43].mxu0  ;;  %v6392_v52 = vpop.f32.mrb[47].mxu1 }
 0x994   : > { %v5507_v32 = vadd.f32 %v6368_v13, %v5467_v15 }
 0x996   : > { %v5547_v31 = vadd.f32 %v6390_v9, %v5507_v32 }
 0x9b0   : > { %v6410_v33 = vpop.f32.mrb[44].mxu0 }
 0x9b1   : > { %v6432_v37 = vpop.f32.mrb[48].mxu1  ;;  %v6411_v34 = vpop.f32.mrb[45].mxu0 }
 0x9b2   : > { %v6412_v35 = vadd.f32 %v6411_v34, %v6410_v33  ;;  %v6433_v38 = vpop.f32.mrb[49].mxu1  ;;  %v6413_v18 = vpop.f32.mrb[46].mxu0 }
 0x9b3   : > { %v6434_v12 = vadd.f32 %v6433_v38, %v6432_v37  ;;  %v6435_v39 = vpop.f32.mrb[50].mxu1  ;;  %v6414_v21 = vpop.f32.mrb[47].mxu0 }
 0x9b4   : > { %v5587_v22 = vadd.f32 %v6412_v35, %v5547_v31  ;;  %v6436_v45 = vpop.f32.mrb[51].mxu1 }
 0x9b6   : > { %v5627_v20 = vadd.f32 %v6434_v12, %v5587_v22 }
 0x9d0   : > { %v6454_v28 = vpop.f32.mrb[48].mxu0 }
 0x9d1   : > { %v6476_v29 = vpop.f32.mrb[52].mxu1  ;;  %v6455_v46 = vpop.f32.mrb[49].mxu0 }
 0x9d2   : > { %v6456_v49 = vadd.f32 %v6455_v46, %v6454_v28  ;;  %v6477_v50 = vpop.f32.mrb[53].mxu1  ;;  %v6457_v51 = vpop.f32.mrb[50].mxu0 }
 0x9d3   : > { %v6478_v41 = vadd.f32 %v6477_v50, %v6476_v29  ;;  %v6479_v47 = vpop.f32.mrb[54].mxu1  ;;  %v6458_v43 = vpop.f32.mrb[51].mxu0 }
 0x9d4   : > { %v5667_v44 = vadd.f32 %v6456_v49, %v5627_v20  ;;  %v6480_v36 = vpop.f32.mrb[55].mxu1 }
 0x9d6   : > { %v5707_v27 = vadd.f32 %v6478_v41, %v5667_v44 }
 0x9d8   : > { %v5712_v55 = vadd.f32 %v5707_v27, %v7494_v48  ;;  %v6261_v48 = vld [vmem:[%s800_s6] ss:$0 sm:$0xff] }
 0x9da   : > { %v5715_v57 = vsel %vm884_vm1, %v5712_v55, 0.0 }
 0x9db   : > { %5716 = vadd.xlane.f32.xlu0 %v5715_v57 }
 0xa68   : > { %v5717_v58 = vpop.xlane.xlu0 %5716 }
 0xa69   : > { %v5718_v59 = vmul.f32 0.015625, %v5717_v58 }
 0xa6b   : > { %v5719_v60 = vsub.f32 %v5712_v55, %v5718_v59 }
 0xa6d   : > { %v5720_v61 = vmul.f32 %v5719_v60, %v5719_v60 }
 0xa6f   : > { %v5721_v62 = vsel %vm884_vm1, %v5720_v61, 0.0 }
 0xa70   : > { %5722 = vadd.xlane.f32.xlu1 %v5721_v62 }
 0xafd   : > { %v5723_v63 = vpop.xlane.xlu1 %5722 }
 0xafe   : > { %v5724_v1 = vmul.f32 0.015625, %v5723_v63 }
 0xb00   : > { %v5725_v2 = vadd.f32 1e-05, %v5724_v1 }
 0xb02   : > { %6812 = vrsqrt.f32 %v5725_v2 }
 0xb0c   : > { %v6813_v40 = vpop.eup %6812 }
 0xb0d   : > { %v5727_v53 = vmul.f32 %v6813_v40, %v5719_v60 }
 0xb0f   : > { %v5734_v42 = vmul.f32 %v6261_v48, %v5727_v53 }
 0xb11   : > { %v5741_v8 = vadd.f32 %v6262_v4, %v5734_v42 }
 0xb13   : > { %5742 = vst.msk [vmem:[%s7837_s3] sm:$0xff] %vm884_vm1, %v5741_v8 }
 0xb14 PF: > { %s7840_s18 = sld [smem:[#allocation4_spill]]  ;;  %s7841_s25 = sld [smem:[#allocation2_spill]] }
 0xb15   : > { %s7842_s26 = sld [smem:[#allocation3_spill]]  ;;  %s7843_s27 = sld [smem:[#allocation5_spill]] }
 0xb16   : > { %s7844_s28 = sld [smem:[#allocation6_spill]] }
 0xb1a   : > { %s23_s29 = sadd.s32 1, %s7840_s18  }
 0xb1b   : > { %p20_p8 = scmp.ge.s32.totalorder %s23_s29, 8  }
 0xb1d   :  { %22 = sbr.rel (!%p20_p8) target bundleno = 8 (0x8), region = 142 }

</bundles_post_ra>
